<compile_context>
chip_gen: v7x
topology: tpu7x:2x2x1
jax: 0.10.0
libtpu: 0.0.40
codegen_flags: <defaults>
</compile_context>

<pallas_src>
import functools

import jax
import jax.numpy as jnp
import numpy as np
from jax.experimental import pallas as pl
from jax.experimental.pallas import tpu as pltpu


def _rup(v, m):
    return ((v + m - 1) // m) * m


# -----------------------------------------------------------------------------
# Parameter initialization (deterministic, mirrors the PyTorch module's shapes)
# -----------------------------------------------------------------------------
def init_params(key, input_dim, hidden_dim, num_layers, diff_steps):
    H = hidden_dim
    keys = iter(jax.random.split(key, 64))

    def unif(shape, bound):
        return jax.random.uniform(next(keys), shape, jnp.float32, -bound, bound)

    def gru_layer(in_dim):
        b = 1.0 / np.sqrt(H)
        # PyTorch layout: weight_ih (3H, in), weight_hh (3H, H), gate order r,z,n
        return (unif((3 * H, in_dim), b), unif((3 * H, H), b),
                unif((3 * H,), b), unif((3 * H,), b))

    def linear(in_d, out_d):
        b = 1.0 / np.sqrt(in_d)
        return unif((out_d, in_d), b), unif((out_d,), b)

    params = {}
    params['enc'] = [gru_layer(input_dim if l == 0 else H) for l in range(num_layers)]
    params['dec'] = [gru_layer(H) for _ in range(num_layers)]
    params['proj1'] = linear(H, H)
    params['proj2'] = linear(H, H)
    params['inp_fc'] = linear(input_dim + H, H)
    params['init_h_fc'] = linear(H, H)
    params['init_y_fc'] = linear(H, input_dim)   # present in __init__, unused in forward
    params['out_fc'] = linear(H, input_dim)

    # DiffusionEmbedding table: (diff_steps, H), dim = H/2 sin/cos halves
    half = H // 2
    steps = np.arange(diff_steps, dtype=np.float64)[:, None]
    freqs = (10.0 ** (np.arange(half, dtype=np.float64) / (half - 1) * 4.0))[None, :]
    table = steps * freqs
    params['emb_table'] = jnp.asarray(
        np.concatenate([np.sin(table), np.cos(table)], axis=1), jnp.float32)
    return params


# -----------------------------------------------------------------------------
# ONE-TIME parameter fusion / slab packing (hoisted out of the per-call path).
# -----------------------------------------------------------------------------
def prepare_fused_params(params, *, input_dim, hidden_dim, num_layers):
    H = hidden_dim
    assert H % 8 == 0, "hidden_dim must be a multiple of 8"
    G = _rup(H, 128)          # per-gate lane stride (gates tile-aligned at 0/G/2G)
    W3 = 3 * G

    def pad_gates(w):
        # w: (rows, 3H) gate-packed r|z|n  ->  (rows, 3G), gate g at cols [gG, gG+H)
        rows = w.shape[0]
        out = jnp.zeros((rows, W3), jnp.float32)
        for g in range(3):
            out = out.at[:, g * G:g * G + H].set(w[:, g * H:(g + 1) * H])
        return out

    def gru_slab(Wih, Whh, bih, bhh, wn_fused=None):
        # Slab rows: [0:ip)=Wih (padded), [ip:ip+H)=Whh, [ip+H:ip+H+8)=bias block
        # (row 0: bih + bhh_{r,z} folded; row 1: bhh_n in the n-gate lanes),
        # optionally followed by the fused noise->gates matrix for dec layer 0.
        in_dim = Wih.shape[1]
        ip = _rup(in_dim, 8)
        wih_p = jnp.zeros((ip, W3), jnp.float32).at[:in_dim].set(pad_gates(Wih.T))
        whh_p = pad_gates(Whh.T)                                   # (H, 3G)
        bias_pre = jnp.concatenate([bih[:H] + bhh[:H],
                                    bih[H:2 * H] + bhh[H:2 * H],
                                    bih[2 * H:]]).reshape(1, 3 * H)
        bias_block = jnp.zeros((8, W3), jnp.float32)
        bias_block = bias_block.at[0:1].set(pad_gates(bias_pre))
        bias_block = bias_block.at[1, 2 * G:2 * G + H].set(bhh[2 * H:])
        blocks = [wih_p, whh_p, bias_block]
        if wn_fused is not None:
            wn_rows = _rup(wn_fused.shape[0], 8)
            blocks.append(jnp.zeros((wn_rows, W3), jnp.float32)
                          .at[:wn_fused.shape[0]].set(wn_fused))
        return jnp.concatenate(blocks, axis=0)

    p1W, p1b = params['proj1']
    p2W, p2b = params['proj2']
    hW, hb = params['init_h_fc']
    inpW, inpb = params['inp_fc']
    outW, outb = params['out_fc']
    inpWt = inpW.T                                                 # (input_dim + H, H)
    inpWn, inpWf = inpWt[:input_dim], inpWt[input_dim:]

    # Dense slab (width H): p1W | p2W | hW | inpWf | outW(padded) | bias rows.
    dense = jnp.zeros((5 * H + 8, H), jnp.float32)
    dense = dense.at[0:H].set(p1W.T)
    dense = dense.at[H:2 * H].set(p2W.T)
    dense = dense.at[2 * H:3 * H].set(hW.T)
    dense = dense.at[3 * H:4 * H].set(inpWf)
    dense = dense.at[4 * H:5 * H, :input_dim].set(outW.T)
    dense = dense.at[5 * H + 0, :].set(p1b)
    dense = dense.at[5 * H + 1, :].set(p2b)
    dense = dense.at[5 * H + 2, :].set(hb)
    dense = dense.at[5 * H + 3, :].set(inpb)
    dense = dense.at[5 * H + 4, :input_dim].set(outb)

    enc_slabs = [gru_slab(*params['enc'][l]) for l in range(num_layers)]
    # Fold inpWn into decoder layer-0's input-gate matrix (done once, f32-exact).
    dec_Wih0 = params['dec'][0][0]
    wn_fused = jnp.dot(inpWn, pad_gates(dec_Wih0.T),
                       precision=jax.lax.Precision.HIGHEST)        # (input_dim, 3G)
    dec_slabs = [gru_slab(*params['dec'][0], wn_fused=wn_fused)]
    dec_slabs += [gru_slab(*params['dec'][l]) for l in range(1, num_layers)]

    return {'enc': enc_slabs, 'dec': dec_slabs, 'dense': dense,
            'emb_table': params['emb_table']}


# -----------------------------------------------------------------------------
# Pallas kernel
# -----------------------------------------------------------------------------
def make_kernel(input_dim, H, num_layers, prefix_len, pred_len, Bp):
    G = _rup(H, 128)
    enc_in = [input_dim] + [H] * (num_layers - 1)
    dec_in = [H] * num_layers

    def gru_offsets(in_dim):
        ip = _rup(in_dim, 8)
        return ip, ip + H, ip + H + 8        # o_whh, o_bias, o_wn

    def kernel(*refs):
        it = iter(refs)
        x_ref = next(it)                      # (prefix_len*Bp, input_dim)
        noise_ref = next(it)                  # (pred_len*Bp,  input_dim)
        emb_ref = next(it)                    # (Bp, H)
        enc_refs = [next(it) for _ in range(num_layers)]
        dec_refs = [next(it) for _ in range(num_layers)]
        dense_ref = next(it)
        out_ref = next(it)                    # (pred_len*Bp, input_dim)
        seq_buf = next(it)                    # scratch (max_T*Bp, H)

        def dot(a, b):
            return jnp.dot(a, b, preferred_element_type=jnp.float32)

        def load_gru(ref, in_dim):
            o_whh, o_bias, _ = gru_offsets(in_dim)
            wih = ref[0:in_dim, :]                               # (in, 3G)
            whh = ref[o_whh:o_whh + H, :]                        # (H, 3G)
            bpre = ref[o_bias:o_bias + 1, :]                     # (1, 3G)
            bhhn = ref[o_bias + 1:o_bias + 2, 2 * G:2 * G + H]   # (1, H)
            return wih, whh, bpre, bhhn

        def run_layer(gi_all, T, whh, bhhn, h, store, gi_extra=None):
            # Serial recurrence; T is small and static -> fully unrolled.
            # TODO(synk): switch to lax.fori_loop(..., unroll=k) if T ever
            # exceeds ~32 (code-size / live-range guard).
            for t in range(T):
                gi = gi_all[t * Bp:(t + 1) * Bp, :]              # sublane-aligned
                if gi_extra is not None:
                    gi = gi + gi_extra                           # off the h-chain
                gh = dot(h, whh)                                 # (Bp, 3G)
                # r and z share ONE sigmoid; all gate slices 128-lane aligned.
                rz = jax.nn.sigmoid(gi[:, :2 * G] + gh[:, :2 * G])
                r = rz[:, :H]
                z = rz[:, G:G + H]
                n = jnp.tanh(gi[:, 2 * G:2 * G + H] +
                             r * (gh[:, 2 * G:2 * G + H] + bhhn))
                h = (1.0 - z) * n + z * h
                if store:
                    seq_buf[t * Bp:(t + 1) * Bp, :] = h
            return h

        zero_h = jnp.zeros((Bp, H), jnp.float32)

        # ---------------- encoder GRU (initial hidden = 0) ----------------
        wih, whh, bpre, bhhn = load_gru(enc_refs[0], enc_in[0])
        gi_all = dot(x_ref[...], wih) + bpre
        h = run_layer(gi_all, prefix_len, whh, bhhn, zero_h,
                      store=(num_layers > 1))
        for l in range(1, num_layers):
            wih, whh, bpre, bhhn = load_gru(enc_refs[l], enc_in[l])
            gi_all = dot(seq_buf[0:prefix_len * Bp, :], wih) + bpre
            h = run_layer(gi_all, prefix_len, whh, bhhn, zero_h,
                          store=(l < num_layers - 1))
        feat = h                                                  # (Bp, H)

        # ---------------- dense-slab views ----------------
        ob = 5 * H
        p1W = dense_ref[0:H, :];        p1b = dense_ref[ob + 0:ob + 1, :]
        p2W = dense_ref[H:2 * H, :];    p2b = dense_ref[ob + 1:ob + 2, :]
        hW = dense_ref[2 * H:3 * H, :]; hb = dense_ref[ob + 2:ob + 3, :]
        inpWf = dense_ref[3 * H:4 * H, :]
        inpb = dense_ref[ob + 3:ob + 4, :]
        outW = dense_ref[4 * H:5 * H, 0:input_dim]
        outb = dense_ref[ob + 4:ob + 5, 0:input_dim]

        # ---------------- diffusion step embedding MLP ----------------
        e = jax.nn.silu(dot(emb_ref[...], p1W) + p1b)
        e = jax.nn.silu(dot(e, p2W) + p2b)

        # ---------------- decoder setup ----------------
        h0 = dot(feat, hW) + hb
        base = dot(feat, inpWf) + inpb + e                        # (Bp, H)

        # decoder layer 0:  gi_t = noise_t @ (inpWn@Wih) + (base@Wih + bias)
        _, _, o_wn0 = gru_offsets(dec_in[0])
        wih0, whh0, bpre0, bhhn0 = load_gru(dec_refs[0], dec_in[0])
        wn_fused = dec_refs[0][o_wn0:o_wn0 + input_dim, :]        # (input_dim, 3G)
        base_gi = dot(base, wih0) + bpre0                         # (Bp, 3G)
        gi_all = dot(noise_ref[...], wn_fused)                    # (P*Bp, 3G)
        h = run_layer(gi_all, pred_len, whh0, bhhn0, h0, store=True,
                      gi_extra=base_gi)
        for l in range(1, num_layers):
            wih, whh, bpre, bhhn = load_gru(dec_refs[l], dec_in[l])
            gi_all = dot(seq_buf[0:pred_len * Bp, :], wih) + bpre
            h = run_layer(gi_all, pred_len, whh, bhhn, h0, store=True)

        # ---------------- output projection (single fused matmul + store) -----
        out_ref[...] = dot(seq_buf[0:pred_len * Bp, :], outW) + outb

    return kernel


# -----------------------------------------------------------------------------
# Per-call wrapper: only embedding gather, batch padding, reshapes, pallas_call.
# -----------------------------------------------------------------------------
def grued_forward(fused, noise, x, t, *, input_dim, hidden_dim, num_layers,
                  prefix_len, pred_len):
    H = hidden_dim
    B = x.shape[1]
    Bp = _rup(max(B, 8), 8)                      # sublane-tile-aligned batch
    max_T = max(prefix_len, pred_len)

    emb = fused['emb_table'][t]                  # gather: glue JAX

    def pad_batch(a):                            # (T, B, F) -> (T*Bp, F)
        T, _, F = a.shape
        ap = jnp.zeros((T, Bp, F), jnp.float32).at[:, :B, :].set(a)
        return ap.reshape(T * Bp, F)

    x_flat = pad_batch(x.astype(jnp.float32))
    noise_flat = pad_batch(noise.astype(jnp.float32))
    emb_p = jnp.zeros((Bp, H), jnp.float32).at[:B, :].set(emb)

    args = ([x_flat, noise_flat, emb_p]
            + list(fused['enc']) + list(fused['dec']) + [fused['dense']])

    kernel = make_kernel(input_dim, H, num_layers, prefix_len, pred_len, Bp)

    # Gridless, whole-arrays-in-VMEM design: working set is a few hundred KiB,
    # far below scoped VMEM on v5e/v6e/v7x, so there is nothing to pipeline.
    # TODO(synk): on v7x, independent batch groups could be split across the
    # 2 TensorCores with a leading "parallel" grid axis for larger batches.
    out_flat = pl.pallas_call(
        kernel,
        out_shape=jax.ShapeDtypeStruct((pred_len * Bp, input_dim), jnp.float32),
        in_specs=[pl.BlockSpec(memory_space=pltpu.MemorySpace.VMEM)] * len(args),
        out_specs=pl.BlockSpec(memory_space=pltpu.MemorySpace.VMEM),
        scratch_shapes=[pltpu.VMEM((max_T * Bp, H), jnp.float32)],
    )(*args)
    return out_flat.reshape(pred_len, Bp, input_dim)[:, :B, :]


# -----------------------------------------------------------------------------
# Pure-JAX reference (mirrors the PyTorch forward exactly)
# -----------------------------------------------------------------------------
def ref_forward(params, noise, x, t, *, hidden_dim, num_layers):
    H = hidden_dim
    B = x.shape[1]

    def run_gru(seq, layers, h0_stack):
        outputs = seq
        for l, (Wih, Whh, bih, bhh) in enumerate(layers):
            h = h0_stack[l]
            outs = []
            for tt in range(outputs.shape[0]):
                gi = outputs[tt] @ Wih.T + bih
                gh = h @ Whh.T + bhh
                i_r, i_z, i_n = jnp.split(gi, 3, axis=-1)
                h_r, h_z, h_n = jnp.split(gh, 3, axis=-1)
                r = jax.nn.sigmoid(i_r + h_r)
                z = jax.nn.sigmoid(i_z + h_z)
                n = jnp.tanh(i_n + r * h_n)
                h = (1 - z) * n + z * h
                outs.append(h)
            outputs = jnp.stack(outs, 0)
        return outputs

    enc_out = run_gru(x, params['enc'], jnp.zeros((num_layers, B, H), jnp.float32))
    feat = enc_out[-1]

    emb = params['emb_table'][t]
    p1W, p1b = params['proj1']
    p2W, p2b = params['proj2']
    e = jax.nn.silu(emb @ p1W.T + p1b)
    e = jax.nn.silu(e @ p2W.T + p2b)

    hW, hb = params['init_h_fc']
    h0 = feat @ hW.T + hb

    inpW, inpb = params['inp_fc']
    rnn_in = jnp.concatenate(
        [noise, jnp.broadcast_to(feat[None], (noise.shape[0], B, H))], axis=-1)
    rnn_in = rnn_in @ inpW.T + inpb + e[None]

    dec_out = run_gru(rnn_in, params['dec'],
                      jnp.broadcast_to(h0[None], (num_layers, B, H)))
    outW, outb = params['out_fc']
    return dec_out @ outW.T + outb


# -----------------------------------------------------------------------------
if __name__ == "__main__":
    input_dim, hidden_dim, num_layers = 4, 32, 2
    prefix_len, pred_len, diff_steps = 8, 8, 50
    batch = 2

    key = jax.random.PRNGKey(0)
    kp, kx, kn, kt = jax.random.split(key, 4)
    params = init_params(kp, input_dim, hidden_dim, num_layers, diff_steps)

    # One-time weight fusion / slab packing (cached; NOT in the per-call path).
    fused = prepare_fused_params(params, input_dim=input_dim,
                                 hidden_dim=hidden_dim, num_layers=num_layers)
    fused = jax.tree_util.tree_map(jax.block_until_ready, fused)

    x = jax.random.normal(kx, (prefix_len, batch, input_dim), jnp.float32)
    noise = jax.random.normal(kn, (pred_len, batch, input_dim), jnp.float32)
    t = jax.random.randint(kt, (batch,), 0, diff_steps)

    fwd = jax.jit(functools.partial(
        grued_forward, input_dim=input_dim, hidden_dim=hidden_dim,
        num_layers=num_layers, prefix_len=prefix_len, pred_len=pred_len))

    out = fwd(fused, noise, x, t)
    out = jax.block_until_ready(out)

    ref = ref_forward(params, noise, x, t,
                      hidden_dim=hidden_dim, num_layers=num_layers)
    assert out.shape == (pred_len, batch, input_dim)
    np.testing.assert_allclose(np.asarray(out), np.asarray(ref),
                               atol=3e-4, rtol=3e-4)
    print("KERNEL_OK")
</pallas_src>

<mosaic_0001>
module attributes {stable_mosaic.version = 11 : i64} {
  func.func @kernel(%arg0: memref<64x4xf32, #tpu.memory_space<vmem>>, %arg1: memref<64x4xf32, #tpu.memory_space<vmem>>, %arg2: memref<8x32xf32, #tpu.memory_space<vmem>>, %arg3: memref<48x384xf32, #tpu.memory_space<vmem>>, %arg4: memref<72x384xf32, #tpu.memory_space<vmem>>, %arg5: memref<80x384xf32, #tpu.memory_space<vmem>>, %arg6: memref<72x384xf32, #tpu.memory_space<vmem>>, %arg7: memref<168x32xf32, #tpu.memory_space<vmem>>, %arg8: memref<64x4xf32, #tpu.memory_space<vmem>>, %arg9: memref<64x32xf32, #tpu.memory_space<vmem>>) attributes {dimension_semantics = [], scalar_prefetch = 0 : i64, scratch_operands = 1 : i64, tpu.core_type = #tpu.core_type<tc>} {
    %cst = arith.constant 0.000000e+00 : f32
    %0 = vector.broadcast %cst : f32 to vector<8x32xf32>
    %c0 = arith.constant 0 : index
    %c0_0 = arith.constant 0 : index
    %1 = vector.load %arg3[%c0, %c0_0] : memref<48x384xf32, #tpu.memory_space<vmem>>, vector<4x384xf32>
    %c8 = arith.constant 8 : index
    %c0_1 = arith.constant 0 : index
    %2 = vector.load %arg3[%c8, %c0_1] : memref<48x384xf32, #tpu.memory_space<vmem>>, vector<32x384xf32>
    %c40 = arith.constant 40 : index
    %c0_2 = arith.constant 0 : index
    %3 = vector.load %arg3[%c40, %c0_2] : memref<48x384xf32, #tpu.memory_space<vmem>>, vector<1x384xf32>
    %c41 = arith.constant 41 : index
    %c256 = arith.constant 256 : index
    %4 = vector.load %arg3[%c41, %c256] : memref<48x384xf32, #tpu.memory_space<vmem>>, vector<1x32xf32>
    %c0_3 = arith.constant 0 : index
    %c0_4 = arith.constant 0 : index
    %5 = vector.load %arg0[%c0_3, %c0_4] : memref<64x4xf32, #tpu.memory_space<vmem>>, vector<64x4xf32>
    %cst_5 = arith.constant dense<0.000000e+00> : vector<64x384xf32>
    %6 = tpu.matmul %5, %1, %cst_5 {dimension_numbers = #tpu.dot_dimension_numbers<[1], [0], [0], [1], [0, 0, 1, 1], [], []>} : vector<64x4xf32>, vector<4x384xf32>, vector<64x384xf32> -> vector<64x384xf32>
    %7 = vector.broadcast %3 : vector<1x384xf32> to vector<64x384xf32>
    %8 = arith.addf %6, %7 : vector<64x384xf32>
    %9 = vector.extract_strided_slice %8 {offsets = [0, 0], sizes = [8, 384], strides = [1, 1]} : vector<64x384xf32> to vector<8x384xf32>
    %cst_6 = arith.constant dense<0.000000e+00> : vector<8x384xf32>
    %10 = tpu.matmul %0, %2, %cst_6 {dimension_numbers = #tpu.dot_dimension_numbers<[1], [0], [0], [1], [0, 0, 1, 1], [], []>} : vector<8x32xf32>, vector<32x384xf32>, vector<8x384xf32> -> vector<8x384xf32>
    %11 = vector.extract_strided_slice %9 {offsets = [0, 0], sizes = [8, 256], strides = [1, 1]} : vector<8x384xf32> to vector<8x256xf32>
    %12 = vector.extract_strided_slice %10 {offsets = [0, 0], sizes = [8, 256], strides = [1, 1]} : vector<8x384xf32> to vector<8x256xf32>
    %13 = arith.addf %11, %12 : vector<8x256xf32>
    %14 = arith.negf %13 : vector<8x256xf32>
    %15 = math.exp %14 : vector<8x256xf32>
    %cst_7 = arith.constant 1.000000e+00 : f32
    %16 = vector.broadcast %cst_7 : f32 to vector<8x256xf32>
    %17 = arith.addf %16, %15 : vector<8x256xf32>
    %18 = arith.divf %16, %17 : vector<8x256xf32>
    %19 = vector.extract_strided_slice %18 {offsets = [0, 0], sizes = [8, 32], strides = [1, 1]} : vector<8x256xf32> to vector<8x32xf32>
    %20 = vector.extract_strided_slice %18 {offsets = [0, 128], sizes = [8, 32], strides = [1, 1]} : vector<8x256xf32> to vector<8x32xf32>
    %21 = vector.extract_strided_slice %9 {offsets = [0, 256], sizes = [8, 32], strides = [1, 1]} : vector<8x384xf32> to vector<8x32xf32>
    %22 = vector.extract_strided_slice %10 {offsets = [0, 256], sizes = [8, 32], strides = [1, 1]} : vector<8x384xf32> to vector<8x32xf32>
    %23 = vector.broadcast %4 : vector<1x32xf32> to vector<8x32xf32>
    %24 = arith.addf %22, %23 : vector<8x32xf32>
    %25 = arith.mulf %19, %24 : vector<8x32xf32>
    %26 = arith.addf %21, %25 : vector<8x32xf32>
    %27 = math.tanh %26 : vector<8x32xf32>
    %cst_8 = arith.constant 1.000000e+00 : f32
    %28 = vector.broadcast %cst_8 : f32 to vector<8x32xf32>
    %29 = arith.subf %28, %20 : vector<8x32xf32>
    %30 = arith.mulf %29, %27 : vector<8x32xf32>
    %31 = arith.mulf %20, %0 : vector<8x32xf32>
    %32 = arith.addf %30, %31 : vector<8x32xf32>
    %c0_9 = arith.constant 0 : index
    %c0_10 = arith.constant 0 : index
    %33 = vector.load %arg9[%c0_9, %c0_10] : memref<64x32xf32, #tpu.memory_space<vmem>>, vector<8x32xf32>
    tpu.vector_store %arg9[%c0_9, %c0_10], %32 {strides = array<i32>} : memref<64x32xf32, #tpu.memory_space<vmem>>, vector<8x32xf32>,
    %34 = vector.extract_strided_slice %8 {offsets = [8, 0], sizes = [8, 384], strides = [1, 1]} : vector<64x384xf32> to vector<8x384xf32>
    %cst_11 = arith.constant dense<0.000000e+00> : vector<8x384xf32>
    %35 = tpu.matmul %32, %2, %cst_11 {dimension_numbers = #tpu.dot_dimension_numbers<[1], [0], [0], [1], [0, 0, 1, 1], [], []>} : vector<8x32xf32>, vector<32x384xf32>, vector<8x384xf32> -> vector<8x384xf32>
    %36 = vector.extract_strided_slice %34 {offsets = [0, 0], sizes = [8, 256], strides = [1, 1]} : vector<8x384xf32> to vector<8x256xf32>
    %37 = vector.extract_strided_slice %35 {offsets = [0, 0], sizes = [8, 256], strides = [1, 1]} : vector<8x384xf32> to vector<8x256xf32>
    %38 = arith.addf %36, %37 : vector<8x256xf32>
    %39 = arith.negf %38 : vector<8x256xf32>
    %40 = math.exp %39 : vector<8x256xf32>
    %cst_12 = arith.constant 1.000000e+00 : f32
    %41 = vector.broadcast %cst_12 : f32 to vector<8x256xf32>
    %42 = arith.addf %41, %40 : vector<8x256xf32>
    %43 = arith.divf %41, %42 : vector<8x256xf32>
    %44 = vector.extract_strided_slice %43 {offsets = [0, 0], sizes = [8, 32], strides = [1, 1]} : vector<8x256xf32> to vector<8x32xf32>
    %45 = vector.extract_strided_slice %43 {offsets = [0, 128], sizes = [8, 32], strides = [1, 1]} : vector<8x256xf32> to vector<8x32xf32>
    %46 = vector.extract_strided_slice %34 {offsets = [0, 256], sizes = [8, 32], strides = [1, 1]} : vector<8x384xf32> to vector<8x32xf32>
    %47 = vector.extract_strided_slice %35 {offsets = [0, 256], sizes = [8, 32], strides = [1, 1]} : vector<8x384xf32> to vector<8x32xf32>
    %48 = vector.broadcast %4 : vector<1x32xf32> to vector<8x32xf32>
    %49 = arith.addf %47, %48 : vector<8x32xf32>
    %50 = arith.mulf %44, %49 : vector<8x32xf32>
    %51 = arith.addf %46, %50 : vector<8x32xf32>
    %52 = math.tanh %51 : vector<8x32xf32>
    %cst_13 = arith.constant 1.000000e+00 : f32
    %53 = vector.broadcast %cst_13 : f32 to vector<8x32xf32>
    %54 = arith.subf %53, %45 : vector<8x32xf32>
    %55 = arith.mulf %54, %52 : vector<8x32xf32>
    %56 = arith.mulf %45, %32 : vector<8x32xf32>
    %57 = arith.addf %55, %56 : vector<8x32xf32>
    %c8_14 = arith.constant 8 : index
    %c0_15 = arith.constant 0 : index
    %58 = vector.load %arg9[%c8_14, %c0_15] : memref<64x32xf32, #tpu.memory_space<vmem>>, vector<8x32xf32>
    tpu.vector_store %arg9[%c8_14, %c0_15], %57 {strides = array<i32>} : memref<64x32xf32, #tpu.memory_space<vmem>>, vector<8x32xf32>,
    %59 = vector.extract_strided_slice %8 {offsets = [16, 0], sizes = [8, 384], strides = [1, 1]} : vector<64x384xf32> to vector<8x384xf32>
    %cst_16 = arith.constant dense<0.000000e+00> : vector<8x384xf32>
    %60 = tpu.matmul %57, %2, %cst_16 {dimension_numbers = #tpu.dot_dimension_numbers<[1], [0], [0], [1], [0, 0, 1, 1], [], []>} : vector<8x32xf32>, vector<32x384xf32>, vector<8x384xf32> -> vector<8x384xf32>
    %61 = vector.extract_strided_slice %59 {offsets = [0, 0], sizes = [8, 256], strides = [1, 1]} : vector<8x384xf32> to vector<8x256xf32>
    %62 = vector.extract_strided_slice %60 {offsets = [0, 0], sizes = [8, 256], strides = [1, 1]} : vector<8x384xf32> to vector<8x256xf32>
    %63 = arith.addf %61, %62 : vector<8x256xf32>
    %64 = arith.negf %63 : vector<8x256xf32>
    %65 = math.exp %64 : vector<8x256xf32>
    %cst_17 = arith.constant 1.000000e+00 : f32
    %66 = vector.broadcast %cst_17 : f32 to vector<8x256xf32>
    %67 = arith.addf %66, %65 : vector<8x256xf32>
    %68 = arith.divf %66, %67 : vector<8x256xf32>
    %69 = vector.extract_strided_slice %68 {offsets = [0, 0], sizes = [8, 32], strides = [1, 1]} : vector<8x256xf32> to vector<8x32xf32>
    %70 = vector.extract_strided_slice %68 {offsets = [0, 128], sizes = [8, 32], strides = [1, 1]} : vector<8x256xf32> to vector<8x32xf32>
    %71 = vector.extract_strided_slice %59 {offsets = [0, 256], sizes = [8, 32], strides = [1, 1]} : vector<8x384xf32> to vector<8x32xf32>
    %72 = vector.extract_strided_slice %60 {offsets = [0, 256], sizes = [8, 32], strides = [1, 1]} : vector<8x384xf32> to vector<8x32xf32>
    %73 = vector.broadcast %4 : vector<1x32xf32> to vector<8x32xf32>
    %74 = arith.addf %72, %73 : vector<8x32xf32>
    %75 = arith.mulf %69, %74 : vector<8x32xf32>
    %76 = arith.addf %71, %75 : vector<8x32xf32>
    %77 = math.tanh %76 : vector<8x32xf32>
    %cst_18 = arith.constant 1.000000e+00 : f32
    %78 = vector.broadcast %cst_18 : f32 to vector<8x32xf32>
    %79 = arith.subf %78, %70 : vector<8x32xf32>
    %80 = arith.mulf %79, %77 : vector<8x32xf32>
    %81 = arith.mulf %70, %57 : vector<8x32xf32>
    %82 = arith.addf %80, %81 : vector<8x32xf32>
    %c16 = arith.constant 16 : index
    %c0_19 = arith.constant 0 : index
    %83 = vector.load %arg9[%c16, %c0_19] : memref<64x32xf32, #tpu.memory_space<vmem>>, vector<8x32xf32>
    tpu.vector_store %arg9[%c16, %c0_19], %82 {strides = array<i32>} : memref<64x32xf32, #tpu.memory_space<vmem>>, vector<8x32xf32>,
    %84 = vector.extract_strided_slice %8 {offsets = [24, 0], sizes = [8, 384], strides = [1, 1]} : vector<64x384xf32> to vector<8x384xf32>
    %cst_20 = arith.constant dense<0.000000e+00> : vector<8x384xf32>
    %85 = tpu.matmul %82, %2, %cst_20 {dimension_numbers = #tpu.dot_dimension_numbers<[1], [0], [0], [1], [0, 0, 1, 1], [], []>} : vector<8x32xf32>, vector<32x384xf32>, vector<8x384xf32> -> vector<8x384xf32>
    %86 = vector.extract_strided_slice %84 {offsets = [0, 0], sizes = [8, 256], strides = [1, 1]} : vector<8x384xf32> to vector<8x256xf32>
    %87 = vector.extract_strided_slice %85 {offsets = [0, 0], sizes = [8, 256], strides = [1, 1]} : vector<8x384xf32> to vector<8x256xf32>
    %88 = arith.addf %86, %87 : vector<8x256xf32>
    %89 = arith.negf %88 : vector<8x256xf32>
    %90 = math.exp %89 : vector<8x256xf32>
    %cst_21 = arith.constant 1.000000e+00 : f32
    %91 = vector.broadcast %cst_21 : f32 to vector<8x256xf32>
    %92 = arith.addf %91, %90 : vector<8x256xf32>
    %93 = arith.divf %91, %92 : vector<8x256xf32>
    %94 = vector.extract_strided_slice %93 {offsets = [0, 0], sizes = [8, 32], strides = [1, 1]} : vector<8x256xf32> to vector<8x32xf32>
    %95 = vector.extract_strided_slice %93 {offsets = [0, 128], sizes = [8, 32], strides = [1, 1]} : vector<8x256xf32> to vector<8x32xf32>
    %96 = vector.extract_strided_slice %84 {offsets = [0, 256], sizes = [8, 32], strides = [1, 1]} : vector<8x384xf32> to vector<8x32xf32>
    %97 = vector.extract_strided_slice %85 {offsets = [0, 256], sizes = [8, 32], strides = [1, 1]} : vector<8x384xf32> to vector<8x32xf32>
    %98 = vector.broadcast %4 : vector<1x32xf32> to vector<8x32xf32>
    %99 = arith.addf %97, %98 : vector<8x32xf32>
    %100 = arith.mulf %94, %99 : vector<8x32xf32>
    %101 = arith.addf %96, %100 : vector<8x32xf32>
    %102 = math.tanh %101 : vector<8x32xf32>
    %cst_22 = arith.constant 1.000000e+00 : f32
    %103 = vector.broadcast %cst_22 : f32 to vector<8x32xf32>
    %104 = arith.subf %103, %95 : vector<8x32xf32>
    %105 = arith.mulf %104, %102 : vector<8x32xf32>
    %106 = arith.mulf %95, %82 : vector<8x32xf32>
    %107 = arith.addf %105, %106 : vector<8x32xf32>
    %c24 = arith.constant 24 : index
    %c0_23 = arith.constant 0 : index
    %108 = vector.load %arg9[%c24, %c0_23] : memref<64x32xf32, #tpu.memory_space<vmem>>, vector<8x32xf32>
    tpu.vector_store %arg9[%c24, %c0_23], %107 {strides = array<i32>} : memref<64x32xf32, #tpu.memory_space<vmem>>, vector<8x32xf32>,
    %109 = vector.extract_strided_slice %8 {offsets = [32, 0], sizes = [8, 384], strides = [1, 1]} : vector<64x384xf32> to vector<8x384xf32>
    %cst_24 = arith.constant dense<0.000000e+00> : vector<8x384xf32>
    %110 = tpu.matmul %107, %2, %cst_24 {dimension_numbers = #tpu.dot_dimension_numbers<[1], [0], [0], [1], [0, 0, 1, 1], [], []>} : vector<8x32xf32>, vector<32x384xf32>, vector<8x384xf32> -> vector<8x384xf32>
    %111 = vector.extract_strided_slice %109 {offsets = [0, 0], sizes = [8, 256], strides = [1, 1]} : vector<8x384xf32> to vector<8x256xf32>
    %112 = vector.extract_strided_slice %110 {offsets = [0, 0], sizes = [8, 256], strides = [1, 1]} : vector<8x384xf32> to vector<8x256xf32>
    %113 = arith.addf %111, %112 : vector<8x256xf32>
    %114 = arith.negf %113 : vector<8x256xf32>
    %115 = math.exp %114 : vector<8x256xf32>
    %cst_25 = arith.constant 1.000000e+00 : f32
    %116 = vector.broadcast %cst_25 : f32 to vector<8x256xf32>
    %117 = arith.addf %116, %115 : vector<8x256xf32>
    %118 = arith.divf %116, %117 : vector<8x256xf32>
    %119 = vector.extract_strided_slice %118 {offsets = [0, 0], sizes = [8, 32], strides = [1, 1]} : vector<8x256xf32> to vector<8x32xf32>
    %120 = vector.extract_strided_slice %118 {offsets = [0, 128], sizes = [8, 32], strides = [1, 1]} : vector<8x256xf32> to vector<8x32xf32>
    %121 = vector.extract_strided_slice %109 {offsets = [0, 256], sizes = [8, 32], strides = [1, 1]} : vector<8x384xf32> to vector<8x32xf32>
    %122 = vector.extract_strided_slice %110 {offsets = [0, 256], sizes = [8, 32], strides = [1, 1]} : vector<8x384xf32> to vector<8x32xf32>
    %123 = vector.broadcast %4 : vector<1x32xf32> to vector<8x32xf32>
    %124 = arith.addf %122, %123 : vector<8x32xf32>
    %125 = arith.mulf %119, %124 : vector<8x32xf32>
    %126 = arith.addf %121, %125 : vector<8x32xf32>
    %127 = math.tanh %126 : vector<8x32xf32>
    %cst_26 = arith.constant 1.000000e+00 : f32
    %128 = vector.broadcast %cst_26 : f32 to vector<8x32xf32>
    %129 = arith.subf %128, %120 : vector<8x32xf32>
    %130 = arith.mulf %129, %127 : vector<8x32xf32>
    %131 = arith.mulf %120, %107 : vector<8x32xf32>
    %132 = arith.addf %130, %131 : vector<8x32xf32>
    %c32 = arith.constant 32 : index
    %c0_27 = arith.constant 0 : index
    %133 = vector.load %arg9[%c32, %c0_27] : memref<64x32xf32, #tpu.memory_space<vmem>>, vector<8x32xf32>
    tpu.vector_store %arg9[%c32, %c0_27], %132 {strides = array<i32>} : memref<64x32xf32, #tpu.memory_space<vmem>>, vector<8x32xf32>,
    %134 = vector.extract_strided_slice %8 {offsets = [40, 0], sizes = [8, 384], strides = [1, 1]} : vector<64x384xf32> to vector<8x384xf32>
    %cst_28 = arith.constant dense<0.000000e+00> : vector<8x384xf32>
    %135 = tpu.matmul %132, %2, %cst_28 {dimension_numbers = #tpu.dot_dimension_numbers<[1], [0], [0], [1], [0, 0, 1, 1], [], []>} : vector<8x32xf32>, vector<32x384xf32>, vector<8x384xf32> -> vector<8x384xf32>
    %136 = vector.extract_strided_slice %134 {offsets = [0, 0], sizes = [8, 256], strides = [1, 1]} : vector<8x384xf32> to vector<8x256xf32>
    %137 = vector.extract_strided_slice %135 {offsets = [0, 0], sizes = [8, 256], strides = [1, 1]} : vector<8x384xf32> to vector<8x256xf32>
    %138 = arith.addf %136, %137 : vector<8x256xf32>
    %139 = arith.negf %138 : vector<8x256xf32>
    %140 = math.exp %139 : vector<8x256xf32>
    %cst_29 = arith.constant 1.000000e+00 : f32
    %141 = vector.broadcast %cst_29 : f32 to vector<8x256xf32>
    %142 = arith.addf %141, %140 : vector<8x256xf32>
    %143 = arith.divf %141, %142 : vector<8x256xf32>
    %144 = vector.extract_strided_slice %143 {offsets = [0, 0], sizes = [8, 32], strides = [1, 1]} : vector<8x256xf32> to vector<8x32xf32>
    %145 = vector.extract_strided_slice %143 {offsets = [0, 128], sizes = [8, 32], strides = [1, 1]} : vector<8x256xf32> to vector<8x32xf32>
    %146 = vector.extract_strided_slice %134 {offsets = [0, 256], sizes = [8, 32], strides = [1, 1]} : vector<8x384xf32> to vector<8x32xf32>
    %147 = vector.extract_strided_slice %135 {offsets = [0, 256], sizes = [8, 32], strides = [1, 1]} : vector<8x384xf32> to vector<8x32xf32>
    %148 = vector.broadcast %4 : vector<1x32xf32> to vector<8x32xf32>
    %149 = arith.addf %147, %148 : vector<8x32xf32>
    %150 = arith.mulf %144, %149 : vector<8x32xf32>
    %151 = arith.addf %146, %150 : vector<8x32xf32>
    %152 = math.tanh %151 : vector<8x32xf32>
    %cst_30 = arith.constant 1.000000e+00 : f32
    %153 = vector.broadcast %cst_30 : f32 to vector<8x32xf32>
    %154 = arith.subf %153, %145 : vector<8x32xf32>
    %155 = arith.mulf %154, %152 : vector<8x32xf32>
    %156 = arith.mulf %145, %132 : vector<8x32xf32>
    %157 = arith.addf %155, %156 : vector<8x32xf32>
    %c40_31 = arith.constant 40 : index
    %c0_32 = arith.constant 0 : index
    %158 = vector.load %arg9[%c40_31, %c0_32] : memref<64x32xf32, #tpu.memory_space<vmem>>, vector<8x32xf32>
    tpu.vector_store %arg9[%c40_31, %c0_32], %157 {strides = array<i32>} : memref<64x32xf32, #tpu.memory_space<vmem>>, vector<8x32xf32>,
    %159 = vector.extract_strided_slice %8 {offsets = [48, 0], sizes = [8, 384], strides = [1, 1]} : vector<64x384xf32> to vector<8x384xf32>
    %cst_33 = arith.constant dense<0.000000e+00> : vector<8x384xf32>
    %160 = tpu.matmul %157, %2, %cst_33 {dimension_numbers = #tpu.dot_dimension_numbers<[1], [0], [0], [1], [0, 0, 1, 1], [], []>} : vector<8x32xf32>, vector<32x384xf32>, vector<8x384xf32> -> vector<8x384xf32>
    %161 = vector.extract_strided_slice %159 {offsets = [0, 0], sizes = [8, 256], strides = [1, 1]} : vector<8x384xf32> to vector<8x256xf32>
    %162 = vector.extract_strided_slice %160 {offsets = [0, 0], sizes = [8, 256], strides = [1, 1]} : vector<8x384xf32> to vector<8x256xf32>
    %163 = arith.addf %161, %162 : vector<8x256xf32>
    %164 = arith.negf %163 : vector<8x256xf32>
    %165 = math.exp %164 : vector<8x256xf32>
    %cst_34 = arith.constant 1.000000e+00 : f32
    %166 = vector.broadcast %cst_34 : f32 to vector<8x256xf32>
    %167 = arith.addf %166, %165 : vector<8x256xf32>
    %168 = arith.divf %166, %167 : vector<8x256xf32>
    %169 = vector.extract_strided_slice %168 {offsets = [0, 0], sizes = [8, 32], strides = [1, 1]} : vector<8x256xf32> to vector<8x32xf32>
    %170 = vector.extract_strided_slice %168 {offsets = [0, 128], sizes = [8, 32], strides = [1, 1]} : vector<8x256xf32> to vector<8x32xf32>
    %171 = vector.extract_strided_slice %159 {offsets = [0, 256], sizes = [8, 32], strides = [1, 1]} : vector<8x384xf32> to vector<8x32xf32>
    %172 = vector.extract_strided_slice %160 {offsets = [0, 256], sizes = [8, 32], strides = [1, 1]} : vector<8x384xf32> to vector<8x32xf32>
    %173 = vector.broadcast %4 : vector<1x32xf32> to vector<8x32xf32>
    %174 = arith.addf %172, %173 : vector<8x32xf32>
    %175 = arith.mulf %169, %174 : vector<8x32xf32>
    %176 = arith.addf %171, %175 : vector<8x32xf32>
    %177 = math.tanh %176 : vector<8x32xf32>
    %cst_35 = arith.constant 1.000000e+00 : f32
    %178 = vector.broadcast %cst_35 : f32 to vector<8x32xf32>
    %179 = arith.subf %178, %170 : vector<8x32xf32>
    %180 = arith.mulf %179, %177 : vector<8x32xf32>
    %181 = arith.mulf %170, %157 : vector<8x32xf32>
    %182 = arith.addf %180, %181 : vector<8x32xf32>
    %c48 = arith.constant 48 : index
    %c0_36 = arith.constant 0 : index
    %183 = vector.load %arg9[%c48, %c0_36] : memref<64x32xf32, #tpu.memory_space<vmem>>, vector<8x32xf32>
    tpu.vector_store %arg9[%c48, %c0_36], %182 {strides = array<i32>} : memref<64x32xf32, #tpu.memory_space<vmem>>, vector<8x32xf32>,
    %184 = vector.extract_strided_slice %8 {offsets = [56, 0], sizes = [8, 384], strides = [1, 1]} : vector<64x384xf32> to vector<8x384xf32>
    %cst_37 = arith.constant dense<0.000000e+00> : vector<8x384xf32>
    %185 = tpu.matmul %182, %2, %cst_37 {dimension_numbers = #tpu.dot_dimension_numbers<[1], [0], [0], [1], [0, 0, 1, 1], [], []>} : vector<8x32xf32>, vector<32x384xf32>, vector<8x384xf32> -> vector<8x384xf32>
    %186 = vector.extract_strided_slice %184 {offsets = [0, 0], sizes = [8, 256], strides = [1, 1]} : vector<8x384xf32> to vector<8x256xf32>
    %187 = vector.extract_strided_slice %185 {offsets = [0, 0], sizes = [8, 256], strides = [1, 1]} : vector<8x384xf32> to vector<8x256xf32>
    %188 = arith.addf %186, %187 : vector<8x256xf32>
    %189 = arith.negf %188 : vector<8x256xf32>
    %190 = math.exp %189 : vector<8x256xf32>
    %cst_38 = arith.constant 1.000000e+00 : f32
    %191 = vector.broadcast %cst_38 : f32 to vector<8x256xf32>
    %192 = arith.addf %191, %190 : vector<8x256xf32>
    %193 = arith.divf %191, %192 : vector<8x256xf32>
    %194 = vector.extract_strided_slice %193 {offsets = [0, 0], sizes = [8, 32], strides = [1, 1]} : vector<8x256xf32> to vector<8x32xf32>
    %195 = vector.extract_strided_slice %193 {offsets = [0, 128], sizes = [8, 32], strides = [1, 1]} : vector<8x256xf32> to vector<8x32xf32>
    %196 = vector.extract_strided_slice %184 {offsets = [0, 256], sizes = [8, 32], strides = [1, 1]} : vector<8x384xf32> to vector<8x32xf32>
    %197 = vector.extract_strided_slice %185 {offsets = [0, 256], sizes = [8, 32], strides = [1, 1]} : vector<8x384xf32> to vector<8x32xf32>
    %198 = vector.broadcast %4 : vector<1x32xf32> to vector<8x32xf32>
    %199 = arith.addf %197, %198 : vector<8x32xf32>
    %200 = arith.mulf %194, %199 : vector<8x32xf32>
    %201 = arith.addf %196, %200 : vector<8x32xf32>
    %202 = math.tanh %201 : vector<8x32xf32>
    %cst_39 = arith.constant 1.000000e+00 : f32
    %203 = vector.broadcast %cst_39 : f32 to vector<8x32xf32>
    %204 = arith.subf %203, %195 : vector<8x32xf32>
    %205 = arith.mulf %204, %202 : vector<8x32xf32>
    %206 = arith.mulf %195, %182 : vector<8x32xf32>
    %207 = arith.addf %205, %206 : vector<8x32xf32>
    %c56 = arith.constant 56 : index
    %c0_40 = arith.constant 0 : index
    %208 = vector.load %arg9[%c56, %c0_40] : memref<64x32xf32, #tpu.memory_space<vmem>>, vector<8x32xf32>
    tpu.vector_store %arg9[%c56, %c0_40], %207 {strides = array<i32>} : memref<64x32xf32, #tpu.memory_space<vmem>>, vector<8x32xf32>,
    %c0_41 = arith.constant 0 : index
    %c0_42 = arith.constant 0 : index
    %209 = vector.load %arg4[%c0_41, %c0_42] : memref<72x384xf32, #tpu.memory_space<vmem>>, vector<32x384xf32>
    %c32_43 = arith.constant 32 : index
    %c0_44 = arith.constant 0 : index
    %210 = vector.load %arg4[%c32_43, %c0_44] : memref<72x384xf32, #tpu.memory_space<vmem>>, vector<32x384xf32>
    %c64 = arith.constant 64 : index
    %c0_45 = arith.constant 0 : index
    %211 = vector.load %arg4[%c64, %c0_45] : memref<72x384xf32, #tpu.memory_space<vmem>>, vector<1x384xf32>
    %c65 = arith.constant 65 : index
    %c256_46 = arith.constant 256 : index
    %212 = vector.load %arg4[%c65, %c256_46] : memref<72x384xf32, #tpu.memory_space<vmem>>, vector<1x32xf32>
    %c0_47 = arith.constant 0 : index
    %c0_48 = arith.constant 0 : index
    %213 = vector.load %arg9[%c0_47, %c0_48] : memref<64x32xf32, #tpu.memory_space<vmem>>, vector<64x32xf32>
    %cst_49 = arith.constant dense<0.000000e+00> : vector<64x384xf32>
    %214 = tpu.matmul %213, %209, %cst_49 {dimension_numbers = #tpu.dot_dimension_numbers<[1], [0], [0], [1], [0, 0, 1, 1], [], []>} : vector<64x32xf32>, vector<32x384xf32>, vector<64x384xf32> -> vector<64x384xf32>
    %215 = vector.broadcast %211 : vector<1x384xf32> to vector<64x384xf32>
    %216 = arith.addf %214, %215 : vector<64x384xf32>
    %217 = vector.extract_strided_slice %216 {offsets = [0, 0], sizes = [8, 384], strides = [1, 1]} : vector<64x384xf32> to vector<8x384xf32>
    %cst_50 = arith.constant dense<0.000000e+00> : vector<8x384xf32>
    %218 = tpu.matmul %0, %210, %cst_50 {dimension_numbers = #tpu.dot_dimension_numbers<[1], [0], [0], [1], [0, 0, 1, 1], [], []>} : vector<8x32xf32>, vector<32x384xf32>, vector<8x384xf32> -> vector<8x384xf32>
    %219 = vector.extract_strided_slice %217 {offsets = [0, 0], sizes = [8, 256], strides = [1, 1]} : vector<8x384xf32> to vector<8x256xf32>
    %220 = vector.extract_strided_slice %218 {offsets = [0, 0], sizes = [8, 256], strides = [1, 1]} : vector<8x384xf32> to vector<8x256xf32>
    %221 = arith.addf %219, %220 : vector<8x256xf32>
    %222 = arith.negf %221 : vector<8x256xf32>
    %223 = math.exp %222 : vector<8x256xf32>
    %cst_51 = arith.constant 1.000000e+00 : f32
    %224 = vector.broadcast %cst_51 : f32 to vector<8x256xf32>
    %225 = arith.addf %224, %223 : vector<8x256xf32>
    %226 = arith.divf %224, %225 : vector<8x256xf32>
    %227 = vector.extract_strided_slice %226 {offsets = [0, 0], sizes = [8, 32], strides = [1, 1]} : vector<8x256xf32> to vector<8x32xf32>
    %228 = vector.extract_strided_slice %226 {offsets = [0, 128], sizes = [8, 32], strides = [1, 1]} : vector<8x256xf32> to vector<8x32xf32>
    %229 = vector.extract_strided_slice %217 {offsets = [0, 256], sizes = [8, 32], strides = [1, 1]} : vector<8x384xf32> to vector<8x32xf32>
    %230 = vector.extract_strided_slice %218 {offsets = [0, 256], sizes = [8, 32], strides = [1, 1]} : vector<8x384xf32> to vector<8x32xf32>
    %231 = vector.broadcast %212 : vector<1x32xf32> to vector<8x32xf32>
    %232 = arith.addf %230, %231 : vector<8x32xf32>
    %233 = arith.mulf %227, %232 : vector<8x32xf32>
    %234 = arith.addf %229, %233 : vector<8x32xf32>
    %235 = math.tanh %234 : vector<8x32xf32>
    %cst_52 = arith.constant 1.000000e+00 : f32
    %236 = vector.broadcast %cst_52 : f32 to vector<8x32xf32>
    %237 = arith.subf %236, %228 : vector<8x32xf32>
    %238 = arith.mulf %237, %235 : vector<8x32xf32>
    %239 = arith.mulf %228, %0 : vector<8x32xf32>
    %240 = arith.addf %238, %239 : vector<8x32xf32>
    %241 = vector.extract_strided_slice %216 {offsets = [8, 0], sizes = [8, 384], strides = [1, 1]} : vector<64x384xf32> to vector<8x384xf32>
    %cst_53 = arith.constant dense<0.000000e+00> : vector<8x384xf32>
    %242 = tpu.matmul %240, %210, %cst_53 {dimension_numbers = #tpu.dot_dimension_numbers<[1], [0], [0], [1], [0, 0, 1, 1], [], []>} : vector<8x32xf32>, vector<32x384xf32>, vector<8x384xf32> -> vector<8x384xf32>
    %243 = vector.extract_strided_slice %241 {offsets = [0, 0], sizes = [8, 256], strides = [1, 1]} : vector<8x384xf32> to vector<8x256xf32>
    %244 = vector.extract_strided_slice %242 {offsets = [0, 0], sizes = [8, 256], strides = [1, 1]} : vector<8x384xf32> to vector<8x256xf32>
    %245 = arith.addf %243, %244 : vector<8x256xf32>
    %246 = arith.negf %245 : vector<8x256xf32>
    %247 = math.exp %246 : vector<8x256xf32>
    %cst_54 = arith.constant 1.000000e+00 : f32
    %248 = vector.broadcast %cst_54 : f32 to vector<8x256xf32>
    %249 = arith.addf %248, %247 : vector<8x256xf32>
    %250 = arith.divf %248, %249 : vector<8x256xf32>
    %251 = vector.extract_strided_slice %250 {offsets = [0, 0], sizes = [8, 32], strides = [1, 1]} : vector<8x256xf32> to vector<8x32xf32>
    %252 = vector.extract_strided_slice %250 {offsets = [0, 128], sizes = [8, 32], strides = [1, 1]} : vector<8x256xf32> to vector<8x32xf32>
    %253 = vector.extract_strided_slice %241 {offsets = [0, 256], sizes = [8, 32], strides = [1, 1]} : vector<8x384xf32> to vector<8x32xf32>
    %254 = vector.extract_strided_slice %242 {offsets = [0, 256], sizes = [8, 32], strides = [1, 1]} : vector<8x384xf32> to vector<8x32xf32>
    %255 = vector.broadcast %212 : vector<1x32xf32> to vector<8x32xf32>
    %256 = arith.addf %254, %255 : vector<8x32xf32>
    %257 = arith.mulf %251, %256 : vector<8x32xf32>
    %258 = arith.addf %253, %257 : vector<8x32xf32>
    %259 = math.tanh %258 : vector<8x32xf32>
    %cst_55 = arith.constant 1.000000e+00 : f32
    %260 = vector.broadcast %cst_55 : f32 to vector<8x32xf32>
    %261 = arith.subf %260, %252 : vector<8x32xf32>
    %262 = arith.mulf %261, %259 : vector<8x32xf32>
    %263 = arith.mulf %252, %240 : vector<8x32xf32>
    %264 = arith.addf %262, %263 : vector<8x32xf32>
    %265 = vector.extract_strided_slice %216 {offsets = [16, 0], sizes = [8, 384], strides = [1, 1]} : vector<64x384xf32> to vector<8x384xf32>
    %cst_56 = arith.constant dense<0.000000e+00> : vector<8x384xf32>
    %266 = tpu.matmul %264, %210, %cst_56 {dimension_numbers = #tpu.dot_dimension_numbers<[1], [0], [0], [1], [0, 0, 1, 1], [], []>} : vector<8x32xf32>, vector<32x384xf32>, vector<8x384xf32> -> vector<8x384xf32>
    %267 = vector.extract_strided_slice %265 {offsets = [0, 0], sizes = [8, 256], strides = [1, 1]} : vector<8x384xf32> to vector<8x256xf32>
    %268 = vector.extract_strided_slice %266 {offsets = [0, 0], sizes = [8, 256], strides = [1, 1]} : vector<8x384xf32> to vector<8x256xf32>
    %269 = arith.addf %267, %268 : vector<8x256xf32>
    %270 = arith.negf %269 : vector<8x256xf32>
    %271 = math.exp %270 : vector<8x256xf32>
    %cst_57 = arith.constant 1.000000e+00 : f32
    %272 = vector.broadcast %cst_57 : f32 to vector<8x256xf32>
    %273 = arith.addf %272, %271 : vector<8x256xf32>
    %274 = arith.divf %272, %273 : vector<8x256xf32>
    %275 = vector.extract_strided_slice %274 {offsets = [0, 0], sizes = [8, 32], strides = [1, 1]} : vector<8x256xf32> to vector<8x32xf32>
    %276 = vector.extract_strided_slice %274 {offsets = [0, 128], sizes = [8, 32], strides = [1, 1]} : vector<8x256xf32> to vector<8x32xf32>
    %277 = vector.extract_strided_slice %265 {offsets = [0, 256], sizes = [8, 32], strides = [1, 1]} : vector<8x384xf32> to vector<8x32xf32>
    %278 = vector.extract_strided_slice %266 {offsets = [0, 256], sizes = [8, 32], strides = [1, 1]} : vector<8x384xf32> to vector<8x32xf32>
    %279 = vector.broadcast %212 : vector<1x32xf32> to vector<8x32xf32>
    %280 = arith.addf %278, %279 : vector<8x32xf32>
    %281 = arith.mulf %275, %280 : vector<8x32xf32>
    %282 = arith.addf %277, %281 : vector<8x32xf32>
    %283 = math.tanh %282 : vector<8x32xf32>
    %cst_58 = arith.constant 1.000000e+00 : f32
    %284 = vector.broadcast %cst_58 : f32 to vector<8x32xf32>
    %285 = arith.subf %284, %276 : vector<8x32xf32>
    %286 = arith.mulf %285, %283 : vector<8x32xf32>
    %287 = arith.mulf %276, %264 : vector<8x32xf32>
    %288 = arith.addf %286, %287 : vector<8x32xf32>
    %289 = vector.extract_strided_slice %216 {offsets = [24, 0], sizes = [8, 384], strides = [1, 1]} : vector<64x384xf32> to vector<8x384xf32>
    %cst_59 = arith.constant dense<0.000000e+00> : vector<8x384xf32>
    %290 = tpu.matmul %288, %210, %cst_59 {dimension_numbers = #tpu.dot_dimension_numbers<[1], [0], [0], [1], [0, 0, 1, 1], [], []>} : vector<8x32xf32>, vector<32x384xf32>, vector<8x384xf32> -> vector<8x384xf32>
    %291 = vector.extract_strided_slice %289 {offsets = [0, 0], sizes = [8, 256], strides = [1, 1]} : vector<8x384xf32> to vector<8x256xf32>
    %292 = vector.extract_strided_slice %290 {offsets = [0, 0], sizes = [8, 256], strides = [1, 1]} : vector<8x384xf32> to vector<8x256xf32>
    %293 = arith.addf %291, %292 : vector<8x256xf32>
    %294 = arith.negf %293 : vector<8x256xf32>
    %295 = math.exp %294 : vector<8x256xf32>
    %cst_60 = arith.constant 1.000000e+00 : f32
    %296 = vector.broadcast %cst_60 : f32 to vector<8x256xf32>
    %297 = arith.addf %296, %295 : vector<8x256xf32>
    %298 = arith.divf %296, %297 : vector<8x256xf32>
    %299 = vector.extract_strided_slice %298 {offsets = [0, 0], sizes = [8, 32], strides = [1, 1]} : vector<8x256xf32> to vector<8x32xf32>
    %300 = vector.extract_strided_slice %298 {offsets = [0, 128], sizes = [8, 32], strides = [1, 1]} : vector<8x256xf32> to vector<8x32xf32>
    %301 = vector.extract_strided_slice %289 {offsets = [0, 256], sizes = [8, 32], strides = [1, 1]} : vector<8x384xf32> to vector<8x32xf32>
    %302 = vector.extract_strided_slice %290 {offsets = [0, 256], sizes = [8, 32], strides = [1, 1]} : vector<8x384xf32> to vector<8x32xf32>
    %303 = vector.broadcast %212 : vector<1x32xf32> to vector<8x32xf32>
    %304 = arith.addf %302, %303 : vector<8x32xf32>
    %305 = arith.mulf %299, %304 : vector<8x32xf32>
    %306 = arith.addf %301, %305 : vector<8x32xf32>
    %307 = math.tanh %306 : vector<8x32xf32>
    %cst_61 = arith.constant 1.000000e+00 : f32
    %308 = vector.broadcast %cst_61 : f32 to vector<8x32xf32>
    %309 = arith.subf %308, %300 : vector<8x32xf32>
    %310 = arith.mulf %309, %307 : vector<8x32xf32>
    %311 = arith.mulf %300, %288 : vector<8x32xf32>
    %312 = arith.addf %310, %311 : vector<8x32xf32>
    %313 = vector.extract_strided_slice %216 {offsets = [32, 0], sizes = [8, 384], strides = [1, 1]} : vector<64x384xf32> to vector<8x384xf32>
    %cst_62 = arith.constant dense<0.000000e+00> : vector<8x384xf32>
    %314 = tpu.matmul %312, %210, %cst_62 {dimension_numbers = #tpu.dot_dimension_numbers<[1], [0], [0], [1], [0, 0, 1, 1], [], []>} : vector<8x32xf32>, vector<32x384xf32>, vector<8x384xf32> -> vector<8x384xf32>
    %315 = vector.extract_strided_slice %313 {offsets = [0, 0], sizes = [8, 256], strides = [1, 1]} : vector<8x384xf32> to vector<8x256xf32>
    %316 = vector.extract_strided_slice %314 {offsets = [0, 0], sizes = [8, 256], strides = [1, 1]} : vector<8x384xf32> to vector<8x256xf32>
    %317 = arith.addf %315, %316 : vector<8x256xf32>
    %318 = arith.negf %317 : vector<8x256xf32>
    %319 = math.exp %318 : vector<8x256xf32>
    %cst_63 = arith.constant 1.000000e+00 : f32
    %320 = vector.broadcast %cst_63 : f32 to vector<8x256xf32>
    %321 = arith.addf %320, %319 : vector<8x256xf32>
    %322 = arith.divf %320, %321 : vector<8x256xf32>
    %323 = vector.extract_strided_slice %322 {offsets = [0, 0], sizes = [8, 32], strides = [1, 1]} : vector<8x256xf32> to vector<8x32xf32>
    %324 = vector.extract_strided_slice %322 {offsets = [0, 128], sizes = [8, 32], strides = [1, 1]} : vector<8x256xf32> to vector<8x32xf32>
    %325 = vector.extract_strided_slice %313 {offsets = [0, 256], sizes = [8, 32], strides = [1, 1]} : vector<8x384xf32> to vector<8x32xf32>
    %326 = vector.extract_strided_slice %314 {offsets = [0, 256], sizes = [8, 32], strides = [1, 1]} : vector<8x384xf32> to vector<8x32xf32>
    %327 = vector.broadcast %212 : vector<1x32xf32> to vector<8x32xf32>
    %328 = arith.addf %326, %327 : vector<8x32xf32>
    %329 = arith.mulf %323, %328 : vector<8x32xf32>
    %330 = arith.addf %325, %329 : vector<8x32xf32>
    %331 = math.tanh %330 : vector<8x32xf32>
    %cst_64 = arith.constant 1.000000e+00 : f32
    %332 = vector.broadcast %cst_64 : f32 to vector<8x32xf32>
    %333 = arith.subf %332, %324 : vector<8x32xf32>
    %334 = arith.mulf %333, %331 : vector<8x32xf32>
    %335 = arith.mulf %324, %312 : vector<8x32xf32>
    %336 = arith.addf %334, %335 : vector<8x32xf32>
    %337 = vector.extract_strided_slice %216 {offsets = [40, 0], sizes = [8, 384], strides = [1, 1]} : vector<64x384xf32> to vector<8x384xf32>
    %cst_65 = arith.constant dense<0.000000e+00> : vector<8x384xf32>
    %338 = tpu.matmul %336, %210, %cst_65 {dimension_numbers = #tpu.dot_dimension_numbers<[1], [0], [0], [1], [0, 0, 1, 1], [], []>} : vector<8x32xf32>, vector<32x384xf32>, vector<8x384xf32> -> vector<8x384xf32>
    %339 = vector.extract_strided_slice %337 {offsets = [0, 0], sizes = [8, 256], strides = [1, 1]} : vector<8x384xf32> to vector<8x256xf32>
    %340 = vector.extract_strided_slice %338 {offsets = [0, 0], sizes = [8, 256], strides = [1, 1]} : vector<8x384xf32> to vector<8x256xf32>
    %341 = arith.addf %339, %340 : vector<8x256xf32>
    %342 = arith.negf %341 : vector<8x256xf32>
    %343 = math.exp %342 : vector<8x256xf32>
    %cst_66 = arith.constant 1.000000e+00 : f32
    %344 = vector.broadcast %cst_66 : f32 to vector<8x256xf32>
    %345 = arith.addf %344, %343 : vector<8x256xf32>
    %346 = arith.divf %344, %345 : vector<8x256xf32>
    %347 = vector.extract_strided_slice %346 {offsets = [0, 0], sizes = [8, 32], strides = [1, 1]} : vector<8x256xf32> to vector<8x32xf32>
    %348 = vector.extract_strided_slice %346 {offsets = [0, 128], sizes = [8, 32], strides = [1, 1]} : vector<8x256xf32> to vector<8x32xf32>
    %349 = vector.extract_strided_slice %337 {offsets = [0, 256], sizes = [8, 32], strides = [1, 1]} : vector<8x384xf32> to vector<8x32xf32>
    %350 = vector.extract_strided_slice %338 {offsets = [0, 256], sizes = [8, 32], strides = [1, 1]} : vector<8x384xf32> to vector<8x32xf32>
    %351 = vector.broadcast %212 : vector<1x32xf32> to vector<8x32xf32>
    %352 = arith.addf %350, %351 : vector<8x32xf32>
    %353 = arith.mulf %347, %352 : vector<8x32xf32>
    %354 = arith.addf %349, %353 : vector<8x32xf32>
    %355 = math.tanh %354 : vector<8x32xf32>
    %cst_67 = arith.constant 1.000000e+00 : f32
    %356 = vector.broadcast %cst_67 : f32 to vector<8x32xf32>
    %357 = arith.subf %356, %348 : vector<8x32xf32>
    %358 = arith.mulf %357, %355 : vector<8x32xf32>
    %359 = arith.mulf %348, %336 : vector<8x32xf32>
    %360 = arith.addf %358, %359 : vector<8x32xf32>
    %361 = vector.extract_strided_slice %216 {offsets = [48, 0], sizes = [8, 384], strides = [1, 1]} : vector<64x384xf32> to vector<8x384xf32>
    %cst_68 = arith.constant dense<0.000000e+00> : vector<8x384xf32>
    %362 = tpu.matmul %360, %210, %cst_68 {dimension_numbers = #tpu.dot_dimension_numbers<[1], [0], [0], [1], [0, 0, 1, 1], [], []>} : vector<8x32xf32>, vector<32x384xf32>, vector<8x384xf32> -> vector<8x384xf32>
    %363 = vector.extract_strided_slice %361 {offsets = [0, 0], sizes = [8, 256], strides = [1, 1]} : vector<8x384xf32> to vector<8x256xf32>
    %364 = vector.extract_strided_slice %362 {offsets = [0, 0], sizes = [8, 256], strides = [1, 1]} : vector<8x384xf32> to vector<8x256xf32>
    %365 = arith.addf %363, %364 : vector<8x256xf32>
    %366 = arith.negf %365 : vector<8x256xf32>
    %367 = math.exp %366 : vector<8x256xf32>
    %cst_69 = arith.constant 1.000000e+00 : f32
    %368 = vector.broadcast %cst_69 : f32 to vector<8x256xf32>
    %369 = arith.addf %368, %367 : vector<8x256xf32>
    %370 = arith.divf %368, %369 : vector<8x256xf32>
    %371 = vector.extract_strided_slice %370 {offsets = [0, 0], sizes = [8, 32], strides = [1, 1]} : vector<8x256xf32> to vector<8x32xf32>
    %372 = vector.extract_strided_slice %370 {offsets = [0, 128], sizes = [8, 32], strides = [1, 1]} : vector<8x256xf32> to vector<8x32xf32>
    %373 = vector.extract_strided_slice %361 {offsets = [0, 256], sizes = [8, 32], strides = [1, 1]} : vector<8x384xf32> to vector<8x32xf32>
    %374 = vector.extract_strided_slice %362 {offsets = [0, 256], sizes = [8, 32], strides = [1, 1]} : vector<8x384xf32> to vector<8x32xf32>
    %375 = vector.broadcast %212 : vector<1x32xf32> to vector<8x32xf32>
    %376 = arith.addf %374, %375 : vector<8x32xf32>
    %377 = arith.mulf %371, %376 : vector<8x32xf32>
    %378 = arith.addf %373, %377 : vector<8x32xf32>
    %379 = math.tanh %378 : vector<8x32xf32>
    %cst_70 = arith.constant 1.000000e+00 : f32
    %380 = vector.broadcast %cst_70 : f32 to vector<8x32xf32>
    %381 = arith.subf %380, %372 : vector<8x32xf32>
    %382 = arith.mulf %381, %379 : vector<8x32xf32>
    %383 = arith.mulf %372, %360 : vector<8x32xf32>
    %384 = arith.addf %382, %383 : vector<8x32xf32>
    %385 = vector.extract_strided_slice %216 {offsets = [56, 0], sizes = [8, 384], strides = [1, 1]} : vector<64x384xf32> to vector<8x384xf32>
    %cst_71 = arith.constant dense<0.000000e+00> : vector<8x384xf32>
    %386 = tpu.matmul %384, %210, %cst_71 {dimension_numbers = #tpu.dot_dimension_numbers<[1], [0], [0], [1], [0, 0, 1, 1], [], []>} : vector<8x32xf32>, vector<32x384xf32>, vector<8x384xf32> -> vector<8x384xf32>
    %387 = vector.extract_strided_slice %385 {offsets = [0, 0], sizes = [8, 256], strides = [1, 1]} : vector<8x384xf32> to vector<8x256xf32>
    %388 = vector.extract_strided_slice %386 {offsets = [0, 0], sizes = [8, 256], strides = [1, 1]} : vector<8x384xf32> to vector<8x256xf32>
    %389 = arith.addf %387, %388 : vector<8x256xf32>
    %390 = arith.negf %389 : vector<8x256xf32>
    %391 = math.exp %390 : vector<8x256xf32>
    %cst_72 = arith.constant 1.000000e+00 : f32
    %392 = vector.broadcast %cst_72 : f32 to vector<8x256xf32>
    %393 = arith.addf %392, %391 : vector<8x256xf32>
    %394 = arith.divf %392, %393 : vector<8x256xf32>
    %395 = vector.extract_strided_slice %394 {offsets = [0, 0], sizes = [8, 32], strides = [1, 1]} : vector<8x256xf32> to vector<8x32xf32>
    %396 = vector.extract_strided_slice %394 {offsets = [0, 128], sizes = [8, 32], strides = [1, 1]} : vector<8x256xf32> to vector<8x32xf32>
    %397 = vector.extract_strided_slice %385 {offsets = [0, 256], sizes = [8, 32], strides = [1, 1]} : vector<8x384xf32> to vector<8x32xf32>
    %398 = vector.extract_strided_slice %386 {offsets = [0, 256], sizes = [8, 32], strides = [1, 1]} : vector<8x384xf32> to vector<8x32xf32>
    %399 = vector.broadcast %212 : vector<1x32xf32> to vector<8x32xf32>
    %400 = arith.addf %398, %399 : vector<8x32xf32>
    %401 = arith.mulf %395, %400 : vector<8x32xf32>
    %402 = arith.addf %397, %401 : vector<8x32xf32>
    %403 = math.tanh %402 : vector<8x32xf32>
    %cst_73 = arith.constant 1.000000e+00 : f32
    %404 = vector.broadcast %cst_73 : f32 to vector<8x32xf32>
    %405 = arith.subf %404, %396 : vector<8x32xf32>
    %406 = arith.mulf %405, %403 : vector<8x32xf32>
    %407 = arith.mulf %396, %384 : vector<8x32xf32>
    %408 = arith.addf %406, %407 : vector<8x32xf32>
    %c0_74 = arith.constant 0 : index
    %c0_75 = arith.constant 0 : index
    %409 = vector.load %arg7[%c0_74, %c0_75] : memref<168x32xf32, #tpu.memory_space<vmem>>, vector<32x32xf32>
    %c160 = arith.constant 160 : index
    %c0_76 = arith.constant 0 : index
    %410 = vector.load %arg7[%c160, %c0_76] : memref<168x32xf32, #tpu.memory_space<vmem>>, vector<1x32xf32>
    %c32_77 = arith.constant 32 : index
    %c0_78 = arith.constant 0 : index
    %411 = vector.load %arg7[%c32_77, %c0_78] : memref<168x32xf32, #tpu.memory_space<vmem>>, vector<32x32xf32>
    %c161 = arith.constant 161 : index
    %c0_79 = arith.constant 0 : index
    %412 = vector.load %arg7[%c161, %c0_79] : memref<168x32xf32, #tpu.memory_space<vmem>>, vector<1x32xf32>
    %c64_80 = arith.constant 64 : index
    %c0_81 = arith.constant 0 : index
    %413 = vector.load %arg7[%c64_80, %c0_81] : memref<168x32xf32, #tpu.memory_space<vmem>>, vector<32x32xf32>
    %c162 = arith.constant 162 : index
    %c0_82 = arith.constant 0 : index
    %414 = vector.load %arg7[%c162, %c0_82] : memref<168x32xf32, #tpu.memory_space<vmem>>, vector<1x32xf32>
    %c96 = arith.constant 96 : index
    %c0_83 = arith.constant 0 : index
    %415 = vector.load %arg7[%c96, %c0_83] : memref<168x32xf32, #tpu.memory_space<vmem>>, vector<32x32xf32>
    %c163 = arith.constant 163 : index
    %c0_84 = arith.constant 0 : index
    %416 = vector.load %arg7[%c163, %c0_84] : memref<168x32xf32, #tpu.memory_space<vmem>>, vector<1x32xf32>
    %c128 = arith.constant 128 : index
    %c0_85 = arith.constant 0 : index
    %417 = vector.load %arg7[%c128, %c0_85] : memref<168x32xf32, #tpu.memory_space<vmem>>, vector<32x4xf32>
    %c164 = arith.constant 164 : index
    %c0_86 = arith.constant 0 : index
    %418 = vector.load %arg7[%c164, %c0_86] : memref<168x32xf32, #tpu.memory_space<vmem>>, vector<1x4xf32>
    %c0_87 = arith.constant 0 : index
    %c0_88 = arith.constant 0 : index
    %419 = vector.load %arg2[%c0_87, %c0_88] : memref<8x32xf32, #tpu.memory_space<vmem>>, vector<8x32xf32>
    %cst_89 = arith.constant dense<0.000000e+00> : vector<8x32xf32>
    %420 = tpu.matmul %419, %409, %cst_89 {dimension_numbers = #tpu.dot_dimension_numbers<[1], [0], [0], [1], [0, 0, 1, 1], [], []>} : vector<8x32xf32>, vector<32x32xf32>, vector<8x32xf32> -> vector<8x32xf32>
    %421 = vector.broadcast %410 : vector<1x32xf32> to vector<8x32xf32>
    %422 = arith.addf %420, %421 : vector<8x32xf32>
    %423 = arith.negf %422 : vector<8x32xf32>
    %424 = math.exp %423 : vector<8x32xf32>
    %cst_90 = arith.constant 1.000000e+00 : f32
    %425 = vector.broadcast %cst_90 : f32 to vector<8x32xf32>
    %426 = arith.addf %425, %424 : vector<8x32xf32>
    %427 = arith.divf %425, %426 : vector<8x32xf32>
    %428 = arith.mulf %422, %427 : vector<8x32xf32>
    %cst_91 = arith.constant dense<0.000000e+00> : vector<8x32xf32>
    %429 = tpu.matmul %428, %411, %cst_91 {dimension_numbers = #tpu.dot_dimension_numbers<[1], [0], [0], [1], [0, 0, 1, 1], [], []>} : vector<8x32xf32>, vector<32x32xf32>, vector<8x32xf32> -> vector<8x32xf32>
    %430 = vector.broadcast %412 : vector<1x32xf32> to vector<8x32xf32>
    %431 = arith.addf %429, %430 : vector<8x32xf32>
    %432 = arith.negf %431 : vector<8x32xf32>
    %433 = math.exp %432 : vector<8x32xf32>
    %cst_92 = arith.constant 1.000000e+00 : f32
    %434 = vector.broadcast %cst_92 : f32 to vector<8x32xf32>
    %435 = arith.addf %434, %433 : vector<8x32xf32>
    %436 = arith.divf %434, %435 : vector<8x32xf32>
    %437 = arith.mulf %431, %436 : vector<8x32xf32>
    %cst_93 = arith.constant dense<0.000000e+00> : vector<8x32xf32>
    %438 = tpu.matmul %408, %413, %cst_93 {dimension_numbers = #tpu.dot_dimension_numbers<[1], [0], [0], [1], [0, 0, 1, 1], [], []>} : vector<8x32xf32>, vector<32x32xf32>, vector<8x32xf32> -> vector<8x32xf32>
    %439 = vector.broadcast %414 : vector<1x32xf32> to vector<8x32xf32>
    %440 = arith.addf %438, %439 : vector<8x32xf32>
    %cst_94 = arith.constant dense<0.000000e+00> : vector<8x32xf32>
    %441 = tpu.matmul %408, %415, %cst_94 {dimension_numbers = #tpu.dot_dimension_numbers<[1], [0], [0], [1], [0, 0, 1, 1], [], []>} : vector<8x32xf32>, vector<32x32xf32>, vector<8x32xf32> -> vector<8x32xf32>
    %442 = vector.broadcast %416 : vector<1x32xf32> to vector<8x32xf32>
    %443 = arith.addf %441, %442 : vector<8x32xf32>
    %444 = arith.addf %443, %437 : vector<8x32xf32>
    %c0_95 = arith.constant 0 : index
    %c0_96 = arith.constant 0 : index
    %445 = vector.load %arg5[%c0_95, %c0_96] : memref<80x384xf32, #tpu.memory_space<vmem>>, vector<32x384xf32>
    %c32_97 = arith.constant 32 : index
    %c0_98 = arith.constant 0 : index
    %446 = vector.load %arg5[%c32_97, %c0_98] : memref<80x384xf32, #tpu.memory_space<vmem>>, vector<32x384xf32>
    %c64_99 = arith.constant 64 : index
    %c0_100 = arith.constant 0 : index
    %447 = vector.load %arg5[%c64_99, %c0_100] : memref<80x384xf32, #tpu.memory_space<vmem>>, vector<1x384xf32>
    %c65_101 = arith.constant 65 : index
    %c256_102 = arith.constant 256 : index
    %448 = vector.load %arg5[%c65_101, %c256_102] : memref<80x384xf32, #tpu.memory_space<vmem>>, vector<1x32xf32>
    %c72 = arith.constant 72 : index
    %c0_103 = arith.constant 0 : index
    %449 = vector.load %arg5[%c72, %c0_103] : memref<80x384xf32, #tpu.memory_space<vmem>>, vector<4x384xf32>
    %cst_104 = arith.constant dense<0.000000e+00> : vector<8x384xf32>
    %450 = tpu.matmul %444, %445, %cst_104 {dimension_numbers = #tpu.dot_dimension_numbers<[1], [0], [0], [1], [0, 0, 1, 1], [], []>} : vector<8x32xf32>, vector<32x384xf32>, vector<8x384xf32> -> vector<8x384xf32>
    %451 = vector.broadcast %447 : vector<1x384xf32> to vector<8x384xf32>
    %452 = arith.addf %450, %451 : vector<8x384xf32>
    %c0_105 = arith.constant 0 : index
    %c0_106 = arith.constant 0 : index
    %453 = vector.load %arg1[%c0_105, %c0_106] : memref<64x4xf32, #tpu.memory_space<vmem>>, vector<64x4xf32>
    %cst_107 = arith.constant dense<0.000000e+00> : vector<64x384xf32>
    %454 = tpu.matmul %453, %449, %cst_107 {dimension_numbers = #tpu.dot_dimension_numbers<[1], [0], [0], [1], [0, 0, 1, 1], [], []>} : vector<64x4xf32>, vector<4x384xf32>, vector<64x384xf32> -> vector<64x384xf32>
    %455 = vector.extract_strided_slice %454 {offsets = [0, 0], sizes = [8, 384], strides = [1, 1]} : vector<64x384xf32> to vector<8x384xf32>
    %456 = arith.addf %455, %452 : vector<8x384xf32>
    %cst_108 = arith.constant dense<0.000000e+00> : vector<8x384xf32>
    %457 = tpu.matmul %440, %446, %cst_108 {dimension_numbers = #tpu.dot_dimension_numbers<[1], [0], [0], [1], [0, 0, 1, 1], [], []>} : vector<8x32xf32>, vector<32x384xf32>, vector<8x384xf32> -> vector<8x384xf32>
    %458 = vector.extract_strided_slice %456 {offsets = [0, 0], sizes = [8, 256], strides = [1, 1]} : vector<8x384xf32> to vector<8x256xf32>
    %459 = vector.extract_strided_slice %457 {offsets = [0, 0], sizes = [8, 256], strides = [1, 1]} : vector<8x384xf32> to vector<8x256xf32>
    %460 = arith.addf %458, %459 : vector<8x256xf32>
    %461 = arith.negf %460 : vector<8x256xf32>
    %462 = math.exp %461 : vector<8x256xf32>
    %cst_109 = arith.constant 1.000000e+00 : f32
    %463 = vector.broadcast %cst_109 : f32 to vector<8x256xf32>
    %464 = arith.addf %463, %462 : vector<8x256xf32>
    %465 = arith.divf %463, %464 : vector<8x256xf32>
    %466 = vector.extract_strided_slice %465 {offsets = [0, 0], sizes = [8, 32], strides = [1, 1]} : vector<8x256xf32> to vector<8x32xf32>
    %467 = vector.extract_strided_slice %465 {offsets = [0, 128], sizes = [8, 32], strides = [1, 1]} : vector<8x256xf32> to vector<8x32xf32>
    %468 = vector.extract_strided_slice %456 {offsets = [0, 256], sizes = [8, 32], strides = [1, 1]} : vector<8x384xf32> to vector<8x32xf32>
    %469 = vector.extract_strided_slice %457 {offsets = [0, 256], sizes = [8, 32], strides = [1, 1]} : vector<8x384xf32> to vector<8x32xf32>
    %470 = vector.broadcast %448 : vector<1x32xf32> to vector<8x32xf32>
    %471 = arith.addf %469, %470 : vector<8x32xf32>
    %472 = arith.mulf %466, %471 : vector<8x32xf32>
    %473 = arith.addf %468, %472 : vector<8x32xf32>
    %474 = math.tanh %473 : vector<8x32xf32>
    %cst_110 = arith.constant 1.000000e+00 : f32
    %475 = vector.broadcast %cst_110 : f32 to vector<8x32xf32>
    %476 = arith.subf %475, %467 : vector<8x32xf32>
    %477 = arith.mulf %476, %474 : vector<8x32xf32>
    %478 = arith.mulf %467, %440 : vector<8x32xf32>
    %479 = arith.addf %477, %478 : vector<8x32xf32>
    %c0_111 = arith.constant 0 : index
    %c0_112 = arith.constant 0 : index
    %480 = vector.load %arg9[%c0_111, %c0_112] : memref<64x32xf32, #tpu.memory_space<vmem>>, vector<8x32xf32>
    tpu.vector_store %arg9[%c0_111, %c0_112], %479 {strides = array<i32>} : memref<64x32xf32, #tpu.memory_space<vmem>>, vector<8x32xf32>,
    %481 = vector.extract_strided_slice %454 {offsets = [8, 0], sizes = [8, 384], strides = [1, 1]} : vector<64x384xf32> to vector<8x384xf32>
    %482 = arith.addf %481, %452 : vector<8x384xf32>
    %cst_113 = arith.constant dense<0.000000e+00> : vector<8x384xf32>
    %483 = tpu.matmul %479, %446, %cst_113 {dimension_numbers = #tpu.dot_dimension_numbers<[1], [0], [0], [1], [0, 0, 1, 1], [], []>} : vector<8x32xf32>, vector<32x384xf32>, vector<8x384xf32> -> vector<8x384xf32>
    %484 = vector.extract_strided_slice %482 {offsets = [0, 0], sizes = [8, 256], strides = [1, 1]} : vector<8x384xf32> to vector<8x256xf32>
    %485 = vector.extract_strided_slice %483 {offsets = [0, 0], sizes = [8, 256], strides = [1, 1]} : vector<8x384xf32> to vector<8x256xf32>
    %486 = arith.addf %484, %485 : vector<8x256xf32>
    %487 = arith.negf %486 : vector<8x256xf32>
    %488 = math.exp %487 : vector<8x256xf32>
    %cst_114 = arith.constant 1.000000e+00 : f32
    %489 = vector.broadcast %cst_114 : f32 to vector<8x256xf32>
    %490 = arith.addf %489, %488 : vector<8x256xf32>
    %491 = arith.divf %489, %490 : vector<8x256xf32>
    %492 = vector.extract_strided_slice %491 {offsets = [0, 0], sizes = [8, 32], strides = [1, 1]} : vector<8x256xf32> to vector<8x32xf32>
    %493 = vector.extract_strided_slice %491 {offsets = [0, 128], sizes = [8, 32], strides = [1, 1]} : vector<8x256xf32> to vector<8x32xf32>
    %494 = vector.extract_strided_slice %482 {offsets = [0, 256], sizes = [8, 32], strides = [1, 1]} : vector<8x384xf32> to vector<8x32xf32>
    %495 = vector.extract_strided_slice %483 {offsets = [0, 256], sizes = [8, 32], strides = [1, 1]} : vector<8x384xf32> to vector<8x32xf32>
    %496 = vector.broadcast %448 : vector<1x32xf32> to vector<8x32xf32>
    %497 = arith.addf %495, %496 : vector<8x32xf32>
    %498 = arith.mulf %492, %497 : vector<8x32xf32>
    %499 = arith.addf %494, %498 : vector<8x32xf32>
    %500 = math.tanh %499 : vector<8x32xf32>
    %cst_115 = arith.constant 1.000000e+00 : f32
    %501 = vector.broadcast %cst_115 : f32 to vector<8x32xf32>
    %502 = arith.subf %501, %493 : vector<8x32xf32>
    %503 = arith.mulf %502, %500 : vector<8x32xf32>
    %504 = arith.mulf %493, %479 : vector<8x32xf32>
    %505 = arith.addf %503, %504 : vector<8x32xf32>
    %c8_116 = arith.constant 8 : index
    %c0_117 = arith.constant 0 : index
    %506 = vector.load %arg9[%c8_116, %c0_117] : memref<64x32xf32, #tpu.memory_space<vmem>>, vector<8x32xf32>
    tpu.vector_store %arg9[%c8_116, %c0_117], %505 {strides = array<i32>} : memref<64x32xf32, #tpu.memory_space<vmem>>, vector<8x32xf32>,
    %507 = vector.extract_strided_slice %454 {offsets = [16, 0], sizes = [8, 384], strides = [1, 1]} : vector<64x384xf32> to vector<8x384xf32>
    %508 = arith.addf %507, %452 : vector<8x384xf32>
    %cst_118 = arith.constant dense<0.000000e+00> : vector<8x384xf32>
    %509 = tpu.matmul %505, %446, %cst_118 {dimension_numbers = #tpu.dot_dimension_numbers<[1], [0], [0], [1], [0, 0, 1, 1], [], []>} : vector<8x32xf32>, vector<32x384xf32>, vector<8x384xf32> -> vector<8x384xf32>
    %510 = vector.extract_strided_slice %508 {offsets = [0, 0], sizes = [8, 256], strides = [1, 1]} : vector<8x384xf32> to vector<8x256xf32>
    %511 = vector.extract_strided_slice %509 {offsets = [0, 0], sizes = [8, 256], strides = [1, 1]} : vector<8x384xf32> to vector<8x256xf32>
    %512 = arith.addf %510, %511 : vector<8x256xf32>
    %513 = arith.negf %512 : vector<8x256xf32>
    %514 = math.exp %513 : vector<8x256xf32>
    %cst_119 = arith.constant 1.000000e+00 : f32
    %515 = vector.broadcast %cst_119 : f32 to vector<8x256xf32>
    %516 = arith.addf %515, %514 : vector<8x256xf32>
    %517 = arith.divf %515, %516 : vector<8x256xf32>
    %518 = vector.extract_strided_slice %517 {offsets = [0, 0], sizes = [8, 32], strides = [1, 1]} : vector<8x256xf32> to vector<8x32xf32>
    %519 = vector.extract_strided_slice %517 {offsets = [0, 128], sizes = [8, 32], strides = [1, 1]} : vector<8x256xf32> to vector<8x32xf32>
    %520 = vector.extract_strided_slice %508 {offsets = [0, 256], sizes = [8, 32], strides = [1, 1]} : vector<8x384xf32> to vector<8x32xf32>
    %521 = vector.extract_strided_slice %509 {offsets = [0, 256], sizes = [8, 32], strides = [1, 1]} : vector<8x384xf32> to vector<8x32xf32>
    %522 = vector.broadcast %448 : vector<1x32xf32> to vector<8x32xf32>
    %523 = arith.addf %521, %522 : vector<8x32xf32>
    %524 = arith.mulf %518, %523 : vector<8x32xf32>
    %525 = arith.addf %520, %524 : vector<8x32xf32>
    %526 = math.tanh %525 : vector<8x32xf32>
    %cst_120 = arith.constant 1.000000e+00 : f32
    %527 = vector.broadcast %cst_120 : f32 to vector<8x32xf32>
    %528 = arith.subf %527, %519 : vector<8x32xf32>
    %529 = arith.mulf %528, %526 : vector<8x32xf32>
    %530 = arith.mulf %519, %505 : vector<8x32xf32>
    %531 = arith.addf %529, %530 : vector<8x32xf32>
    %c16_121 = arith.constant 16 : index
    %c0_122 = arith.constant 0 : index
    %532 = vector.load %arg9[%c16_121, %c0_122] : memref<64x32xf32, #tpu.memory_space<vmem>>, vector<8x32xf32>
    tpu.vector_store %arg9[%c16_121, %c0_122], %531 {strides = array<i32>} : memref<64x32xf32, #tpu.memory_space<vmem>>, vector<8x32xf32>,
    %533 = vector.extract_strided_slice %454 {offsets = [24, 0], sizes = [8, 384], strides = [1, 1]} : vector<64x384xf32> to vector<8x384xf32>
    %534 = arith.addf %533, %452 : vector<8x384xf32>
    %cst_123 = arith.constant dense<0.000000e+00> : vector<8x384xf32>
    %535 = tpu.matmul %531, %446, %cst_123 {dimension_numbers = #tpu.dot_dimension_numbers<[1], [0], [0], [1], [0, 0, 1, 1], [], []>} : vector<8x32xf32>, vector<32x384xf32>, vector<8x384xf32> -> vector<8x384xf32>
    %536 = vector.extract_strided_slice %534 {offsets = [0, 0], sizes = [8, 256], strides = [1, 1]} : vector<8x384xf32> to vector<8x256xf32>
    %537 = vector.extract_strided_slice %535 {offsets = [0, 0], sizes = [8, 256], strides = [1, 1]} : vector<8x384xf32> to vector<8x256xf32>
    %538 = arith.addf %536, %537 : vector<8x256xf32>
    %539 = arith.negf %538 : vector<8x256xf32>
    %540 = math.exp %539 : vector<8x256xf32>
    %cst_124 = arith.constant 1.000000e+00 : f32
    %541 = vector.broadcast %cst_124 : f32 to vector<8x256xf32>
    %542 = arith.addf %541, %540 : vector<8x256xf32>
    %543 = arith.divf %541, %542 : vector<8x256xf32>
    %544 = vector.extract_strided_slice %543 {offsets = [0, 0], sizes = [8, 32], strides = [1, 1]} : vector<8x256xf32> to vector<8x32xf32>
    %545 = vector.extract_strided_slice %543 {offsets = [0, 128], sizes = [8, 32], strides = [1, 1]} : vector<8x256xf32> to vector<8x32xf32>
    %546 = vector.extract_strided_slice %534 {offsets = [0, 256], sizes = [8, 32], strides = [1, 1]} : vector<8x384xf32> to vector<8x32xf32>
    %547 = vector.extract_strided_slice %535 {offsets = [0, 256], sizes = [8, 32], strides = [1, 1]} : vector<8x384xf32> to vector<8x32xf32>
    %548 = vector.broadcast %448 : vector<1x32xf32> to vector<8x32xf32>
    %549 = arith.addf %547, %548 : vector<8x32xf32>
    %550 = arith.mulf %544, %549 : vector<8x32xf32>
    %551 = arith.addf %546, %550 : vector<8x32xf32>
    %552 = math.tanh %551 : vector<8x32xf32>
    %cst_125 = arith.constant 1.000000e+00 : f32
    %553 = vector.broadcast %cst_125 : f32 to vector<8x32xf32>
    %554 = arith.subf %553, %545 : vector<8x32xf32>
    %555 = arith.mulf %554, %552 : vector<8x32xf32>
    %556 = arith.mulf %545, %531 : vector<8x32xf32>
    %557 = arith.addf %555, %556 : vector<8x32xf32>
    %c24_126 = arith.constant 24 : index
    %c0_127 = arith.constant 0 : index
    %558 = vector.load %arg9[%c24_126, %c0_127] : memref<64x32xf32, #tpu.memory_space<vmem>>, vector<8x32xf32>
    tpu.vector_store %arg9[%c24_126, %c0_127], %557 {strides = array<i32>} : memref<64x32xf32, #tpu.memory_space<vmem>>, vector<8x32xf32>,
    %559 = vector.extract_strided_slice %454 {offsets = [32, 0], sizes = [8, 384], strides = [1, 1]} : vector<64x384xf32> to vector<8x384xf32>
    %560 = arith.addf %559, %452 : vector<8x384xf32>
    %cst_128 = arith.constant dense<0.000000e+00> : vector<8x384xf32>
    %561 = tpu.matmul %557, %446, %cst_128 {dimension_numbers = #tpu.dot_dimension_numbers<[1], [0], [0], [1], [0, 0, 1, 1], [], []>} : vector<8x32xf32>, vector<32x384xf32>, vector<8x384xf32> -> vector<8x384xf32>
    %562 = vector.extract_strided_slice %560 {offsets = [0, 0], sizes = [8, 256], strides = [1, 1]} : vector<8x384xf32> to vector<8x256xf32>
    %563 = vector.extract_strided_slice %561 {offsets = [0, 0], sizes = [8, 256], strides = [1, 1]} : vector<8x384xf32> to vector<8x256xf32>
    %564 = arith.addf %562, %563 : vector<8x256xf32>
    %565 = arith.negf %564 : vector<8x256xf32>
    %566 = math.exp %565 : vector<8x256xf32>
    %cst_129 = arith.constant 1.000000e+00 : f32
    %567 = vector.broadcast %cst_129 : f32 to vector<8x256xf32>
    %568 = arith.addf %567, %566 : vector<8x256xf32>
    %569 = arith.divf %567, %568 : vector<8x256xf32>
    %570 = vector.extract_strided_slice %569 {offsets = [0, 0], sizes = [8, 32], strides = [1, 1]} : vector<8x256xf32> to vector<8x32xf32>
    %571 = vector.extract_strided_slice %569 {offsets = [0, 128], sizes = [8, 32], strides = [1, 1]} : vector<8x256xf32> to vector<8x32xf32>
    %572 = vector.extract_strided_slice %560 {offsets = [0, 256], sizes = [8, 32], strides = [1, 1]} : vector<8x384xf32> to vector<8x32xf32>
    %573 = vector.extract_strided_slice %561 {offsets = [0, 256], sizes = [8, 32], strides = [1, 1]} : vector<8x384xf32> to vector<8x32xf32>
    %574 = vector.broadcast %448 : vector<1x32xf32> to vector<8x32xf32>
    %575 = arith.addf %573, %574 : vector<8x32xf32>
    %576 = arith.mulf %570, %575 : vector<8x32xf32>
    %577 = arith.addf %572, %576 : vector<8x32xf32>
    %578 = math.tanh %577 : vector<8x32xf32>
    %cst_130 = arith.constant 1.000000e+00 : f32
    %579 = vector.broadcast %cst_130 : f32 to vector<8x32xf32>
    %580 = arith.subf %579, %571 : vector<8x32xf32>
    %581 = arith.mulf %580, %578 : vector<8x32xf32>
    %582 = arith.mulf %571, %557 : vector<8x32xf32>
    %583 = arith.addf %581, %582 : vector<8x32xf32>
    %c32_131 = arith.constant 32 : index
    %c0_132 = arith.constant 0 : index
    %584 = vector.load %arg9[%c32_131, %c0_132] : memref<64x32xf32, #tpu.memory_space<vmem>>, vector<8x32xf32>
    tpu.vector_store %arg9[%c32_131, %c0_132], %583 {strides = array<i32>} : memref<64x32xf32, #tpu.memory_space<vmem>>, vector<8x32xf32>,
    %585 = vector.extract_strided_slice %454 {offsets = [40, 0], sizes = [8, 384], strides = [1, 1]} : vector<64x384xf32> to vector<8x384xf32>
    %586 = arith.addf %585, %452 : vector<8x384xf32>
    %cst_133 = arith.constant dense<0.000000e+00> : vector<8x384xf32>
    %587 = tpu.matmul %583, %446, %cst_133 {dimension_numbers = #tpu.dot_dimension_numbers<[1], [0], [0], [1], [0, 0, 1, 1], [], []>} : vector<8x32xf32>, vector<32x384xf32>, vector<8x384xf32> -> vector<8x384xf32>
    %588 = vector.extract_strided_slice %586 {offsets = [0, 0], sizes = [8, 256], strides = [1, 1]} : vector<8x384xf32> to vector<8x256xf32>
    %589 = vector.extract_strided_slice %587 {offsets = [0, 0], sizes = [8, 256], strides = [1, 1]} : vector<8x384xf32> to vector<8x256xf32>
    %590 = arith.addf %588, %589 : vector<8x256xf32>
    %591 = arith.negf %590 : vector<8x256xf32>
    %592 = math.exp %591 : vector<8x256xf32>
    %cst_134 = arith.constant 1.000000e+00 : f32
    %593 = vector.broadcast %cst_134 : f32 to vector<8x256xf32>
    %594 = arith.addf %593, %592 : vector<8x256xf32>
    %595 = arith.divf %593, %594 : vector<8x256xf32>
    %596 = vector.extract_strided_slice %595 {offsets = [0, 0], sizes = [8, 32], strides = [1, 1]} : vector<8x256xf32> to vector<8x32xf32>
    %597 = vector.extract_strided_slice %595 {offsets = [0, 128], sizes = [8, 32], strides = [1, 1]} : vector<8x256xf32> to vector<8x32xf32>
    %598 = vector.extract_strided_slice %586 {offsets = [0, 256], sizes = [8, 32], strides = [1, 1]} : vector<8x384xf32> to vector<8x32xf32>
    %599 = vector.extract_strided_slice %587 {offsets = [0, 256], sizes = [8, 32], strides = [1, 1]} : vector<8x384xf32> to vector<8x32xf32>
    %600 = vector.broadcast %448 : vector<1x32xf32> to vector<8x32xf32>
    %601 = arith.addf %599, %600 : vector<8x32xf32>
    %602 = arith.mulf %596, %601 : vector<8x32xf32>
    %603 = arith.addf %598, %602 : vector<8x32xf32>
    %604 = math.tanh %603 : vector<8x32xf32>
    %cst_135 = arith.constant 1.000000e+00 : f32
    %605 = vector.broadcast %cst_135 : f32 to vector<8x32xf32>
    %606 = arith.subf %605, %597 : vector<8x32xf32>
    %607 = arith.mulf %606, %604 : vector<8x32xf32>
    %608 = arith.mulf %597, %583 : vector<8x32xf32>
    %609 = arith.addf %607, %608 : vector<8x32xf32>
    %c40_136 = arith.constant 40 : index
    %c0_137 = arith.constant 0 : index
    %610 = vector.load %arg9[%c40_136, %c0_137] : memref<64x32xf32, #tpu.memory_space<vmem>>, vector<8x32xf32>
    tpu.vector_store %arg9[%c40_136, %c0_137], %609 {strides = array<i32>} : memref<64x32xf32, #tpu.memory_space<vmem>>, vector<8x32xf32>,
    %611 = vector.extract_strided_slice %454 {offsets = [48, 0], sizes = [8, 384], strides = [1, 1]} : vector<64x384xf32> to vector<8x384xf32>
    %612 = arith.addf %611, %452 : vector<8x384xf32>
    %cst_138 = arith.constant dense<0.000000e+00> : vector<8x384xf32>
    %613 = tpu.matmul %609, %446, %cst_138 {dimension_numbers = #tpu.dot_dimension_numbers<[1], [0], [0], [1], [0, 0, 1, 1], [], []>} : vector<8x32xf32>, vector<32x384xf32>, vector<8x384xf32> -> vector<8x384xf32>
    %614 = vector.extract_strided_slice %612 {offsets = [0, 0], sizes = [8, 256], strides = [1, 1]} : vector<8x384xf32> to vector<8x256xf32>
    %615 = vector.extract_strided_slice %613 {offsets = [0, 0], sizes = [8, 256], strides = [1, 1]} : vector<8x384xf32> to vector<8x256xf32>
    %616 = arith.addf %614, %615 : vector<8x256xf32>
    %617 = arith.negf %616 : vector<8x256xf32>
    %618 = math.exp %617 : vector<8x256xf32>
    %cst_139 = arith.constant 1.000000e+00 : f32
    %619 = vector.broadcast %cst_139 : f32 to vector<8x256xf32>
    %620 = arith.addf %619, %618 : vector<8x256xf32>
    %621 = arith.divf %619, %620 : vector<8x256xf32>
    %622 = vector.extract_strided_slice %621 {offsets = [0, 0], sizes = [8, 32], strides = [1, 1]} : vector<8x256xf32> to vector<8x32xf32>
    %623 = vector.extract_strided_slice %621 {offsets = [0, 128], sizes = [8, 32], strides = [1, 1]} : vector<8x256xf32> to vector<8x32xf32>
    %624 = vector.extract_strided_slice %612 {offsets = [0, 256], sizes = [8, 32], strides = [1, 1]} : vector<8x384xf32> to vector<8x32xf32>
    %625 = vector.extract_strided_slice %613 {offsets = [0, 256], sizes = [8, 32], strides = [1, 1]} : vector<8x384xf32> to vector<8x32xf32>
    %626 = vector.broadcast %448 : vector<1x32xf32> to vector<8x32xf32>
    %627 = arith.addf %625, %626 : vector<8x32xf32>
    %628 = arith.mulf %622, %627 : vector<8x32xf32>
    %629 = arith.addf %624, %628 : vector<8x32xf32>
    %630 = math.tanh %629 : vector<8x32xf32>
    %cst_140 = arith.constant 1.000000e+00 : f32
    %631 = vector.broadcast %cst_140 : f32 to vector<8x32xf32>
    %632 = arith.subf %631, %623 : vector<8x32xf32>
    %633 = arith.mulf %632, %630 : vector<8x32xf32>
    %634 = arith.mulf %623, %609 : vector<8x32xf32>
    %635 = arith.addf %633, %634 : vector<8x32xf32>
    %c48_141 = arith.constant 48 : index
    %c0_142 = arith.constant 0 : index
    %636 = vector.load %arg9[%c48_141, %c0_142] : memref<64x32xf32, #tpu.memory_space<vmem>>, vector<8x32xf32>
    tpu.vector_store %arg9[%c48_141, %c0_142], %635 {strides = array<i32>} : memref<64x32xf32, #tpu.memory_space<vmem>>, vector<8x32xf32>,
    %637 = vector.extract_strided_slice %454 {offsets = [56, 0], sizes = [8, 384], strides = [1, 1]} : vector<64x384xf32> to vector<8x384xf32>
    %638 = arith.addf %637, %452 : vector<8x384xf32>
    %cst_143 = arith.constant dense<0.000000e+00> : vector<8x384xf32>
    %639 = tpu.matmul %635, %446, %cst_143 {dimension_numbers = #tpu.dot_dimension_numbers<[1], [0], [0], [1], [0, 0, 1, 1], [], []>} : vector<8x32xf32>, vector<32x384xf32>, vector<8x384xf32> -> vector<8x384xf32>
    %640 = vector.extract_strided_slice %638 {offsets = [0, 0], sizes = [8, 256], strides = [1, 1]} : vector<8x384xf32> to vector<8x256xf32>
    %641 = vector.extract_strided_slice %639 {offsets = [0, 0], sizes = [8, 256], strides = [1, 1]} : vector<8x384xf32> to vector<8x256xf32>
    %642 = arith.addf %640, %641 : vector<8x256xf32>
    %643 = arith.negf %642 : vector<8x256xf32>
    %644 = math.exp %643 : vector<8x256xf32>
    %cst_144 = arith.constant 1.000000e+00 : f32
    %645 = vector.broadcast %cst_144 : f32 to vector<8x256xf32>
    %646 = arith.addf %645, %644 : vector<8x256xf32>
    %647 = arith.divf %645, %646 : vector<8x256xf32>
    %648 = vector.extract_strided_slice %647 {offsets = [0, 0], sizes = [8, 32], strides = [1, 1]} : vector<8x256xf32> to vector<8x32xf32>
    %649 = vector.extract_strided_slice %647 {offsets = [0, 128], sizes = [8, 32], strides = [1, 1]} : vector<8x256xf32> to vector<8x32xf32>
    %650 = vector.extract_strided_slice %638 {offsets = [0, 256], sizes = [8, 32], strides = [1, 1]} : vector<8x384xf32> to vector<8x32xf32>
    %651 = vector.extract_strided_slice %639 {offsets = [0, 256], sizes = [8, 32], strides = [1, 1]} : vector<8x384xf32> to vector<8x32xf32>
    %652 = vector.broadcast %448 : vector<1x32xf32> to vector<8x32xf32>
    %653 = arith.addf %651, %652 : vector<8x32xf32>
    %654 = arith.mulf %648, %653 : vector<8x32xf32>
    %655 = arith.addf %650, %654 : vector<8x32xf32>
    %656 = math.tanh %655 : vector<8x32xf32>
    %cst_145 = arith.constant 1.000000e+00 : f32
    %657 = vector.broadcast %cst_145 : f32 to vector<8x32xf32>
    %658 = arith.subf %657, %649 : vector<8x32xf32>
    %659 = arith.mulf %658, %656 : vector<8x32xf32>
    %660 = arith.mulf %649, %635 : vector<8x32xf32>
    %661 = arith.addf %659, %660 : vector<8x32xf32>
    %c56_146 = arith.constant 56 : index
    %c0_147 = arith.constant 0 : index
    %662 = vector.load %arg9[%c56_146, %c0_147] : memref<64x32xf32, #tpu.memory_space<vmem>>, vector<8x32xf32>
    tpu.vector_store %arg9[%c56_146, %c0_147], %661 {strides = array<i32>} : memref<64x32xf32, #tpu.memory_space<vmem>>, vector<8x32xf32>,
    %c0_148 = arith.constant 0 : index
    %c0_149 = arith.constant 0 : index
    %663 = vector.load %arg6[%c0_148, %c0_149] : memref<72x384xf32, #tpu.memory_space<vmem>>, vector<32x384xf32>
    %c32_150 = arith.constant 32 : index
    %c0_151 = arith.constant 0 : index
    %664 = vector.load %arg6[%c32_150, %c0_151] : memref<72x384xf32, #tpu.memory_space<vmem>>, vector<32x384xf32>
    %c64_152 = arith.constant 64 : index
    %c0_153 = arith.constant 0 : index
    %665 = vector.load %arg6[%c64_152, %c0_153] : memref<72x384xf32, #tpu.memory_space<vmem>>, vector<1x384xf32>
    %c65_154 = arith.constant 65 : index
    %c256_155 = arith.constant 256 : index
    %666 = vector.load %arg6[%c65_154, %c256_155] : memref<72x384xf32, #tpu.memory_space<vmem>>, vector<1x32xf32>
    %c0_156 = arith.constant 0 : index
    %c0_157 = arith.constant 0 : index
    %667 = vector.load %arg9[%c0_156, %c0_157] : memref<64x32xf32, #tpu.memory_space<vmem>>, vector<64x32xf32>
    %cst_158 = arith.constant dense<0.000000e+00> : vector<64x384xf32>
    %668 = tpu.matmul %667, %663, %cst_158 {dimension_numbers = #tpu.dot_dimension_numbers<[1], [0], [0], [1], [0, 0, 1, 1], [], []>} : vector<64x32xf32>, vector<32x384xf32>, vector<64x384xf32> -> vector<64x384xf32>
    %669 = vector.broadcast %665 : vector<1x384xf32> to vector<64x384xf32>
    %670 = arith.addf %668, %669 : vector<64x384xf32>
    %671 = vector.extract_strided_slice %670 {offsets = [0, 0], sizes = [8, 384], strides = [1, 1]} : vector<64x384xf32> to vector<8x384xf32>
    %cst_159 = arith.constant dense<0.000000e+00> : vector<8x384xf32>
    %672 = tpu.matmul %440, %664, %cst_159 {dimension_numbers = #tpu.dot_dimension_numbers<[1], [0], [0], [1], [0, 0, 1, 1], [], []>} : vector<8x32xf32>, vector<32x384xf32>, vector<8x384xf32> -> vector<8x384xf32>
    %673 = vector.extract_strided_slice %671 {offsets = [0, 0], sizes = [8, 256], strides = [1, 1]} : vector<8x384xf32> to vector<8x256xf32>
    %674 = vector.extract_strided_slice %672 {offsets = [0, 0], sizes = [8, 256], strides = [1, 1]} : vector<8x384xf32> to vector<8x256xf32>
    %675 = arith.addf %673, %674 : vector<8x256xf32>
    %676 = arith.negf %675 : vector<8x256xf32>
    %677 = math.exp %676 : vector<8x256xf32>
    %cst_160 = arith.constant 1.000000e+00 : f32
    %678 = vector.broadcast %cst_160 : f32 to vector<8x256xf32>
    %679 = arith.addf %678, %677 : vector<8x256xf32>
    %680 = arith.divf %678, %679 : vector<8x256xf32>
    %681 = vector.extract_strided_slice %680 {offsets = [0, 0], sizes = [8, 32], strides = [1, 1]} : vector<8x256xf32> to vector<8x32xf32>
    %682 = vector.extract_strided_slice %680 {offsets = [0, 128], sizes = [8, 32], strides = [1, 1]} : vector<8x256xf32> to vector<8x32xf32>
    %683 = vector.extract_strided_slice %671 {offsets = [0, 256], sizes = [8, 32], strides = [1, 1]} : vector<8x384xf32> to vector<8x32xf32>
    %684 = vector.extract_strided_slice %672 {offsets = [0, 256], sizes = [8, 32], strides = [1, 1]} : vector<8x384xf32> to vector<8x32xf32>
    %685 = vector.broadcast %666 : vector<1x32xf32> to vector<8x32xf32>
    %686 = arith.addf %684, %685 : vector<8x32xf32>
    %687 = arith.mulf %681, %686 : vector<8x32xf32>
    %688 = arith.addf %683, %687 : vector<8x32xf32>
    %689 = math.tanh %688 : vector<8x32xf32>
    %cst_161 = arith.constant 1.000000e+00 : f32
    %690 = vector.broadcast %cst_161 : f32 to vector<8x32xf32>
    %691 = arith.subf %690, %682 : vector<8x32xf32>
    %692 = arith.mulf %691, %689 : vector<8x32xf32>
    %693 = arith.mulf %682, %440 : vector<8x32xf32>
    %694 = arith.addf %692, %693 : vector<8x32xf32>
    %c0_162 = arith.constant 0 : index
    %c0_163 = arith.constant 0 : index
    %695 = vector.load %arg9[%c0_162, %c0_163] : memref<64x32xf32, #tpu.memory_space<vmem>>, vector<8x32xf32>
    tpu.vector_store %arg9[%c0_162, %c0_163], %694 {strides = array<i32>} : memref<64x32xf32, #tpu.memory_space<vmem>>, vector<8x32xf32>,
    %696 = vector.extract_strided_slice %670 {offsets = [8, 0], sizes = [8, 384], strides = [1, 1]} : vector<64x384xf32> to vector<8x384xf32>
    %cst_164 = arith.constant dense<0.000000e+00> : vector<8x384xf32>
    %697 = tpu.matmul %694, %664, %cst_164 {dimension_numbers = #tpu.dot_dimension_numbers<[1], [0], [0], [1], [0, 0, 1, 1], [], []>} : vector<8x32xf32>, vector<32x384xf32>, vector<8x384xf32> -> vector<8x384xf32>
    %698 = vector.extract_strided_slice %696 {offsets = [0, 0], sizes = [8, 256], strides = [1, 1]} : vector<8x384xf32> to vector<8x256xf32>
    %699 = vector.extract_strided_slice %697 {offsets = [0, 0], sizes = [8, 256], strides = [1, 1]} : vector<8x384xf32> to vector<8x256xf32>
    %700 = arith.addf %698, %699 : vector<8x256xf32>
    %701 = arith.negf %700 : vector<8x256xf32>
    %702 = math.exp %701 : vector<8x256xf32>
    %cst_165 = arith.constant 1.000000e+00 : f32
    %703 = vector.broadcast %cst_165 : f32 to vector<8x256xf32>
    %704 = arith.addf %703, %702 : vector<8x256xf32>
    %705 = arith.divf %703, %704 : vector<8x256xf32>
    %706 = vector.extract_strided_slice %705 {offsets = [0, 0], sizes = [8, 32], strides = [1, 1]} : vector<8x256xf32> to vector<8x32xf32>
    %707 = vector.extract_strided_slice %705 {offsets = [0, 128], sizes = [8, 32], strides = [1, 1]} : vector<8x256xf32> to vector<8x32xf32>
    %708 = vector.extract_strided_slice %696 {offsets = [0, 256], sizes = [8, 32], strides = [1, 1]} : vector<8x384xf32> to vector<8x32xf32>
    %709 = vector.extract_strided_slice %697 {offsets = [0, 256], sizes = [8, 32], strides = [1, 1]} : vector<8x384xf32> to vector<8x32xf32>
    %710 = vector.broadcast %666 : vector<1x32xf32> to vector<8x32xf32>
    %711 = arith.addf %709, %710 : vector<8x32xf32>
    %712 = arith.mulf %706, %711 : vector<8x32xf32>
    %713 = arith.addf %708, %712 : vector<8x32xf32>
    %714 = math.tanh %713 : vector<8x32xf32>
    %cst_166 = arith.constant 1.000000e+00 : f32
    %715 = vector.broadcast %cst_166 : f32 to vector<8x32xf32>
    %716 = arith.subf %715, %707 : vector<8x32xf32>
    %717 = arith.mulf %716, %714 : vector<8x32xf32>
    %718 = arith.mulf %707, %694 : vector<8x32xf32>
    %719 = arith.addf %717, %718 : vector<8x32xf32>
    %c8_167 = arith.constant 8 : index
    %c0_168 = arith.constant 0 : index
    %720 = vector.load %arg9[%c8_167, %c0_168] : memref<64x32xf32, #tpu.memory_space<vmem>>, vector<8x32xf32>
    tpu.vector_store %arg9[%c8_167, %c0_168], %719 {strides = array<i32>} : memref<64x32xf32, #tpu.memory_space<vmem>>, vector<8x32xf32>,
    %721 = vector.extract_strided_slice %670 {offsets = [16, 0], sizes = [8, 384], strides = [1, 1]} : vector<64x384xf32> to vector<8x384xf32>
    %cst_169 = arith.constant dense<0.000000e+00> : vector<8x384xf32>
    %722 = tpu.matmul %719, %664, %cst_169 {dimension_numbers = #tpu.dot_dimension_numbers<[1], [0], [0], [1], [0, 0, 1, 1], [], []>} : vector<8x32xf32>, vector<32x384xf32>, vector<8x384xf32> -> vector<8x384xf32>
    %723 = vector.extract_strided_slice %721 {offsets = [0, 0], sizes = [8, 256], strides = [1, 1]} : vector<8x384xf32> to vector<8x256xf32>
    %724 = vector.extract_strided_slice %722 {offsets = [0, 0], sizes = [8, 256], strides = [1, 1]} : vector<8x384xf32> to vector<8x256xf32>
    %725 = arith.addf %723, %724 : vector<8x256xf32>
    %726 = arith.negf %725 : vector<8x256xf32>
    %727 = math.exp %726 : vector<8x256xf32>
    %cst_170 = arith.constant 1.000000e+00 : f32
    %728 = vector.broadcast %cst_170 : f32 to vector<8x256xf32>
    %729 = arith.addf %728, %727 : vector<8x256xf32>
    %730 = arith.divf %728, %729 : vector<8x256xf32>
    %731 = vector.extract_strided_slice %730 {offsets = [0, 0], sizes = [8, 32], strides = [1, 1]} : vector<8x256xf32> to vector<8x32xf32>
    %732 = vector.extract_strided_slice %730 {offsets = [0, 128], sizes = [8, 32], strides = [1, 1]} : vector<8x256xf32> to vector<8x32xf32>
    %733 = vector.extract_strided_slice %721 {offsets = [0, 256], sizes = [8, 32], strides = [1, 1]} : vector<8x384xf32> to vector<8x32xf32>
    %734 = vector.extract_strided_slice %722 {offsets = [0, 256], sizes = [8, 32], strides = [1, 1]} : vector<8x384xf32> to vector<8x32xf32>
    %735 = vector.broadcast %666 : vector<1x32xf32> to vector<8x32xf32>
    %736 = arith.addf %734, %735 : vector<8x32xf32>
    %737 = arith.mulf %731, %736 : vector<8x32xf32>
    %738 = arith.addf %733, %737 : vector<8x32xf32>
    %739 = math.tanh %738 : vector<8x32xf32>
    %cst_171 = arith.constant 1.000000e+00 : f32
    %740 = vector.broadcast %cst_171 : f32 to vector<8x32xf32>
    %741 = arith.subf %740, %732 : vector<8x32xf32>
    %742 = arith.mulf %741, %739 : vector<8x32xf32>
    %743 = arith.mulf %732, %719 : vector<8x32xf32>
    %744 = arith.addf %742, %743 : vector<8x32xf32>
    %c16_172 = arith.constant 16 : index
    %c0_173 = arith.constant 0 : index
    %745 = vector.load %arg9[%c16_172, %c0_173] : memref<64x32xf32, #tpu.memory_space<vmem>>, vector<8x32xf32>
    tpu.vector_store %arg9[%c16_172, %c0_173], %744 {strides = array<i32>} : memref<64x32xf32, #tpu.memory_space<vmem>>, vector<8x32xf32>,
    %746 = vector.extract_strided_slice %670 {offsets = [24, 0], sizes = [8, 384], strides = [1, 1]} : vector<64x384xf32> to vector<8x384xf32>
    %cst_174 = arith.constant dense<0.000000e+00> : vector<8x384xf32>
    %747 = tpu.matmul %744, %664, %cst_174 {dimension_numbers = #tpu.dot_dimension_numbers<[1], [0], [0], [1], [0, 0, 1, 1], [], []>} : vector<8x32xf32>, vector<32x384xf32>, vector<8x384xf32> -> vector<8x384xf32>
    %748 = vector.extract_strided_slice %746 {offsets = [0, 0], sizes = [8, 256], strides = [1, 1]} : vector<8x384xf32> to vector<8x256xf32>
    %749 = vector.extract_strided_slice %747 {offsets = [0, 0], sizes = [8, 256], strides = [1, 1]} : vector<8x384xf32> to vector<8x256xf32>
    %750 = arith.addf %748, %749 : vector<8x256xf32>
    %751 = arith.negf %750 : vector<8x256xf32>
    %752 = math.exp %751 : vector<8x256xf32>
    %cst_175 = arith.constant 1.000000e+00 : f32
    %753 = vector.broadcast %cst_175 : f32 to vector<8x256xf32>
    %754 = arith.addf %753, %752 : vector<8x256xf32>
    %755 = arith.divf %753, %754 : vector<8x256xf32>
    %756 = vector.extract_strided_slice %755 {offsets = [0, 0], sizes = [8, 32], strides = [1, 1]} : vector<8x256xf32> to vector<8x32xf32>
    %757 = vector.extract_strided_slice %755 {offsets = [0, 128], sizes = [8, 32], strides = [1, 1]} : vector<8x256xf32> to vector<8x32xf32>
    %758 = vector.extract_strided_slice %746 {offsets = [0, 256], sizes = [8, 32], strides = [1, 1]} : vector<8x384xf32> to vector<8x32xf32>
    %759 = vector.extract_strided_slice %747 {offsets = [0, 256], sizes = [8, 32], strides = [1, 1]} : vector<8x384xf32> to vector<8x32xf32>
    %760 = vector.broadcast %666 : vector<1x32xf32> to vector<8x32xf32>
    %761 = arith.addf %759, %760 : vector<8x32xf32>
    %762 = arith.mulf %756, %761 : vector<8x32xf32>
    %763 = arith.addf %758, %762 : vector<8x32xf32>
    %764 = math.tanh %763 : vector<8x32xf32>
    %cst_176 = arith.constant 1.000000e+00 : f32
    %765 = vector.broadcast %cst_176 : f32 to vector<8x32xf32>
    %766 = arith.subf %765, %757 : vector<8x32xf32>
    %767 = arith.mulf %766, %764 : vector<8x32xf32>
    %768 = arith.mulf %757, %744 : vector<8x32xf32>
    %769 = arith.addf %767, %768 : vector<8x32xf32>
    %c24_177 = arith.constant 24 : index
    %c0_178 = arith.constant 0 : index
    %770 = vector.load %arg9[%c24_177, %c0_178] : memref<64x32xf32, #tpu.memory_space<vmem>>, vector<8x32xf32>
    tpu.vector_store %arg9[%c24_177, %c0_178], %769 {strides = array<i32>} : memref<64x32xf32, #tpu.memory_space<vmem>>, vector<8x32xf32>,
    %771 = vector.extract_strided_slice %670 {offsets = [32, 0], sizes = [8, 384], strides = [1, 1]} : vector<64x384xf32> to vector<8x384xf32>
    %cst_179 = arith.constant dense<0.000000e+00> : vector<8x384xf32>
    %772 = tpu.matmul %769, %664, %cst_179 {dimension_numbers = #tpu.dot_dimension_numbers<[1], [0], [0], [1], [0, 0, 1, 1], [], []>} : vector<8x32xf32>, vector<32x384xf32>, vector<8x384xf32> -> vector<8x384xf32>
    %773 = vector.extract_strided_slice %771 {offsets = [0, 0], sizes = [8, 256], strides = [1, 1]} : vector<8x384xf32> to vector<8x256xf32>
    %774 = vector.extract_strided_slice %772 {offsets = [0, 0], sizes = [8, 256], strides = [1, 1]} : vector<8x384xf32> to vector<8x256xf32>
    %775 = arith.addf %773, %774 : vector<8x256xf32>
    %776 = arith.negf %775 : vector<8x256xf32>
    %777 = math.exp %776 : vector<8x256xf32>
    %cst_180 = arith.constant 1.000000e+00 : f32
    %778 = vector.broadcast %cst_180 : f32 to vector<8x256xf32>
    %779 = arith.addf %778, %777 : vector<8x256xf32>
    %780 = arith.divf %778, %779 : vector<8x256xf32>
    %781 = vector.extract_strided_slice %780 {offsets = [0, 0], sizes = [8, 32], strides = [1, 1]} : vector<8x256xf32> to vector<8x32xf32>
    %782 = vector.extract_strided_slice %780 {offsets = [0, 128], sizes = [8, 32], strides = [1, 1]} : vector<8x256xf32> to vector<8x32xf32>
    %783 = vector.extract_strided_slice %771 {offsets = [0, 256], sizes = [8, 32], strides = [1, 1]} : vector<8x384xf32> to vector<8x32xf32>
    %784 = vector.extract_strided_slice %772 {offsets = [0, 256], sizes = [8, 32], strides = [1, 1]} : vector<8x384xf32> to vector<8x32xf32>
    %785 = vector.broadcast %666 : vector<1x32xf32> to vector<8x32xf32>
    %786 = arith.addf %784, %785 : vector<8x32xf32>
    %787 = arith.mulf %781, %786 : vector<8x32xf32>
    %788 = arith.addf %783, %787 : vector<8x32xf32>
    %789 = math.tanh %788 : vector<8x32xf32>
    %cst_181 = arith.constant 1.000000e+00 : f32
    %790 = vector.broadcast %cst_181 : f32 to vector<8x32xf32>
    %791 = arith.subf %790, %782 : vector<8x32xf32>
    %792 = arith.mulf %791, %789 : vector<8x32xf32>
    %793 = arith.mulf %782, %769 : vector<8x32xf32>
    %794 = arith.addf %792, %793 : vector<8x32xf32>
    %c32_182 = arith.constant 32 : index
    %c0_183 = arith.constant 0 : index
    %795 = vector.load %arg9[%c32_182, %c0_183] : memref<64x32xf32, #tpu.memory_space<vmem>>, vector<8x32xf32>
    tpu.vector_store %arg9[%c32_182, %c0_183], %794 {strides = array<i32>} : memref<64x32xf32, #tpu.memory_space<vmem>>, vector<8x32xf32>,
    %796 = vector.extract_strided_slice %670 {offsets = [40, 0], sizes = [8, 384], strides = [1, 1]} : vector<64x384xf32> to vector<8x384xf32>
    %cst_184 = arith.constant dense<0.000000e+00> : vector<8x384xf32>
    %797 = tpu.matmul %794, %664, %cst_184 {dimension_numbers = #tpu.dot_dimension_numbers<[1], [0], [0], [1], [0, 0, 1, 1], [], []>} : vector<8x32xf32>, vector<32x384xf32>, vector<8x384xf32> -> vector<8x384xf32>
    %798 = vector.extract_strided_slice %796 {offsets = [0, 0], sizes = [8, 256], strides = [1, 1]} : vector<8x384xf32> to vector<8x256xf32>
    %799 = vector.extract_strided_slice %797 {offsets = [0, 0], sizes = [8, 256], strides = [1, 1]} : vector<8x384xf32> to vector<8x256xf32>
    %800 = arith.addf %798, %799 : vector<8x256xf32>
    %801 = arith.negf %800 : vector<8x256xf32>
    %802 = math.exp %801 : vector<8x256xf32>
    %cst_185 = arith.constant 1.000000e+00 : f32
    %803 = vector.broadcast %cst_185 : f32 to vector<8x256xf32>
    %804 = arith.addf %803, %802 : vector<8x256xf32>
    %805 = arith.divf %803, %804 : vector<8x256xf32>
    %806 = vector.extract_strided_slice %805 {offsets = [0, 0], sizes = [8, 32], strides = [1, 1]} : vector<8x256xf32> to vector<8x32xf32>
    %807 = vector.extract_strided_slice %805 {offsets = [0, 128], sizes = [8, 32], strides = [1, 1]} : vector<8x256xf32> to vector<8x32xf32>
    %808 = vector.extract_strided_slice %796 {offsets = [0, 256], sizes = [8, 32], strides = [1, 1]} : vector<8x384xf32> to vector<8x32xf32>
    %809 = vector.extract_strided_slice %797 {offsets = [0, 256], sizes = [8, 32], strides = [1, 1]} : vector<8x384xf32> to vector<8x32xf32>
    %810 = vector.broadcast %666 : vector<1x32xf32> to vector<8x32xf32>
    %811 = arith.addf %809, %810 : vector<8x32xf32>
    %812 = arith.mulf %806, %811 : vector<8x32xf32>
    %813 = arith.addf %808, %812 : vector<8x32xf32>
    %814 = math.tanh %813 : vector<8x32xf32>
    %cst_186 = arith.constant 1.000000e+00 : f32
    %815 = vector.broadcast %cst_186 : f32 to vector<8x32xf32>
    %816 = arith.subf %815, %807 : vector<8x32xf32>
    %817 = arith.mulf %816, %814 : vector<8x32xf32>
    %818 = arith.mulf %807, %794 : vector<8x32xf32>
    %819 = arith.addf %817, %818 : vector<8x32xf32>
    %c40_187 = arith.constant 40 : index
    %c0_188 = arith.constant 0 : index
    %820 = vector.load %arg9[%c40_187, %c0_188] : memref<64x32xf32, #tpu.memory_space<vmem>>, vector<8x32xf32>
    tpu.vector_store %arg9[%c40_187, %c0_188], %819 {strides = array<i32>} : memref<64x32xf32, #tpu.memory_space<vmem>>, vector<8x32xf32>,
    %821 = vector.extract_strided_slice %670 {offsets = [48, 0], sizes = [8, 384], strides = [1, 1]} : vector<64x384xf32> to vector<8x384xf32>
    %cst_189 = arith.constant dense<0.000000e+00> : vector<8x384xf32>
    %822 = tpu.matmul %819, %664, %cst_189 {dimension_numbers = #tpu.dot_dimension_numbers<[1], [0], [0], [1], [0, 0, 1, 1], [], []>} : vector<8x32xf32>, vector<32x384xf32>, vector<8x384xf32> -> vector<8x384xf32>
    %823 = vector.extract_strided_slice %821 {offsets = [0, 0], sizes = [8, 256], strides = [1, 1]} : vector<8x384xf32> to vector<8x256xf32>
    %824 = vector.extract_strided_slice %822 {offsets = [0, 0], sizes = [8, 256], strides = [1, 1]} : vector<8x384xf32> to vector<8x256xf32>
    %825 = arith.addf %823, %824 : vector<8x256xf32>
    %826 = arith.negf %825 : vector<8x256xf32>
    %827 = math.exp %826 : vector<8x256xf32>
    %cst_190 = arith.constant 1.000000e+00 : f32
    %828 = vector.broadcast %cst_190 : f32 to vector<8x256xf32>
    %829 = arith.addf %828, %827 : vector<8x256xf32>
    %830 = arith.divf %828, %829 : vector<8x256xf32>
    %831 = vector.extract_strided_slice %830 {offsets = [0, 0], sizes = [8, 32], strides = [1, 1]} : vector<8x256xf32> to vector<8x32xf32>
    %832 = vector.extract_strided_slice %830 {offsets = [0, 128], sizes = [8, 32], strides = [1, 1]} : vector<8x256xf32> to vector<8x32xf32>
    %833 = vector.extract_strided_slice %821 {offsets = [0, 256], sizes = [8, 32], strides = [1, 1]} : vector<8x384xf32> to vector<8x32xf32>
    %834 = vector.extract_strided_slice %822 {offsets = [0, 256], sizes = [8, 32], strides = [1, 1]} : vector<8x384xf32> to vector<8x32xf32>
    %835 = vector.broadcast %666 : vector<1x32xf32> to vector<8x32xf32>
    %836 = arith.addf %834, %835 : vector<8x32xf32>
    %837 = arith.mulf %831, %836 : vector<8x32xf32>
    %838 = arith.addf %833, %837 : vector<8x32xf32>
    %839 = math.tanh %838 : vector<8x32xf32>
    %cst_191 = arith.constant 1.000000e+00 : f32
    %840 = vector.broadcast %cst_191 : f32 to vector<8x32xf32>
    %841 = arith.subf %840, %832 : vector<8x32xf32>
    %842 = arith.mulf %841, %839 : vector<8x32xf32>
    %843 = arith.mulf %832, %819 : vector<8x32xf32>
    %844 = arith.addf %842, %843 : vector<8x32xf32>
    %c48_192 = arith.constant 48 : index
    %c0_193 = arith.constant 0 : index
    %845 = vector.load %arg9[%c48_192, %c0_193] : memref<64x32xf32, #tpu.memory_space<vmem>>, vector<8x32xf32>
    tpu.vector_store %arg9[%c48_192, %c0_193], %844 {strides = array<i32>} : memref<64x32xf32, #tpu.memory_space<vmem>>, vector<8x32xf32>,
    %846 = vector.extract_strided_slice %670 {offsets = [56, 0], sizes = [8, 384], strides = [1, 1]} : vector<64x384xf32> to vector<8x384xf32>
    %cst_194 = arith.constant dense<0.000000e+00> : vector<8x384xf32>
    %847 = tpu.matmul %844, %664, %cst_194 {dimension_numbers = #tpu.dot_dimension_numbers<[1], [0], [0], [1], [0, 0, 1, 1], [], []>} : vector<8x32xf32>, vector<32x384xf32>, vector<8x384xf32> -> vector<8x384xf32>
    %848 = vector.extract_strided_slice %846 {offsets = [0, 0], sizes = [8, 256], strides = [1, 1]} : vector<8x384xf32> to vector<8x256xf32>
    %849 = vector.extract_strided_slice %847 {offsets = [0, 0], sizes = [8, 256], strides = [1, 1]} : vector<8x384xf32> to vector<8x256xf32>
    %850 = arith.addf %848, %849 : vector<8x256xf32>
    %851 = arith.negf %850 : vector<8x256xf32>
    %852 = math.exp %851 : vector<8x256xf32>
    %cst_195 = arith.constant 1.000000e+00 : f32
    %853 = vector.broadcast %cst_195 : f32 to vector<8x256xf32>
    %854 = arith.addf %853, %852 : vector<8x256xf32>
    %855 = arith.divf %853, %854 : vector<8x256xf32>
    %856 = vector.extract_strided_slice %855 {offsets = [0, 0], sizes = [8, 32], strides = [1, 1]} : vector<8x256xf32> to vector<8x32xf32>
    %857 = vector.extract_strided_slice %855 {offsets = [0, 128], sizes = [8, 32], strides = [1, 1]} : vector<8x256xf32> to vector<8x32xf32>
    %858 = vector.extract_strided_slice %846 {offsets = [0, 256], sizes = [8, 32], strides = [1, 1]} : vector<8x384xf32> to vector<8x32xf32>
    %859 = vector.extract_strided_slice %847 {offsets = [0, 256], sizes = [8, 32], strides = [1, 1]} : vector<8x384xf32> to vector<8x32xf32>
    %860 = vector.broadcast %666 : vector<1x32xf32> to vector<8x32xf32>
    %861 = arith.addf %859, %860 : vector<8x32xf32>
    %862 = arith.mulf %856, %861 : vector<8x32xf32>
    %863 = arith.addf %858, %862 : vector<8x32xf32>
    %864 = math.tanh %863 : vector<8x32xf32>
    %cst_196 = arith.constant 1.000000e+00 : f32
    %865 = vector.broadcast %cst_196 : f32 to vector<8x32xf32>
    %866 = arith.subf %865, %857 : vector<8x32xf32>
    %867 = arith.mulf %866, %864 : vector<8x32xf32>
    %868 = arith.mulf %857, %844 : vector<8x32xf32>
    %869 = arith.addf %867, %868 : vector<8x32xf32>
    %c56_197 = arith.constant 56 : index
    %c0_198 = arith.constant 0 : index
    %870 = vector.load %arg9[%c56_197, %c0_198] : memref<64x32xf32, #tpu.memory_space<vmem>>, vector<8x32xf32>
    tpu.vector_store %arg9[%c56_197, %c0_198], %869 {strides = array<i32>} : memref<64x32xf32, #tpu.memory_space<vmem>>, vector<8x32xf32>,
    %c0_199 = arith.constant 0 : index
    %c0_200 = arith.constant 0 : index
    %871 = vector.load %arg9[%c0_199, %c0_200] : memref<64x32xf32, #tpu.memory_space<vmem>>, vector<64x32xf32>
    %cst_201 = arith.constant dense<0.000000e+00> : vector<64x4xf32>
    %872 = tpu.matmul %871, %417, %cst_201 {dimension_numbers = #tpu.dot_dimension_numbers<[1], [0], [0], [1], [0, 0, 1, 1], [], []>} : vector<64x32xf32>, vector<32x4xf32>, vector<64x4xf32> -> vector<64x4xf32>
    %873 = vector.broadcast %418 : vector<1x4xf32> to vector<64x4xf32>
    %874 = arith.addf %872, %873 : vector<64x4xf32>
    %c0_202 = arith.constant 0 : index
    %c0_203 = arith.constant 0 : index
    %875 = vector.load %arg8[%c0_202, %c0_203] : memref<64x4xf32, #tpu.memory_space<vmem>>, vector<64x4xf32>
    tpu.vector_store %arg8[%c0_202, %c0_203], %874 {strides = array<i32>} : memref<64x4xf32, #tpu.memory_space<vmem>>, vector<64x4xf32>,
    return
  }
}

</mosaic_0001>

<bundles_post_ra>
// kernel: grued_forward.1
= control target key start
LH: loop header
LB: loop body
LE: loop exit
PB: predicated region body
PF: predicated region fallthrough
CT: control target
= control target key end

     0   :  { %13 = vsyncpa [#allocation4], 0  ;;  %s10555_s0 = inlined_call_operand.vmem [shape: f32[64,4], index: 0, kind: input, shape index: {}]   ;;  %s10556_s1 = inlined_call_operand.vmem [shape: f32[64,4], index: 1, kind: input, shape index: {}]   ;;  %s10557_s2 = inlined_call_operand.vmem [shape: f32[8,32], index: 2, kind: input, shape index: {}]   ;;  %s10558_s3 = inlined_call_operand.hbm [shape: f32[48,384], index: 3, kind: input, shape index: {}]   ;;  %s10559_s4 = inlined_call_operand.vmem [shape: f32[72,384], index: 4, kind: input, shape index: {}]   ;;  %s10560_s5 = inlined_call_operand.vmem [shape: f32[80,384], index: 5, kind: input, shape index: {}]   ;;  %s10561_s6 = inlined_call_operand.hbm [shape: f32[72,384], index: 6, kind: input, shape index: {}]   ;;  %s10562_s7 = inlined_call_operand.vmem [shape: f32[168,32], index: 7, kind: input, shape index: {}]   ;;  %s10563_s8 = inlined_call_operand.vmem [shape: f32[64,4], index: 8, kind: output, shape index: {}]  }
   0x1   :  { %14 = vsyncpa [#allocation6], 0  ;;  %s9233_s27 = smov [#allocation3]   ;;  %s9185_s9 = scalar_lea.hbm %s10558_s3, 2304 }
   0x2   :  { %s26_s28 = sshll.u32 %s9233_s27, 4  ;;  %p9186_p0 = scmp.ne.s32.totalorder %s10558_s3, %s9185_s9  ;;  %s27_s28 = int_to_ptr.vmem [resolvable:$true] %s26_s28 }
   0x3   :  { %p9189_p1 = scmp.lt.u32.totalorder %s9185_s9, %s10558_s3 }
   0x5   :  { %p9191_p2 = pnand %p9189_p1, %p9186_p0 }
   0x7   :  { %9194 = shalt.err (!%p9191_p2)
}
   0x8   :  { %s9195_s14 = scalar_lea.vmem %s27_s28, 2304  ;;  %p9200_p4 = scmp.lt.s32.totalorder %s27_s28, %s27_s28 }
   0x9   :  { %p9196_p3 = scmp.ne.s32.totalorder %s27_s28, %s9195_s14  ;;  %p9201_p5 = scmp.lt.s32.totalorder %s9195_s14, %s9195_s14 }
   0xb   :  { %p9202_p6 = por %p9201_p5, %p9200_p4 }
   0xd   :  { %p9203_p7 = pnand %p9202_p6, %p9196_p3 }
   0xf   :  { %9206 = shalt.err (!%p9203_p7)
}
  0x10   :  { %s9234_s15 = smov 384   ;;  %s9235_s16 = smov 24  }
  0x11   :  { %32 = dma.hbm_to_vmem [thread:$0]  %s10558_s3, 2304, %s27_s28, [#allocation4], %s9234_s15, %s9234_s15, %s9235_s16  }
  0x12   :  { %s9236_s19 = smov [#allocation5]   ;;  %s9207_s23 = scalar_lea.hbm %s10561_s6, 3456 }
  0x13   :  { %s42_s20 = sshll.u32 %s9236_s19, 4  ;;  %p9208_p8 = scmp.ne.s32.totalorder %s10561_s6, %s9207_s23  ;;  %s43_s20 = int_to_ptr.vmem [resolvable:$true] %s42_s20 }
  0x14   :  { %p9211_p9 = scmp.lt.u32.totalorder %s9207_s23, %s10561_s6 }
  0x16   :  { %p9213_p10 = pnand %p9211_p9, %p9208_p8 }
  0x18   :  { %9216 = shalt.err (!%p9213_p10)
}
  0x19   :  { %s9217_s29 = scalar_lea.vmem %s43_s20, 3456  ;;  %p9222_p12 = scmp.lt.s32.totalorder %s43_s20, %s43_s20 }
  0x1a   :  { %p9218_p11 = scmp.ne.s32.totalorder %s43_s20, %s9217_s29  ;;  %p9223_p13 = scmp.lt.s32.totalorder %s9217_s29, %s9217_s29 }
  0x1c   :  { %p9224_p0 = por %p9223_p13, %p9222_p12 }
  0x1e   :  { %p9225_p1 = pnand %p9224_p0, %p9218_p11 }
  0x20   :  { %9228 = shalt.err (!%p9225_p1)
}
  0x21   :  { %48 = dma.hbm_to_vmem [thread:$0]  %s10561_s6, 3456, %s43_s20, [#allocation6], %s9234_s15, %s9234_s15, %s9235_s16  }
  0x22   :  { %9229 = dma.done.wait [#allocation4], 2304  }
  0x23   :  { %9230 = vsyncadd [#allocation4], 4294964992 }
  0x24   :  { %9231 = dma.done.wait [#allocation6], 3456  }
  0x25   :  { %9232 = vsyncadd [#allocation6], 4294963840  ;;  %v9237_v0 = vmov 0.0   ;;  %vm124_vm0 = vcmask 1043456   ;;  %v58_v1 = vld [vmem:[#allocation3 + $0x8] sm:$0xf]  ;;  %v84_v31 = vlaneseq }
  0x26   :  { %198 = vmatprep.mubr.f32.mxu0 %v9237_v0  ;;  %234 = vmatprep.mubr.f32.mxu1 %v9237_v0  ;;  %v57_v2 = vld [vmem:[#allocation3] sm:$0xf]  ;;  %vm99_vm1 = vcmask 31744   ;;  %v64_v5 = vld [vmem:[#allocation3 + $0x38] sm:$0xff]  ;;  %v63_v8 = vld [vmem:[#allocation3 + $0x30] sm:$0xff]  ;;  %v9238_v23 = vmov 0.0|0.0  }
  0x27   :  { %v75_v3 = vld [vmem:[%s10555_s0] sm:$0xff]  ;;  %7243 = vmatprep.subr.msk.mxu0 %vm124_vm0, %v58_v1  ;;  %v60_v6 = vld [vmem:[#allocation3 + $0x18] sm:$0xff]  ;;  %8720 = vmatprep.subr.msk.mxu1 %vm124_vm0, %v58_v1  ;;  %v67_v10 = vld [vmem:[#allocation3 + $0x50] sm:$0xff]  ;;  %vm9239_vm2 = vmmov 0   ;;  %v85_v32 = vshrl.u32 %v84_v31, 7  ;;  %vm352_vm3 = vcmask 261120  }
  0x28   :  { %v61_v4 = vld [vmem:[#allocation3 + $0x20] sm:$0xff]  ;;  %7244 = vmatpush1.msk.msra.mxu0 %vm124_vm0, %v57_v2  ;;  %8721 = vmatpush1.msk.msra.mxu1 %vm124_vm0, %v57_v2  ;;  %v9321_v9 = vpack.c.bf16 %v63_v8, %v60_v6  ;;  %v70_v11 = vld [vmem:[#allocation3 + $0x68] sm:$0xff]  ;;  %v81_v17 = vld [vmem:[%s10555_s0 + $0x30] sm:$0xff] }
  0x29   :  { %v9317_v7 = vpack.c.bf16 %v64_v5, %v61_v4  ;;  %7245 = vmatmul.mubr.msk.f32.vlgmr.msra.gmra.mrb[0].mxu0 %vm99_vm1, %v75_v3  ;;  %v76_v12 = vld [vmem:[%s10555_s0 + $0x8] sm:$0xff]  ;;  %v9328_v13 = vpack.c.bf16 %v70_v11, %v67_v10  ;;  %v69_v15 = vld [vmem:[#allocation3 + $0x60] sm:$0xff]  ;;  %v59_v18 = vld [vmem:[#allocation3 + $0x10] sm:$0xf]  ;;  %7251 = vmatmul.mubr.msk.f32.vlgmr.msra.gmra.mrb[0].mxu1 %vm99_vm1, %v81_v17  ;;  %v9405_v35 = vsub.s32 2, %v85_v32  ;;  %v9416_v46 = vsub.s32 0, %v85_v32 }
  0x2a   :  { %204 = vmatprep.mubr.f32.mxu0 %v9237_v0  ;;  %v66_v14 = vld [vmem:[#allocation3 + $0x48] sm:$0xff]  ;;  %7699 = vmatprep.subr.msk.mxu1 %vm124_vm0, %v59_v18  ;;  %v82_v19 = vld [vmem:[%s10555_s0 + $0x38] sm:$0xff]  ;;  %v77_v20 = vld [vmem:[%s10555_s0 + $0x10] sm:$0xff]  ;;  %v9420_v49 = vsub.s32 1, %v85_v32 }
  0x2b   :  { %8195 = vmatprep.subr.bf16.mxu0 %v9317_v7  ;;  %v9331_v16 = vpack.c.bf16 %v69_v15, %v66_v14  ;;  %7700 = vmatpush3.msk.msra.mxu1 %vm124_vm0, %v59_v18  ;;  %v62_v21 = vld [vmem:[#allocation3 + $0x28] sm:$0xff]  ;;  %v65_v22 = vld [vmem:[#allocation3 + $0x40] sm:$0xff]  ;;  %v78_v25 = vld [vmem:[%s10555_s0 + $0x18] sm:$0xff] }
  0x2c   :  { %8197 = vmatpush1.bf16.msra.mxu0 %v9321_v9  ;;  %240 = vmatprep.mubr.f32.mxu1 %v9237_v0  ;;  %v9354_v24 = vpack.c.bf16 %v65_v22, %v62_v21  ;;  %v68_v26 = vld [vmem:[#allocation3 + $0x58] sm:$0xff]  ;;  %v71_v27 = vld [vmem:[#allocation3 + $0x70] sm:$0xff]  ;;  %v79_v28 = vld [vmem:[%s10555_s0 + $0x20] sm:$0xff] }
  0x2d   :  { %8199 = vmatprep.subr.bf16.mxu0 %v9328_v13  ;;  %7246 = vmatmul.mubr.msk.f32.gmra.mrb[2].mxu0 %vm99_vm1, %v76_v12  ;;  %v9369_v29 = vpack.c.bf16 %v71_v27, %v68_v26  ;;  %v80_v30 = vld [vmem:[%s10555_s0 + $0x28] sm:$0xff] }
  0x2e   :  { %210 = vmatprep.mubr.f32.mxu0 %v9237_v0  ;;  %7252 = vmatmul.mubr.msk.f32.gmra.mrb[2].mxu1 %vm99_vm1, %v82_v19  ;;  %v73_v36 = vld [vmem:[#allocation3 + $0x78] ss:$8 sm:$0x7]  ;;  %v9438_v8 = vld [vmem:[#allocation3 + $0x89] ss:$0 sm:$0xff] }
  0x2f   :  { %8202 = vmatprep.subr.bf16.mxu1 %v9238_v23  ;;  %7701 = vmatprep.mubr.msk.f32.mxu1 %vm99_vm1, %v75_v3  ;;  %v95_v39 = vrot.slane %v73_v36, %v9405_v35  ;;  %v9425_v52 = vrot.slane %v73_v36, %v9416_v46  ;;  %v9430_v56 = vrot.slane %v73_v36, %v9420_v49 }
  0x30   :  { %8201 = vmatpush1.bf16.msra.mxu0 %v9331_v16 }
  0x31   :  { %7247 = vmatmul.mubr.msk.f32.gmra.mrb[4].mxu0 %vm99_vm1, %v77_v20  ;;  %8209 = vmatprep.subr.bf16.mxu0 %v9317_v7 }
  0x32   :  { %216 = vmatprep.mubr.f32.mxu0 %v9237_v0  ;;  %7702 = vmatmul.mubr.msk.f32.vlgmr.msra.gmra.mrb[4].mxu1 %vm99_vm1, %v76_v12 }
  0x33   :  { %8204 = vmatpush3.bf16.msra.mxu1 %v9354_v24  ;;  %7704 = vmatprep.mubr.msk.f32.mxu1 %vm99_vm1, %v77_v20 }
  0x34   :  { %8205 = vmatprep.subr.bf16.mxu1 %v9238_v23 }
  0x35   :  { %7248 = vmatmul.mubr.msk.f32.gmra.mrb[6].mxu0 %vm99_vm1, %v78_v25 }
  0x36   :  { %222 = vmatprep.mubr.f32.mxu0 %v9237_v0  ;;  %7705 = vmatmul.mubr.msk.f32.gmra.mrb[6].mxu1 %vm99_vm1, %v78_v25 }
  0x37   :  { %7707 = vmatprep.mubr.msk.f32.mxu1 %vm99_vm1, %v79_v28  ;;  %8207 = vmatpush3.bf16.msra.mxu1 %v9369_v29 }
  0x38   :  { %8216 = vmatprep.subr.bf16.mxu1 %v9238_v23 }
  0x39   :  { %7249 = vmatmul.mubr.msk.f32.gmra.mrb[8].mxu0 %vm99_vm1, %v79_v28 }
  0x3a   :  { %228 = vmatprep.mubr.f32.mxu0 %v9237_v0  ;;  %7708 = vmatmul.mubr.msk.f32.gmra.mrb[8].mxu1 %vm99_vm1, %v80_v30 }
  0x3b   :  { %7710 = vmatprep.mubr.msk.f32.mxu1 %vm99_vm1, %v81_v17 }
  0x3d   :  { %7250 = vmatmul.mubr.msk.f32.gmra.mrb[10].mxu0 %vm99_vm1, %v80_v30 }
  0x3e   :  { %420 = vmatprep.mubr.f32.mxu0 %v9237_v0  ;;  %7711 = vmatmul.mubr.msk.f32.gmra.mrb[10].mxu1 %vm99_vm1, %v82_v19 }
  0x3f   :  { %7721 = vmatprep.mubr.msk.f32.mxu1 %vm9239_vm2, %v9237_v0 }
  0x41   :  { %421 = vmatmul.mubr.f32.vlgmr.msra.gmra.mrb[0].mxu0 %v9237_v0 }
  0x42   :  { %8211 = vmatpush1.bf16.msra.mxu0 %v9321_v9  ;;  %587 = vmatprep.mubr.f32.mxu0 %v9237_v0 }
  0x43   :  { %8213 = vmatprep.subr.bf16.mxu0 %v9328_v13  ;;  %7722 = vmatmul.mubr.f32.vlgmr.msra.gmra.mrb[12].mxu1 %v9237_v0 }
  0x44   :  { %8218 = vmatpush3.bf16.msra.mxu1 %v9354_v24  ;;  %7732 = vmatprep.mubr.msk.f32.mxu1 %vm9239_vm2, %v9237_v0 }
  0x45   :  { %8219 = vmatprep.subr.bf16.mxu1 %v9238_v23 }
  0x46   :  { %8215 = vmatpush1.bf16.msra.mxu0 %v9331_v16 }
  0x47   :  { %8223 = vmatprep.subr.bf16.mxu0 %v9317_v7 }
  0x48   :  { %8221 = vmatpush3.bf16.msra.mxu1 %v9369_v29 }
  0x49   :  { %8230 = vmatprep.subr.bf16.mxu1 %v9238_v23 }
  0xfc   :  { %v9401_v33 = vpop.f32.mrb[0].mxu1 }
  0xfd   :  { %v9403_v34 = vpop.f32.mrb[1].mxu1 }
 0x101   :  { %v9407_v37 = vpop.f32.mrb[2].mxu1 }
 0x102   :  { %v9409_v38 = vpop.f32.mrb[3].mxu1 }
 0x105   :  { %v7703_v40 = vpop.f32.mrb[4].mxu1 }
 0x106   :  { %v9412_v41 = vadd.f32 %v7703_v40, %v95_v39  ;;  %v313_v42 = vpop.f32.mrb[5].mxu1 }
 0x107   :  { %v314_v14 = vadd.f32 %v313_v42, %v95_v39 }
 0x109   :  { %v7706_v43 = vpop.f32.mrb[6].mxu1 }
 0x10a   :  { %v9414_v44 = vadd.f32 %v7706_v43, %v95_v39  ;;  %v323_v45 = vpop.f32.mrb[7].mxu1 }
 0x10b   :  { %v9418_v47 = vadd.f32 %v323_v45, %v95_v39 }
 0x10d   :  { %v7709_v48 = vpop.f32.mrb[8].mxu1 }
 0x10e   :  { %v9422_v50 = vadd.f32 %v7709_v48, %v95_v39  ;;  %v333_v51 = vpop.f32.mrb[9].mxu1 }
 0x10f   :  { %v9427_v53 = vadd.f32 %v333_v51, %v95_v39 }
 0x111   :  { %v7712_v54 = vpop.f32.mrb[10].mxu1 }
 0x112   :  { %v9432_v57 = vadd.f32 %v7712_v54, %v95_v39  ;;  %v343_v58 = vpop.f32.mrb[11].mxu1 }
 0x113   :  { %v9435_v61 = vadd.f32 %v343_v58, %v95_v39 }
 0x114   :  { %v422_v55 = vpop.f32.mrb[0].mxu0 }
 0x115   :  { %v8722_v59 = vadd.f32 %v422_v55, %v9425_v52  ;;  %v424_v60 = vpop.f32.mrb[1].mxu0 }
 0x116   :  { %v493_v63 = vpop.f32.mrb[12].mxu1  ;;  %v8723_v1 = vadd.f32 %v424_v60, %v9430_v56 }
 0x117   :  { %v7262_v62 = vmul.f32 -1.442695, %v8722_v59  ;;  %v7723_v2 = vpop.f32.mrb[13].mxu1  ;;  %v511_v11 = vadd.f32 %v493_v63, %v9438_v8 }
 0x118   :  { %v7263_v3 = vmul.f32 -1.442695, %v8723_v1 }
 0x119   :  { %8857 = vpow2.f32 %v7262_v62 }
 0x11a   :  { %8859 = vpow2.f32 %v7263_v3 }
 0x123   :  { %v8858_v4 = vpop.eup %8857 }
 0x124   :  { %v505_v5 = vadd.f32 1.0, %v8858_v4  ;;  %v8860_v6 = vpop.eup %8859 }
 0x125   :  { %v506_v10 = vadd.f32 1.0, %v8860_v6 }
 0x126   :  { %8861 = vrcp.f32 %v505_v5 }
 0x127   :  { %8863 = vrcp.f32 %v506_v10 }
 0x130   :  { %v8862_v12 = vpop.eup %8861 }
 0x131   :  { %v512_v15 = vmul.f32 %v8862_v12, %v511_v11  ;;  %v8864_v18 = vpop.eup %8863 }
 0x132   :  { %v515_v19 = vsub.f32 1.0, %v8864_v18  ;;  %v517_v22 = vmul.f32 0.0, %v8864_v18 }
 0x133   :  { %v513_v17 = vadd.f32 %v512_v15, %v314_v14 }
 0x135   :  { %8865 = vtanh.f32 %v513_v17 }
 0x13f   :  { %v8866_v20 = vpop.eup %8865 }
 0x140   :  { %v516_v21 = vmul.f32 %v8866_v20, %v515_v19 }
 0x142   :  { %v518_v25 = vadd.f32 %v517_v22, %v516_v21 }
 0x144   :  { %519 = vst.msk [vmem:[#allocation2] sm:$0xff] %vm352_vm3, %v518_v25  ;;  %7264 = vmatmul.mubr.msk.f32.vlgmr.msra.gmra.mrb[2].mxu0 %vm352_vm3, %v518_v25  ;;  %7733 = vmatmul.mubr.msk.f32.vlgmr.msra.gmra.mrb[14].mxu1 %vm352_vm3, %v518_v25 }
 0x145   :  { %8225 = vmatpush1.bf16.msra.mxu0 %v9321_v9  ;;  %8232 = vmatpush3.bf16.msra.mxu1 %v9354_v24 }
 0x146   :  { %8227 = vmatprep.subr.bf16.mxu0 %v9328_v13  ;;  %8233 = vmatprep.subr.bf16.mxu1 %v9238_v23 }
 0x147   :  { %754 = vmatprep.mubr.f32.mxu0 %v9237_v0  ;;  %7743 = vmatprep.mubr.msk.f32.mxu1 %vm9239_vm2, %v9237_v0 }
 0x149   :  { %8229 = vmatpush1.bf16.msra.mxu0 %v9331_v16  ;;  %8235 = vmatpush3.bf16.msra.mxu1 %v9369_v29 }
 0x14a   :  { %8237 = vmatprep.subr.bf16.mxu0 %v9317_v7  ;;  %8244 = vmatprep.subr.bf16.mxu1 %v9238_v23 }
 0x217   :  { %v589_v26 = vpop.f32.mrb[2].mxu0  ;;  %v660_v27 = vpop.f32.mrb[14].mxu1 }
 0x218   :  { %v8724_v28 = vadd.f32 %v589_v26, %v9425_v52  ;;  %v591_v30 = vpop.f32.mrb[3].mxu0  ;;  %v7734_v31 = vpop.f32.mrb[15].mxu1  ;;  %v678_v48 = vadd.f32 %v660_v27, %v9438_v8 }
 0x219   :  { %v8725_v36 = vadd.f32 %v591_v30, %v9430_v56 }
 0x21a   :  { %v7266_v32 = vmul.f32 -1.442695, %v8724_v28 }
 0x21b   :  { %v7267_v39 = vmul.f32 -1.442695, %v8725_v36 }
 0x21c   :  { %8867 = vpow2.f32 %v7266_v32 }
 0x21d   :  { %8869 = vpow2.f32 %v7267_v39 }
 0x226   :  { %v8868_v40 = vpop.eup %8867 }
 0x227   :  { %v672_v42 = vadd.f32 1.0, %v8868_v40  ;;  %v8870_v43 = vpop.eup %8869 }
 0x228   :  { %v673_v45 = vadd.f32 1.0, %v8870_v43 }
 0x229   :  { %8871 = vrcp.f32 %v672_v42 }
 0x22a   :  { %8873 = vrcp.f32 %v673_v45 }
 0x233   :  { %v8872_v51 = vpop.eup %8871 }
 0x234   :  { %v679_v54 = vmul.f32 %v8872_v51, %v678_v48  ;;  %v8874_v58 = vpop.eup %8873 }
 0x235   :  { %v682_v59 = vsub.f32 1.0, %v8874_v58  ;;  %v684_v63 = vmul.f32 %v8874_v58, %v518_v25 }
 0x236   :  { %v680_v55 = vadd.f32 %v679_v54, %v9412_v41 }
 0x238   :  { %8875 = vtanh.f32 %v680_v55 }
 0x242   :  { %v8876_v60 = vpop.eup %8875 }
 0x243   :  { %v683_v62 = vmul.f32 %v8876_v60, %v682_v59 }
 0x245   :  { %v685_v1 = vadd.f32 %v684_v63, %v683_v62 }
 0x247   :  { %686 = vst.msk [vmem:[#allocation2 + $0x8] sm:$0xff] %vm352_vm3, %v685_v1  ;;  %7268 = vmatmul.mubr.msk.f32.vlgmr.msra.gmra.mrb[4].mxu0 %vm352_vm3, %v685_v1  ;;  %7744 = vmatmul.mubr.msk.f32.vlgmr.msra.gmra.mrb[16].mxu1 %vm352_vm3, %v685_v1 }
 0x248   :  { %8239 = vmatpush1.bf16.msra.mxu0 %v9321_v9  ;;  %8246 = vmatpush3.bf16.msra.mxu1 %v9354_v24 }
 0x249   :  { %8241 = vmatprep.subr.bf16.mxu0 %v9328_v13  ;;  %8247 = vmatprep.subr.bf16.mxu1 %v9238_v23 }
 0x24a   :  { %921 = vmatprep.mubr.f32.mxu0 %v9237_v0  ;;  %7754 = vmatprep.mubr.msk.f32.mxu1 %vm9239_vm2, %v9237_v0 }
 0x24c   :  { %8243 = vmatpush1.bf16.msra.mxu0 %v9331_v16  ;;  %8249 = vmatpush3.bf16.msra.mxu1 %v9369_v29 }
 0x24d   :  { %8251 = vmatprep.subr.bf16.mxu0 %v9317_v7  ;;  %8258 = vmatprep.subr.bf16.mxu1 %v9238_v23 }
 0x31a   :  { %v756_v41 = vpop.f32.mrb[4].mxu0  ;;  %v827_v2 = vpop.f32.mrb[16].mxu1 }
 0x31b   :  { %v8726_v3 = vadd.f32 %v756_v41, %v9425_v52  ;;  %v758_v4 = vpop.f32.mrb[5].mxu0  ;;  %v7745_v5 = vpop.f32.mrb[17].mxu1  ;;  %v845_v18 = vadd.f32 %v827_v2, %v9438_v8 }
 0x31c   :  { %v8727_v10 = vadd.f32 %v758_v4, %v9430_v56 }
 0x31d   :  { %v7270_v6 = vmul.f32 -1.442695, %v8726_v3 }
 0x31e   :  { %v7271_v11 = vmul.f32 -1.442695, %v8727_v10 }
 0x31f   :  { %8877 = vpow2.f32 %v7270_v6 }
 0x320   :  { %8879 = vpow2.f32 %v7271_v11 }
 0x329   :  { %v8878_v12 = vpop.eup %8877 }
 0x32a   :  { %v839_v14 = vadd.f32 1.0, %v8878_v12  ;;  %v8880_v15 = vpop.eup %8879 }
 0x32b   :  { %v840_v17 = vadd.f32 1.0, %v8880_v15 }
 0x32c   :  { %8881 = vrcp.f32 %v839_v14 }
 0x32d   :  { %8883 = vrcp.f32 %v840_v17 }
 0x336   :  { %v8882_v19 = vpop.eup %8881 }
 0x337   :  { %v846_v20 = vmul.f32 %v8882_v19, %v845_v18  ;;  %v8884_v22 = vpop.eup %8883 }
 0x338   :  { %v849_v25 = vsub.f32 1.0, %v8884_v22  ;;  %v851_v28 = vmul.f32 %v8884_v22, %v685_v1 }
 0x339   :  { %v847_v21 = vadd.f32 %v846_v20, %v9418_v47 }
 0x33b   :  { %8885 = vtanh.f32 %v847_v21 }
 0x345   :  { %v8886_v26 = vpop.eup %8885 }
 0x346   :  { %v850_v27 = vmul.f32 %v8886_v26, %v849_v25 }
 0x348   :  { %v852_v30 = vadd.f32 %v851_v28, %v850_v27 }
 0x34a   :  { %853 = vst.msk [vmem:[#allocation2 + $0x10] sm:$0xff] %vm352_vm3, %v852_v30  ;;  %7272 = vmatmul.mubr.msk.f32.vlgmr.msra.gmra.mrb[6].mxu0 %vm352_vm3, %v852_v30  ;;  %7755 = vmatmul.mubr.msk.f32.vlgmr.msra.gmra.mrb[18].mxu1 %vm352_vm3, %v852_v30 }
 0x34b   :  { %8253 = vmatpush1.bf16.msra.mxu0 %v9321_v9  ;;  %8260 = vmatpush3.bf16.msra.mxu1 %v9354_v24 }
 0x34c   :  { %8255 = vmatprep.subr.bf16.mxu0 %v9328_v13  ;;  %8261 = vmatprep.subr.bf16.mxu1 %v9238_v23 }
 0x34d   :  { %1088 = vmatprep.mubr.f32.mxu0 %v9237_v0  ;;  %7765 = vmatprep.mubr.msk.f32.mxu1 %vm9239_vm2, %v9237_v0 }
 0x34f   :  { %8257 = vmatpush1.bf16.msra.mxu0 %v9331_v16  ;;  %8263 = vmatpush3.bf16.msra.mxu1 %v9369_v29 }
 0x350   :  { %8265 = vmatprep.subr.bf16.mxu0 %v9317_v7  ;;  %8272 = vmatprep.subr.bf16.mxu1 %v9238_v23 }
 0x41d   :  { %v923_v47 = vpop.f32.mrb[6].mxu0  ;;  %v994_v31 = vpop.f32.mrb[18].mxu1 }
 0x41e   :  { %v8728_v32 = vadd.f32 %v923_v47, %v9425_v52  ;;  %v925_v36 = vpop.f32.mrb[7].mxu0  ;;  %v7756_v39 = vpop.f32.mrb[19].mxu1  ;;  %v1012_v55 = vadd.f32 %v994_v31, %v9438_v8 }
 0x41f   :  { %v8729_v42 = vadd.f32 %v925_v36, %v9430_v56 }
 0x420   :  { %v7274_v40 = vmul.f32 -1.442695, %v8728_v32 }
 0x421   :  { %v7275_v43 = vmul.f32 -1.442695, %v8729_v42 }
 0x422   :  { %8887 = vpow2.f32 %v7274_v40 }
 0x423   :  { %8889 = vpow2.f32 %v7275_v43 }
 0x42c   :  { %v8888_v45 = vpop.eup %8887 }
 0x42d   :  { %v1006_v48 = vadd.f32 1.0, %v8888_v45  ;;  %v8890_v51 = vpop.eup %8889 }
 0x42e   :  { %v1007_v54 = vadd.f32 1.0, %v8890_v51 }
 0x42f   :  { %8891 = vrcp.f32 %v1006_v48 }
 0x430   :  { %8893 = vrcp.f32 %v1007_v54 }
 0x439   :  { %v8892_v58 = vpop.eup %8891 }
 0x43a   :  { %v1013_v59 = vmul.f32 %v8892_v58, %v1012_v55  ;;  %v8894_v62 = vpop.eup %8893 }
 0x43b   :  { %v1016_v63 = vsub.f32 1.0, %v8894_v62  ;;  %v1018_v2 = vmul.f32 %v8894_v62, %v852_v30 }
 0x43c   :  { %v1014_v60 = vadd.f32 %v1013_v59, %v9414_v44 }
 0x43e   :  { %8895 = vtanh.f32 %v1014_v60 }
 0x448   :  { %v8896_v1 = vpop.eup %8895 }
 0x449   :  { %v1017_v41 = vmul.f32 %v8896_v1, %v1016_v63 }
 0x44b   :  { %v1019_v3 = vadd.f32 %v1018_v2, %v1017_v41 }
 0x44d   :  { %1020 = vst.msk [vmem:[#allocation2 + $0x18] sm:$0xff] %vm352_vm3, %v1019_v3  ;;  %7276 = vmatmul.mubr.msk.f32.vlgmr.msra.gmra.mrb[8].mxu0 %vm352_vm3, %v1019_v3  ;;  %7766 = vmatmul.mubr.msk.f32.vlgmr.msra.gmra.mrb[20].mxu1 %vm352_vm3, %v1019_v3 }
 0x44e   :  { %8267 = vmatpush1.bf16.msra.mxu0 %v9321_v9  ;;  %8274 = vmatpush3.bf16.msra.mxu1 %v9354_v24 }
 0x44f   :  { %8269 = vmatprep.subr.bf16.mxu0 %v9328_v13  ;;  %8275 = vmatprep.subr.bf16.mxu1 %v9238_v23 }
 0x450   :  { %1255 = vmatprep.mubr.f32.mxu0 %v9237_v0  ;;  %7776 = vmatprep.mubr.msk.f32.mxu1 %vm9239_vm2, %v9237_v0 }
 0x452   :  { %8271 = vmatpush1.bf16.msra.mxu0 %v9331_v16  ;;  %8277 = vmatpush3.bf16.msra.mxu1 %v9369_v29 }
 0x453   :  { %8279 = vmatprep.subr.bf16.mxu0 %v9317_v7  ;;  %8286 = vmatprep.subr.bf16.mxu1 %v9238_v23 }
 0x520   :  { %v1090_v44 = vpop.f32.mrb[8].mxu0  ;;  %v1161_v4 = vpop.f32.mrb[20].mxu1 }
 0x521   :  { %v8730_v5 = vadd.f32 %v1090_v44, %v9425_v52  ;;  %v1092_v6 = vpop.f32.mrb[9].mxu0  ;;  %v7767_v10 = vpop.f32.mrb[21].mxu1  ;;  %v1179_v20 = vadd.f32 %v1161_v4, %v9438_v8  ;;  %v1694_v44 = vld [vmem:[%s10559_s4 + $0x28] sm:$0xff]  ;;  %v239_v4 = vadd.f32 %v9403_v34, %v9430_v56 }
 0x522   :  { %v8731_v12 = vadd.f32 %v1092_v6, %v9430_v56 }
 0x523   :  { %v7278_v11 = vmul.f32 -1.442695, %v8730_v5 }
 0x524   :  { %v7279_v14 = vmul.f32 -1.442695, %v8731_v12 }
 0x525   :  { %8897 = vpow2.f32 %v7278_v11 }
 0x526   :  { %8899 = vpow2.f32 %v7279_v14 }
 0x52f   :  { %v8898_v15 = vpop.eup %8897 }
 0x530   :  { %v1173_v17 = vadd.f32 1.0, %v8898_v15  ;;  %v8900_v18 = vpop.eup %8899 }
 0x531   :  { %v1174_v19 = vadd.f32 1.0, %v8900_v18 }
 0x532   :  { %8901 = vrcp.f32 %v1173_v17 }
 0x533   :  { %8903 = vrcp.f32 %v1174_v19 }
 0x53c   :  { %v8902_v21 = vpop.eup %8901 }
 0x53d   :  { %v1180_v22 = vmul.f32 %v8902_v21, %v1179_v20  ;;  %v8904_v26 = vpop.eup %8903 }
 0x53e   :  { %v1183_v27 = vsub.f32 1.0, %v8904_v26  ;;  %v1185_v47 = vmul.f32 %v8904_v26, %v1019_v3 }
 0x53f   :  { %v1181_v25 = vadd.f32 %v1180_v22, %v9427_v53 }
 0x541   :  { %8905 = vtanh.f32 %v1181_v25 }
 0x54b   :  { %v8906_v28 = vpop.eup %8905 }
 0x54c   :  { %v1184_v30 = vmul.f32 %v8906_v28, %v1183_v27  ;;  %v1689_v28 = vld [vmem:[%s10559_s4] sm:$0xff] }
 0x54e   :  { %v1186_v31 = vadd.f32 %v1185_v47, %v1184_v30  ;;  %v1692_v30 = vld [vmem:[%s10559_s4 + $0x18] sm:$0xff] }
 0x550   :  { %1187 = vst.msk [vmem:[#allocation2 + $0x20] sm:$0xff] %vm352_vm3, %v1186_v31  ;;  %7280 = vmatmul.mubr.msk.f32.vlgmr.msra.gmra.mrb[10].mxu0 %vm352_vm3, %v1186_v31  ;;  %7777 = vmatmul.mubr.msk.f32.vlgmr.msra.gmra.mrb[22].mxu1 %vm352_vm3, %v1186_v31 }
 0x551   :  { %8281 = vmatpush1.bf16.msra.mxu0 %v9321_v9  ;;  %8288 = vmatpush3.bf16.msra.mxu1 %v9354_v24 }
 0x552   :  { %8283 = vmatprep.subr.bf16.mxu0 %v9328_v13  ;;  %8289 = vmatprep.subr.bf16.mxu1 %v9238_v23 }
 0x553   :  { %1422 = vmatprep.mubr.f32.mxu0 %v9237_v0  ;;  %7787 = vmatprep.mubr.msk.f32.mxu1 %vm9239_vm2, %v9237_v0 }
 0x555   :  { %8285 = vmatpush1.bf16.msra.mxu0 %v9331_v16  ;;  %8291 = vmatpush3.bf16.msra.mxu1 %v9369_v29 }
 0x556   :  { %8293 = vmatprep.subr.bf16.mxu0 %v9317_v7  ;;  %8300 = vmatprep.subr.bf16.mxu1 %v9238_v23 }
 0x623   :  { %v1257_v53 = vpop.f32.mrb[10].mxu0  ;;  %v1328_v32 = vpop.f32.mrb[22].mxu1 }
 0x624   :  { %v8732_v36 = vadd.f32 %v1257_v53, %v9425_v52  ;;  %v1259_v39 = vpop.f32.mrb[11].mxu0  ;;  %v7778_v40 = vpop.f32.mrb[23].mxu1  ;;  %v1346_v7 = vadd.f32 %v1328_v32, %v9438_v8 }
 0x625   :  { %v8733_v43 = vadd.f32 %v1259_v39, %v9430_v56  ;;  %v1700_v39 = vld [vmem:[%s10559_s4 + $0x58] sm:$0xff]  ;;  %v8308_v40 = vpack.c.bf16 %v1692_v30, %v1689_v28 }
 0x626   :  { %v7282_v42 = vmul.f32 -1.442695, %v8732_v36  ;;  %v1697_v36 = vld [vmem:[%s10559_s4 + $0x40] sm:$0xff] }
 0x627   :  { %v7283_v45 = vmul.f32 -1.442695, %v8733_v43 }
 0x628   :  { %8907 = vpow2.f32 %v7282_v42 }
 0x629   :  { %8909 = vpow2.f32 %v7283_v45  ;;  %v1695_v45 = vld [vmem:[%s10559_s4 + $0x30] sm:$0xff] }
 0x632   :  { %v8908_v48 = vpop.eup %8907 }
 0x633   :  { %v1340_v51 = vadd.f32 1.0, %v8908_v48  ;;  %v8910_v54 = vpop.eup %8909  ;;  %v1698_v48 = vld [vmem:[%s10559_s4 + $0x48] sm:$0xff] }
 0x634   :  { %v1341_v55 = vadd.f32 1.0, %v8910_v54  ;;  %v1716_v54 = vld [vmem:[#allocation2] sm:$0xff] }
 0x635   :  { %8911 = vrcp.f32 %v1340_v51  ;;  %v8318_v51 = vpack.c.bf16 %v1700_v39, %v1697_v36 }
 0x636   :  { %8913 = vrcp.f32 %v1341_v55  ;;  %v8312_v55 = vpack.c.bf16 %v1698_v48, %v1695_v45 }
 0x63f   :  { %v8912_v58 = vpop.eup %8911 }
 0x640   :  { %v1347_v59 = vmul.f32 %v8912_v58, %v1346_v7  ;;  %v8914_v62 = vpop.eup %8913  ;;  %v1717_v7 = vld [vmem:[#allocation2 + $0x8] sm:$0xff]  ;;  %v1718_v58 = vld [vmem:[#allocation2 + $0x10] sm:$0xff] }
 0x641   :  { %v1350_v63 = vsub.f32 1.0, %v8914_v62  ;;  %v1352_v2 = vmul.f32 %v8914_v62, %v1186_v31  ;;  %v1696_v31 = vld [vmem:[%s10559_s4 + $0x38] sm:$0xff] }
 0x642   :  { %v1348_v60 = vadd.f32 %v1347_v59, %v9422_v50  ;;  %v1690_v50 = vld [vmem:[%s10559_s4 + $0x8] sm:$0xff]  ;;  %v1719_v59 = vld [vmem:[#allocation2 + $0x18] sm:$0xff] }
 0x644   :  { %8915 = vtanh.f32 %v1348_v60  ;;  %v1720_v60 = vld [vmem:[#allocation2 + $0x20] sm:$0xff] }
 0x64e   :  { %v8916_v1 = vpop.eup %8915 }
 0x64f   :  { %v1351_v41 = vmul.f32 %v8916_v1, %v1350_v63  ;;  %v1702_v1 = vld [vmem:[%s10559_s4 + $0x68] sm:$0xff] }
 0x651   :  { %v1353_v3 = vadd.f32 %v1352_v2, %v1351_v41  ;;  %v1705_v41 = vld [vmem:[%s10559_s4 + $0x80] sm:$0xff] }
 0x652   :  { %v1701_v2 = vld [vmem:[%s10559_s4 + $0x60] sm:$0xff] }
 0x653   :  { %1354 = vst.msk [vmem:[#allocation2 + $0x28] sm:$0xff] %vm352_vm3, %v1353_v3  ;;  %7284 = vmatmul.mubr.msk.f32.vlgmr.msra.gmra.mrb[12].mxu0 %vm352_vm3, %v1353_v3  ;;  %7788 = vmatmul.mubr.msk.f32.vlgmr.msra.gmra.mrb[24].mxu1 %vm352_vm3, %v1353_v3 }
 0x654   :  { %8295 = vmatpush1.bf16.msra.mxu0 %v9321_v9  ;;  %8302 = vmatpush3.bf16.msra.mxu1 %v9354_v24  ;;  %v1693_v9 = vld [vmem:[%s10559_s4 + $0x20] sm:$0xff] }
 0x655   :  { %8297 = vmatprep.subr.bf16.mxu0 %v9328_v13  ;;  %8303 = vmatprep.subr.bf16.mxu1 %v9238_v23  ;;  %v1691_v13 = vld [vmem:[%s10559_s4 + $0x10] sm:$0xff]  ;;  %v8306_v24 = vpack.c.bf16 %v1693_v9, %v1690_v50  ;;  %v1704_v50 = vld [vmem:[%s10559_s4 + $0x78] sm:$0xff] }
 0x656   :  { %1589 = vmatprep.mubr.f32.mxu0 %v9237_v0  ;;  %7798 = vmatprep.mubr.msk.f32.mxu1 %vm9239_vm2, %v9237_v0  ;;  %v1708_v9 = vld [vmem:[%s10559_s4 + $0x98] sm:$0xff] }
 0x658   :  { %8299 = vmatpush1.bf16.msra.mxu0 %v9331_v16  ;;  %8305 = vmatpush3.bf16.msra.mxu1 %v9369_v29  ;;  %v8314_v16 = vpack.c.bf16 %v1694_v44, %v1691_v13  ;;  %v237_v29 = vadd.f32 %v9401_v33, %v9425_v52  ;;  %v1711_v13 = vld [vmem:[%s10559_s4 + $0xb0] sm:$0xff] }
 0x659   :  { %8307 = vmatprep.subr.bf16.mxu1 %v8306_v24  ;;  %v9636_v24 = vpack.c.bf16 %v1704_v50, %v1701_v2  ;;  %v9638_v44 = vpack.c.bf16 %v1711_v13, %v1708_v9 }
 0x65a   :  { %8315 = vmatprep.subr.bf16.mxu0 %v8314_v16  ;;  %v1721_v62 = vld [vmem:[#allocation2 + $0x28] sm:$0xff] }
 0x726   :  { %v1424_v5 = vpop.f32.mrb[12].mxu0  ;;  %v1495_v6 = vpop.f32.mrb[24].mxu1 }
 0x727   :  { %v1499_v10 = vadd.f32 %v1424_v5, %v237_v29  ;;  %v1426_v11 = vpop.f32.mrb[13].mxu0  ;;  %v7789_v12 = vpop.f32.mrb[25].mxu1  ;;  %v1513_v33 = vadd.f32 %v1495_v6, %v9438_v8  ;;  %v1710_v29 = vld [vmem:[%s10559_s4 + $0xa8] sm:$0xff]  ;;  %v1703_v5 = vld [vmem:[%s10559_s4 + $0x70] sm:$0xff] }
 0x728   :  { %v1500_v14 = vadd.f32 %v1426_v11, %v239_v4  ;;  %v1706_v6 = vld [vmem:[%s10559_s4 + $0x88] sm:$0xff]  ;;  %v1712_v12 = vld [vmem:[%s10559_s4 + $0xb8] sm:$0xff] }
 0x729   :  { %v7286_v15 = vmul.f32 -1.442695, %v1499_v10  ;;  %v1709_v10 = vld [vmem:[%s10559_s4 + $0xa0] sm:$0xff]  ;;  %v9662_v11 = vpack.c.bf16 %v1706_v6, %v1703_v5 }
 0x72a   :  { %v7287_v17 = vmul.f32 -1.442695, %v1500_v14  ;;  %v9668_v14 = vpack.c.bf16 %v1712_v12, %v1709_v10 }
 0x72b   :  { %8917 = vpow2.f32 %v7286_v15  ;;  %v243_v15 = vadd.f32 %v9407_v37, %v9425_v52 }
 0x72c   :  { %8919 = vpow2.f32 %v7287_v17  ;;  %v245_v17 = vadd.f32 %v9409_v38, %v9430_v56 }
 0x735   :  { %v8918_v18 = vpop.eup %8917 }
 0x736   :  { %v1507_v19 = vadd.f32 1.0, %v8918_v18  ;;  %v8920_v20 = vpop.eup %8919 }
 0x737   :  { %v1508_v21 = vadd.f32 1.0, %v8920_v20 }
 0x738   :  { %8921 = vrcp.f32 %v1507_v19 }
 0x739   :  { %8923 = vrcp.f32 %v1508_v21 }
 0x742   :  { %v8922_v22 = vpop.eup %8921 }
 0x743   :  { %v1514_v25 = vmul.f32 %v8922_v22, %v1513_v33  ;;  %v8924_v26 = vpop.eup %8923 }
 0x744   :  { %v1517_v27 = vsub.f32 1.0, %v8924_v26  ;;  %v1519_v32 = vmul.f32 %v8924_v26, %v1353_v3  ;;  %v9625_v3 = vpack.c.bf16 %v1705_v41, %v1702_v1 }
 0x745   :  { %v1515_v34 = vadd.f32 %v1514_v25, %v9435_v61  ;;  %v1699_v61 = vld [vmem:[%s10559_s4 + $0x50] sm:$0xff] }
 0x746   :  { %v8310_v43 = vpack.c.bf16 %v1699_v61, %v1696_v31 }
 0x747   :  { %8925 = vtanh.f32 %v1515_v34 }
 0x751   :  { %v8926_v47 = vpop.eup %8925 }
 0x752   :  { %v1518_v53 = vmul.f32 %v8926_v47, %v1517_v27 }
 0x754   :  { %v9579_v42 = vadd.f32 %v1519_v32, %v1518_v53 }
 0x756   :  { %1521 = vst.msk [vmem:[#allocation2 + $0x30] sm:$0xff] %vm352_vm3, %v9579_v42  ;;  %7288 = vmatmul.mubr.msk.f32.vlgmr.msra.gmra.mrb[14].mxu0 %vm352_vm3, %v9579_v42  ;;  %7799 = vmatmul.mubr.msk.f32.vlgmr.msra.gmra.mrb[26].mxu1 %vm352_vm3, %v9579_v42 }
 0x757   :  { %8309 = vmatpush1.bf16.msra.mxu1 %v8308_v40  ;;  %8317 = vmatpush3.bf16.msra.mxu0 %v8314_v16  ;;  %v1707_v16 = vld [vmem:[%s10559_s4 + $0x90] sm:$0xff] }
 0x758   :  { %7809 = vmatprep.mubr.msk.f32.mxu0 %vm352_vm3, %v1716_v54  ;;  %8311 = vmatprep.subr.bf16.mxu1 %v8310_v43  ;;  %v9648_v4 = vpack.c.bf16 %v1710_v29, %v1707_v16  ;;  %v9729_v16 = vld [vmem:[%s10559_s4 + $0xd1] ss:$0 sm:$0xff] }
 0x759   :  { %8319 = vmatprep.subr.bf16.mxu0 %v8318_v51  ;;  %1828 = vmatprep.mubr.f32.mxu1 %v9237_v0 }
 0x75b   :  { %8313 = vmatpush1.bf16.msra.mxu1 %v8312_v55  ;;  %8321 = vmatpush3.bf16.msra.mxu0 %v8318_v51 }
 0x75c   :  { %8330 = vmatprep.subr.bf16.mxu0 %v9238_v23  ;;  %8323 = vmatprep.subr.bf16.mxu1 %v9625_v3 }
 0x75d   :  { %v1722_v63 = vld [vmem:[#allocation2 + $0x30] sm:$0xff] }
 0x75e   :  { %7293 = vmatmul.mubr.msk.f32.vlgmr.msra.gmra.mrb[28].mxu1 %vm352_vm3, %v1716_v54  ;;  %7810 = vmatmul.mubr.msk.f32.vlgmr.msra.gmra.mrb[16].mxu0 %vm352_vm3, %v1717_v7 }
 0x75f   :  { %7812 = vmatprep.mubr.msk.f32.mxu0 %vm352_vm3, %v1718_v58  ;;  %1834 = vmatprep.mubr.f32.mxu1 %v9237_v0 }
 0x760   :  { %8325 = vmatpush1.bf16.msra.mxu1 %v9636_v24  ;;  %8332 = vmatpush3.bf16.msra.mxu0 %v9662_v11 }
 0x761   :  { %8327 = vmatprep.subr.bf16.mxu1 %v9638_v44  ;;  %8333 = vmatprep.subr.bf16.mxu0 %v9238_v23 }
 0x762   :  { %7294 = vmatmul.mubr.msk.f32.gmra.mrb[30].mxu1 %vm352_vm3, %v1717_v7  ;;  %7813 = vmatmul.mubr.msk.f32.gmra.mrb[18].mxu0 %vm352_vm3, %v1719_v59 }
 0x763   :  { %7815 = vmatprep.mubr.msk.f32.mxu0 %vm352_vm3, %v1720_v60  ;;  %1840 = vmatprep.mubr.f32.mxu1 %v9237_v0 }
 0x764   :  { %8329 = vmatpush1.bf16.msra.mxu1 %v9648_v4  ;;  %8335 = vmatpush3.bf16.msra.mxu0 %v9668_v14 }
 0x765   :  { %8337 = vmatprep.subr.bf16.mxu1 %v9625_v3  ;;  %8344 = vmatprep.subr.bf16.mxu0 %v9238_v23 }
 0x766   :  { %7295 = vmatmul.mubr.msk.f32.gmra.mrb[32].mxu1 %vm352_vm3, %v1718_v58  ;;  %7816 = vmatmul.mubr.msk.f32.gmra.mrb[20].mxu0 %vm352_vm3, %v1721_v62 }
 0x767   :  { %7818 = vmatprep.mubr.msk.f32.mxu0 %vm352_vm3, %v1722_v63  ;;  %1846 = vmatprep.mubr.f32.mxu1 %v9237_v0 }
 0x76a   :  { %7296 = vmatmul.mubr.msk.f32.gmra.mrb[34].mxu1 %vm352_vm3, %v1719_v59 }
 0x76b   :  { %1852 = vmatprep.mubr.f32.mxu1 %v9237_v0 }
 0x76e   :  { %7297 = vmatmul.mubr.msk.f32.gmra.mrb[36].mxu1 %vm352_vm3, %v1720_v60 }
 0x76f   :  { %1858 = vmatprep.mubr.f32.mxu1 %v9237_v0 }
 0x772   :  { %7298 = vmatmul.mubr.msk.f32.gmra.mrb[38].mxu1 %vm352_vm3, %v1721_v62 }
 0x773   :  { %1864 = vmatprep.mubr.f32.mxu1 %v9237_v0 }
 0x776   :  { %7299 = vmatmul.mubr.msk.f32.gmra.mrb[40].mxu1 %vm352_vm3, %v1722_v63 }
 0x777   :  { %1870 = vmatprep.mubr.f32.mxu1 %v9237_v0 }
 0x829   :  { %v1591_v18 = vpop.f32.mrb[14].mxu0  ;;  %v1662_v19 = vpop.f32.mrb[26].mxu1 }
 0x82a   :  { %v1666_v20 = vadd.f32 %v1591_v18, %v243_v15  ;;  %v1593_v21 = vpop.f32.mrb[15].mxu0  ;;  %v7800_v33 = vpop.f32.mrb[27].mxu1  ;;  %v1680_v61 = vadd.f32 %v1662_v19, %v9438_v8 }
 0x82b   :  { %v1667_v22 = vadd.f32 %v1593_v21, %v245_v17 }
 0x82c   :  { %v7290_v25 = vmul.f32 -1.442695, %v1666_v20 }
 0x82d   :  { %v7291_v34 = vmul.f32 -1.442695, %v1667_v22 }
 0x82e   :  { %8927 = vpow2.f32 %v7290_v25 }
 0x82f   :  { %8929 = vpow2.f32 %v7291_v34 }
 0x831   :  { %v9677_v26 = vpop.f32.mrb[16].mxu0 }
 0x832   :  { %v9679_v27 = vpop.f32.mrb[17].mxu0 }
 0x835   :  { %v9681_v28 = vpop.f32.mrb[18].mxu0 }
 0x836   :  { %v9683_v37 = vpop.f32.mrb[19].mxu0 }
 0x838   :  { %v8928_v52 = vpop.eup %8927 }
 0x839   :  { %v1674_v38 = vadd.f32 1.0, %v8928_v52  ;;  %v9685_v56 = vpop.f32.mrb[20].mxu0  ;;  %v8930_v47 = vpop.eup %8929 }
 0x83a   :  { %v9687_v30 = vpop.f32.mrb[21].mxu0  ;;  %v1675_v31 = vadd.f32 1.0, %v8930_v47 }
 0x83b   :  { %8931 = vrcp.f32 %v1674_v38 }
 0x83c   :  { %8933 = vrcp.f32 %v1675_v31 }
 0x845   :  { %v8932_v53 = vpop.eup %8931 }
 0x846   :  { %v1681_v32 = vmul.f32 %v8932_v53, %v1680_v61  ;;  %v8934_v39 = vpop.eup %8933 }
 0x847   :  { %v1684_v40 = vsub.f32 1.0, %v8934_v39  ;;  %v1686_v48 = vmul.f32 %v8934_v39, %v9579_v42 }
 0x848   :  { %v1682_v36 = vadd.f32 %v1681_v32, %v9432_v57  ;;  %v7292_v57 = vld [vmem:[%s10559_s4 + $0xc0] ss:$8 sm:$0x7] }
 0x849   :  { %v9719_v55 = vrot.slane %v7292_v57, %v9416_v46  ;;  %v9722_v58 = vrot.slane %v7292_v57, %v9420_v49  ;;  %v9732_v29 = vrot.slane %v7292_v57, %v9405_v35 }
 0x84a   :  { %8935 = vtanh.f32 %v1682_v36 }
 0x84b   :  { %v1944_v12 = vadd.f32 %v9679_v27, %v9732_v29 }
 0x854   :  { %v8936_v43 = vpop.eup %8935 }
 0x855   :  { %v1685_v45 = vmul.f32 %v8936_v43, %v1684_v40 }
 0x857   :  { %v1687_v51 = vadd.f32 %v1686_v48, %v1685_v45  ;;  %v1949_v45 = vadd.f32 %v9677_v26, %v9732_v29 }
 0x859   :  { %1688 = vst.msk [vmem:[#allocation2 + $0x38] sm:$0xff] %vm352_vm3, %v1687_v51 }
 0x860   :  { %v1723_v54 = vld [vmem:[#allocation2 + $0x38] sm:$0xff] }
 0x861   :  { %7300 = vmatmul.mubr.msk.f32.gmra.mrb[42].mxu1 %vm352_vm3, %v1723_v54  ;;  %7819 = vmatmul.mubr.msk.f32.gmra.mrb[22].mxu0 %vm352_vm3, %v1723_v54 }
 0x862   :  { %2046 = vmatprep.mubr.f32.mxu1 %v9237_v0  ;;  %7829 = vmatprep.mubr.msk.f32.mxu0 %vm9239_vm2, %v9237_v0 }
 0x865   :  { %2047 = vmatmul.mubr.f32.vlgmr.msra.gmra.mrb[28].mxu1 %v9237_v0  ;;  %7830 = vmatmul.mubr.f32.vlgmr.msra.gmra.mrb[24].mxu0 %v9237_v0 }
 0x866   :  { %8339 = vmatpush1.bf16.msra.mxu1 %v9636_v24  ;;  %8346 = vmatpush3.bf16.msra.mxu0 %v9662_v11 }
 0x867   :  { %8341 = vmatprep.subr.bf16.mxu1 %v9638_v44  ;;  %8347 = vmatprep.subr.bf16.mxu0 %v9238_v23 }
 0x868   :  { %2212 = vmatprep.mubr.f32.mxu1 %v9237_v0  ;;  %7840 = vmatprep.mubr.msk.f32.mxu0 %vm9239_vm2, %v9237_v0 }
 0x86a   :  { %8343 = vmatpush1.bf16.msra.mxu1 %v9648_v4  ;;  %8349 = vmatpush3.bf16.msra.mxu0 %v9668_v14 }
 0x86b   :  { %8351 = vmatprep.subr.bf16.mxu1 %v9625_v3  ;;  %8358 = vmatprep.subr.bf16.mxu0 %v9238_v23 }
 0x934   :  { %v9714_v8 = vpop.f32.mrb[22].mxu0 }
 0x935   :  { %v9716_v42 = vpop.f32.mrb[23].mxu0 }
 0x938   :  { %v2048_v7 = vpop.f32.mrb[28].mxu1  ;;  %v2119_v59 = vpop.f32.mrb[24].mxu0 }
 0x939   :  { %v8742_v60 = vadd.f32 %v2048_v7, %v9719_v55  ;;  %v2050_v62 = vpop.f32.mrb[29].mxu1  ;;  %v7831_v63 = vpop.f32.mrb[25].mxu0  ;;  %v2137_v6 = vadd.f32 %v2119_v59, %v9729_v16 }
 0x93a   :  { %v8743_v41 = vadd.f32 %v2050_v62, %v9722_v58 }
 0x93b   :  { %v7309_v1 = vmul.f32 -1.442695, %v8742_v60 }
 0x93c   :  { %v7310_v2 = vmul.f32 -1.442695, %v8743_v41 }
 0x93d   :  { %8937 = vpow2.f32 %v7309_v1 }
 0x93e   :  { %8939 = vpow2.f32 %v7310_v2 }
 0x947   :  { %v8938_v50 = vpop.eup %8937 }
 0x948   :  { %v2131_v9 = vadd.f32 1.0, %v8938_v50  ;;  %v8940_v13 = vpop.eup %8939 }
 0x949   :  { %v2132_v5 = vadd.f32 1.0, %v8940_v13 }
 0x94a   :  { %8941 = vrcp.f32 %v2131_v9 }
 0x94b   :  { %8943 = vrcp.f32 %v2132_v5 }
 0x954   :  { %v8942_v10 = vpop.eup %8941 }
 0x955   :  { %v2138_v15 = vmul.f32 %v8942_v10, %v2137_v6  ;;  %v8944_v18 = vpop.eup %8943 }
 0x956   :  { %v2141_v19 = vsub.f32 1.0, %v8944_v18  ;;  %v2143_v33 = vmul.f32 0.0, %v8944_v18  ;;  %v1954_v18 = vadd.f32 %v9683_v37, %v9732_v29 }
 0x957   :  { %v2139_v17 = vadd.f32 %v2138_v15, %v1944_v12 }
 0x959   :  { %8945 = vtanh.f32 %v2139_v17 }
 0x963   :  { %v8946_v20 = vpop.eup %8945 }
 0x964   :  { %v2142_v21 = vmul.f32 %v8946_v20, %v2141_v19 }
 0x966   :  { %v2144_v22 = vadd.f32 %v2143_v33, %v2142_v21 }
 0x968   :  { %7311 = vmatmul.mubr.msk.f32.vlgmr.msra.gmra.mrb[30].mxu1 %vm352_vm3, %v2144_v22  ;;  %7841 = vmatmul.mubr.msk.f32.vlgmr.msra.gmra.mrb[26].mxu0 %vm352_vm3, %v2144_v22 }
 0x969   :  { %8353 = vmatpush1.bf16.msra.mxu1 %v9636_v24  ;;  %8360 = vmatpush3.bf16.msra.mxu0 %v9662_v11 }
 0x96a   :  { %8355 = vmatprep.subr.bf16.mxu1 %v9638_v44  ;;  %8361 = vmatprep.subr.bf16.mxu0 %v9238_v23 }
 0x96b   :  { %2378 = vmatprep.mubr.f32.mxu1 %v9237_v0  ;;  %7851 = vmatprep.mubr.msk.f32.mxu0 %vm9239_vm2, %v9237_v0 }
 0x96d   :  { %8357 = vmatpush1.bf16.msra.mxu1 %v9648_v4  ;;  %8363 = vmatpush3.bf16.msra.mxu0 %v9668_v14 }
 0x96e   :  { %8365 = vmatprep.subr.bf16.mxu1 %v9625_v3  ;;  %8372 = vmatprep.subr.bf16.mxu0 %v9238_v23 }
 0xa3b   :  { %v2214_v25 = vpop.f32.mrb[30].mxu1  ;;  %v2285_v34 = vpop.f32.mrb[26].mxu0 }
 0xa3c   :  { %v8744_v27 = vadd.f32 %v2214_v25, %v9719_v55  ;;  %v2216_v52 = vpop.f32.mrb[31].mxu1  ;;  %v7842_v38 = vpop.f32.mrb[27].mxu0  ;;  %v2303_v40 = vadd.f32 %v2285_v34, %v9729_v16 }
 0xa3d   :  { %v8745_v31 = vadd.f32 %v2216_v52, %v9722_v58 }
 0xa3e   :  { %v7313_v47 = vmul.f32 -1.442695, %v8744_v27 }
 0xa3f   :  { %v7314_v61 = vmul.f32 -1.442695, %v8745_v31 }
 0xa40   :  { %8947 = vpow2.f32 %v7313_v47 }
 0xa41   :  { %8949 = vpow2.f32 %v7314_v61 }
 0xa4a   :  { %v8948_v53 = vpop.eup %8947 }
 0xa4b   :  { %v2297_v32 = vadd.f32 1.0, %v8948_v53  ;;  %v8950_v36 = vpop.eup %8949 }
 0xa4c   :  { %v2298_v39 = vadd.f32 1.0, %v8950_v36 }
 0xa4d   :  { %8951 = vrcp.f32 %v2297_v32 }
 0xa4e   :  { %8953 = vrcp.f32 %v2298_v39 }
 0xa57   :  { %v8952_v43 = vpop.eup %8951 }
 0xa58   :  { %v2304_v48 = vmul.f32 %v8952_v43, %v2303_v40  ;;  %v8954_v54 = vpop.eup %8953 }
 0xa59   :  { %v2307_v57 = vsub.f32 1.0, %v8954_v54  ;;  %v2309_v60 = vmul.f32 %v8954_v54, %v2144_v22 }
 0xa5a   :  { %v2305_v51 = vadd.f32 %v2304_v48, %v1949_v45 }
 0xa5c   :  { %8955 = vtanh.f32 %v2305_v51  ;;  %v1959_v51 = vadd.f32 %v9681_v28, %v9732_v29 }
 0xa66   :  { %v8956_v7 = vpop.eup %8955 }
 0xa67   :  { %v2308_v59 = vmul.f32 %v8956_v7, %v2307_v57 }
 0xa69   :  { %v2310_v62 = vadd.f32 %v2309_v60, %v2308_v59 }
 0xa6b   :  { %7315 = vmatmul.mubr.msk.f32.vlgmr.msra.gmra.mrb[32].mxu1 %vm352_vm3, %v2310_v62  ;;  %7852 = vmatmul.mubr.msk.f32.vlgmr.msra.gmra.mrb[28].mxu0 %vm352_vm3, %v2310_v62 }
 0xa6c   :  { %8367 = vmatpush1.bf16.msra.mxu1 %v9636_v24  ;;  %8374 = vmatpush3.bf16.msra.mxu0 %v9662_v11 }
 0xa6d   :  { %8369 = vmatprep.subr.bf16.mxu1 %v9638_v44  ;;  %8375 = vmatprep.subr.bf16.mxu0 %v9238_v23 }
 0xa6e   :  { %2544 = vmatprep.mubr.f32.mxu1 %v9237_v0  ;;  %7862 = vmatprep.mubr.msk.f32.mxu0 %vm9239_vm2, %v9237_v0 }
 0xa70   :  { %8371 = vmatpush1.bf16.msra.mxu1 %v9648_v4  ;;  %8377 = vmatpush3.bf16.msra.mxu0 %v9668_v14 }
 0xa71   :  { %8379 = vmatprep.subr.bf16.mxu1 %v9625_v3  ;;  %8386 = vmatprep.subr.bf16.mxu0 %v9238_v23 }
 0xb3e   :  { %v2380_v26 = vpop.f32.mrb[32].mxu1  ;;  %v2451_v63 = vpop.f32.mrb[28].mxu0 }
 0xb3f   :  { %v8746_v1 = vadd.f32 %v2380_v26, %v9719_v55  ;;  %v2382_v41 = vpop.f32.mrb[33].mxu1  ;;  %v7853_v2 = vpop.f32.mrb[29].mxu0  ;;  %v2469_v15 = vadd.f32 %v2451_v63, %v9729_v16 }
 0xb40   :  { %v8747_v9 = vadd.f32 %v2382_v41, %v9722_v58 }
 0xb41   :  { %v7317_v50 = vmul.f32 -1.442695, %v8746_v1 }
 0xb42   :  { %v7318_v13 = vmul.f32 -1.442695, %v8747_v9 }
 0xb43   :  { %8957 = vpow2.f32 %v7317_v50 }
 0xb44   :  { %8959 = vpow2.f32 %v7318_v13 }
 0xb4d   :  { %v8958_v5 = vpop.eup %8957 }
 0xb4e   :  { %v2463_v6 = vadd.f32 1.0, %v8958_v5  ;;  %v8960_v10 = vpop.eup %8959 }
 0xb4f   :  { %v2464_v12 = vadd.f32 1.0, %v8960_v10 }
 0xb50   :  { %8961 = vrcp.f32 %v2463_v6 }
 0xb51   :  { %8963 = vrcp.f32 %v2464_v12 }
 0xb5a   :  { %v8962_v17 = vpop.eup %8961 }
 0xb5b   :  { %v2470_v19 = vmul.f32 %v8962_v17, %v2469_v15  ;;  %v8964_v21 = vpop.eup %8963 }
 0xb5c   :  { %v2473_v33 = vsub.f32 1.0, %v8964_v21  ;;  %v2475_v34 = vmul.f32 %v8964_v21, %v2310_v62 }
 0xb5d   :  { %v2471_v20 = vadd.f32 %v2470_v19, %v1954_v18  ;;  %v1964_v19 = vadd.f32 %v9687_v30, %v9732_v29 }
 0xb5f   :  { %8965 = vtanh.f32 %v2471_v20 }
 0xb69   :  { %v8966_v22 = vpop.eup %8965 }
 0xb6a   :  { %v2474_v25 = vmul.f32 %v8966_v22, %v2473_v33 }
 0xb6c   :  { %v2476_v27 = vadd.f32 %v2475_v34, %v2474_v25 }
 0xb6e   :  { %7319 = vmatmul.mubr.msk.f32.vlgmr.msra.gmra.mrb[34].mxu1 %vm352_vm3, %v2476_v27  ;;  %7863 = vmatmul.mubr.msk.f32.vlgmr.msra.gmra.mrb[30].mxu0 %vm352_vm3, %v2476_v27 }
 0xb6f   :  { %8381 = vmatpush1.bf16.msra.mxu1 %v9636_v24  ;;  %8388 = vmatpush3.bf16.msra.mxu0 %v9662_v11 }
 0xb70   :  { %8383 = vmatprep.subr.bf16.mxu1 %v9638_v44  ;;  %8389 = vmatprep.subr.bf16.mxu0 %v9238_v23 }
 0xb71   :  { %2710 = vmatprep.mubr.f32.mxu1 %v9237_v0  ;;  %7873 = vmatprep.mubr.msk.f32.mxu0 %vm9239_vm2, %v9237_v0 }
 0xb73   :  { %8385 = vmatpush1.bf16.msra.mxu1 %v9648_v4  ;;  %8391 = vmatpush3.bf16.msra.mxu0 %v9668_v14 }
 0xb74   :  { %8393 = vmatprep.subr.bf16.mxu1 %v9625_v3  ;;  %8400 = vmatprep.subr.bf16.mxu0 %v9238_v23 }
 0xc41   :  { %v2546_v37 = vpop.f32.mrb[34].mxu1  ;;  %v2617_v52 = vpop.f32.mrb[30].mxu0 }
 0xc42   :  { %v8748_v38 = vadd.f32 %v2546_v37, %v9719_v55  ;;  %v2548_v47 = vpop.f32.mrb[35].mxu1  ;;  %v7864_v31 = vpop.f32.mrb[31].mxu0  ;;  %v2635_v45 = vadd.f32 %v2617_v52, %v9729_v16 }
 0xc43   :  { %v8749_v53 = vadd.f32 %v2548_v47, %v9722_v58 }
 0xc44   :  { %v7321_v61 = vmul.f32 -1.442695, %v8748_v38 }
 0xc45   :  { %v7322_v32 = vmul.f32 -1.442695, %v8749_v53 }
 0xc46   :  { %8967 = vpow2.f32 %v7321_v61 }
 0xc47   :  { %8969 = vpow2.f32 %v7322_v32 }
 0xc50   :  { %v8968_v36 = vpop.eup %8967 }
 0xc51   :  { %v2629_v39 = vadd.f32 1.0, %v8968_v36  ;;  %v8970_v40 = vpop.eup %8969 }
 0xc52   :  { %v2630_v43 = vadd.f32 1.0, %v8970_v40 }
 0xc53   :  { %8971 = vrcp.f32 %v2629_v39 }
 0xc54   :  { %8973 = vrcp.f32 %v2630_v43 }
 0xc5d   :  { %v8972_v48 = vpop.eup %8971 }
 0xc5e   :  { %v2636_v54 = vmul.f32 %v8972_v48, %v2635_v45  ;;  %v8974_v7 = vpop.eup %8973  ;;  %v1969_v48 = vadd.f32 %v9685_v56, %v9732_v29 }
 0xc5f   :  { %v2639_v59 = vsub.f32 1.0, %v8974_v7  ;;  %v2641_v26 = vmul.f32 %v8974_v7, %v2476_v27 }
 0xc60   :  { %v2637_v57 = vadd.f32 %v2636_v54, %v1959_v51 }
 0xc62   :  { %8975 = vtanh.f32 %v2637_v57 }
 0xc6c   :  { %v8976_v60 = vpop.eup %8975 }
 0xc6d   :  { %v2640_v62 = vmul.f32 %v8976_v60, %v2639_v59 }
 0xc6f   :  { %v2642_v63 = vadd.f32 %v2641_v26, %v2640_v62 }
 0xc71   :  { %7323 = vmatmul.mubr.msk.f32.vlgmr.msra.gmra.mrb[36].mxu1 %vm352_vm3, %v2642_v63  ;;  %7874 = vmatmul.mubr.msk.f32.vlgmr.msra.gmra.mrb[32].mxu0 %vm352_vm3, %v2642_v63 }
 0xc72   :  { %8395 = vmatpush1.bf16.msra.mxu1 %v9636_v24  ;;  %8402 = vmatpush3.bf16.msra.mxu0 %v9662_v11 }
 0xc73   :  { %8397 = vmatprep.subr.bf16.mxu1 %v9638_v44  ;;  %8403 = vmatprep.subr.bf16.mxu0 %v9238_v23 }
 0xc74   :  { %2876 = vmatprep.mubr.f32.mxu1 %v9237_v0  ;;  %7884 = vmatprep.mubr.msk.f32.mxu0 %vm9239_vm2, %v9237_v0 }
 0xc76   :  { %8399 = vmatpush1.bf16.msra.mxu1 %v9648_v4  ;;  %8405 = vmatpush3.bf16.msra.mxu0 %v9668_v14 }
 0xc77   :  { %8407 = vmatprep.subr.bf16.mxu1 %v9625_v3  ;;  %8414 = vmatprep.subr.bf16.mxu0 %v9238_v23 }
 0xd44   :  { %v2712_v28 = vpop.f32.mrb[36].mxu1  ;;  %v2783_v1 = vpop.f32.mrb[32].mxu0 }
 0xd45   :  { %v8750_v41 = vadd.f32 %v2712_v28, %v9719_v55  ;;  %v2714_v2 = vpop.f32.mrb[37].mxu1  ;;  %v7875_v50 = vpop.f32.mrb[33].mxu0  ;;  %v2801_v17 = vadd.f32 %v2783_v1, %v9729_v16 }
 0xd46   :  { %v8751_v13 = vadd.f32 %v2714_v2, %v9722_v58 }
 0xd47   :  { %v7325_v9 = vmul.f32 -1.442695, %v8750_v41 }
 0xd48   :  { %v7326_v5 = vmul.f32 -1.442695, %v8751_v13 }
 0xd49   :  { %8977 = vpow2.f32 %v7325_v9 }
 0xd4a   :  { %8979 = vpow2.f32 %v7326_v5  ;;  %v1974_v5 = vadd.f32 %v9716_v42, %v9732_v29  ;;  %v3309_v42 = vld [vmem:[%s10562_s7 + $0x10] sm:$0xff] }
 0xd53   :  { %v8978_v6 = vpop.eup %8977 }
 0xd54   :  { %v2795_v10 = vadd.f32 1.0, %v8978_v6  ;;  %v8980_v12 = vpop.eup %8979 }
 0xd55   :  { %v2796_v15 = vadd.f32 1.0, %v8980_v12 }
 0xd56   :  { %8981 = vrcp.f32 %v2795_v10 }
 0xd57   :  { %8983 = vrcp.f32 %v2796_v15 }
 0xd60   :  { %v8982_v18 = vpop.eup %8981 }
 0xd61   :  { %v2802_v20 = vmul.f32 %v8982_v18, %v2801_v17  ;;  %v8984_v33 = vpop.eup %8983  ;;  %v3307_v17 = vld [vmem:[%s10562_s7] sm:$0xff]  ;;  %v3308_v18 = vld [vmem:[%s10562_s7 + $0x8] sm:$0xff] }
 0xd62   :  { %v2805_v22 = vsub.f32 1.0, %v8984_v33  ;;  %v2807_v27 = vmul.f32 %v8984_v33, %v2642_v63  ;;  %v8435_v33 = vpack.c.bf16 %v3308_v18, %v3307_v17 }
 0xd63   :  { %v2803_v21 = vadd.f32 %v2802_v20, %v1964_v19 }
 0xd65   :  { %8985 = vtanh.f32 %v2803_v21 }
 0xd6f   :  { %v8986_v25 = vpop.eup %8985 }
 0xd70   :  { %v2806_v34 = vmul.f32 %v8986_v25, %v2805_v22  ;;  %v3310_v25 = vld [vmem:[%s10562_s7 + $0x18] sm:$0xff] }
 0xd72   :  { %v2808_v37 = vadd.f32 %v2807_v27, %v2806_v34  ;;  %v8438_v34 = vpack.c.bf16 %v3310_v25, %v3309_v42  ;;  %v3332_v27 = vld [vmem:[%s10557_s2] sm:$0xff]  ;;  %v3655_v42 = vld [vmem:[%s10560_s5 + $0x10] sm:$0xff] }
 0xd74   :  { %7327 = vmatmul.mubr.msk.f32.vlgmr.msra.gmra.mrb[38].mxu1 %vm352_vm3, %v2808_v37  ;;  %7885 = vmatmul.mubr.msk.f32.vlgmr.msra.gmra.mrb[34].mxu0 %vm352_vm3, %v2808_v37 }
 0xd75   :  { %8409 = vmatpush1.bf16.msra.mxu1 %v9636_v24  ;;  %8416 = vmatpush3.bf16.msra.mxu0 %v9662_v11 }
 0xd76   :  { %8411 = vmatprep.subr.bf16.mxu1 %v9638_v44  ;;  %8417 = vmatprep.subr.bf16.mxu0 %v9238_v23 }
 0xd77   :  { %3042 = vmatprep.mubr.f32.mxu1 %v9237_v0  ;;  %7895 = vmatprep.mubr.msk.f32.mxu0 %vm9239_vm2, %v9237_v0 }
 0xd79   :  { %8413 = vmatpush1.bf16.msra.mxu1 %v9648_v4  ;;  %8419 = vmatpush3.bf16.msra.mxu0 %v9668_v14 }
 0xd7a   :  { %8428 = vmatprep.subr.bf16.mxu0 %v9238_v23  ;;  %8421 = vmatprep.subr.bf16.mxu1 %v9625_v3 }
 0xe47   :  { %v2878_v30 = vpop.f32.mrb[38].mxu1  ;;  %v2949_v52 = vpop.f32.mrb[34].mxu0 }
 0xe48   :  { %v8752_v38 = vadd.f32 %v2878_v30, %v9719_v55  ;;  %v2880_v47 = vpop.f32.mrb[39].mxu1  ;;  %v7886_v31 = vpop.f32.mrb[35].mxu0  ;;  %v2967_v45 = vadd.f32 %v2949_v52, %v9729_v16  ;;  %v3313_v30 = vld [vmem:[%s10562_s7 + $0x28] sm:$0xff] }
 0xe49   :  { %v8753_v53 = vadd.f32 %v2880_v47, %v9722_v58  ;;  %v3315_v47 = vld [vmem:[%s10562_s7 + $0x38] sm:$0xff] }
 0xe4a   :  { %v7329_v61 = vmul.f32 -1.442695, %v8752_v38  ;;  %v3314_v38 = vld [vmem:[%s10562_s7 + $0x30] sm:$0xff] }
 0xe4b   :  { %v7330_v32 = vmul.f32 -1.442695, %v8753_v53  ;;  %v8444_v31 = vpack.c.bf16 %v3315_v47, %v3314_v38  ;;  %v3318_v53 = vld [vmem:[%s10562_s7 + $0x48] sm:$0xff]  ;;  %v3659_v38 = vld [vmem:[%s10560_s5 + $0x30] sm:$0xff] }
 0xe4c   :  { %8987 = vpow2.f32 %v7329_v61  ;;  %v3317_v61 = vld [vmem:[%s10562_s7 + $0x40] sm:$0xff]  ;;  %v3662_v47 = vld [vmem:[%s10560_s5 + $0x48] sm:$0xff] }
 0xe4d   :  { %8989 = vpow2.f32 %v7330_v32  ;;  %v8447_v32 = vpack.c.bf16 %v3318_v53, %v3317_v61  ;;  %v8464_v61 = vpack.c.bf16 %v3662_v47, %v3659_v38  ;;  %v3664_v53 = vld [vmem:[%s10560_s5 + $0x58] sm:$0xff] }
 0xe56   :  { %v8988_v36 = vpop.eup %8987 }
 0xe57   :  { %v2961_v39 = vadd.f32 1.0, %v8988_v36  ;;  %v8990_v40 = vpop.eup %8989  ;;  %v3319_v36 = vld [vmem:[%s10562_s7 + $0x50] sm:$0xff] }
 0xe58   :  { %v2962_v43 = vadd.f32 1.0, %v8990_v40 }
 0xe59   :  { %8991 = vrcp.f32 %v2961_v39  ;;  %v3320_v39 = vld [vmem:[%s10562_s7 + $0x58] sm:$0xff] }
 0xe5a   :  { %8993 = vrcp.f32 %v2962_v43  ;;  %v8450_v40 = vpack.c.bf16 %v3320_v39, %v3319_v36  ;;  %v3681_v36 = vld [vmem:[%s10560_s5 + $0xe0] sm:$0xf]  ;;  %v3682_v39 = vld [vmem:[%s10560_s5 + $0xe8] sm:$0xf] }
 0xe63   :  { %v8992_v3 = vpop.eup %8991 }
 0xe64   :  { %v2968_v51 = vmul.f32 %v8992_v3, %v2967_v45  ;;  %v8994_v57 = vpop.eup %8993 }
 0xe65   :  { %v2971_v7 = vsub.f32 1.0, %v8994_v57  ;;  %v2973_v62 = vmul.f32 %v8994_v57, %v2808_v37  ;;  %v3312_v37 = vld [vmem:[%s10562_s7 + $0x20] sm:$0xff] }
 0xe66   :  { %v2969_v54 = vadd.f32 %v2968_v51, %v1969_v48  ;;  %v8441_v52 = vpack.c.bf16 %v3313_v30, %v3312_v37  ;;  %v3660_v37 = vld [vmem:[%s10560_s5 + $0x38] sm:$0xff]  ;;  %v3663_v30 = vld [vmem:[%s10560_s5 + $0x50] sm:$0xff] }
 0xe68   :  { %8995 = vtanh.f32 %v2969_v54 }
 0xe72   :  { %v8996_v59 = vpop.eup %8995 }
 0xe73   :  { %v2972_v60 = vmul.f32 %v8996_v59, %v2971_v7  ;;  %v7339_v7 = vld [vmem:[%s10562_s7 + $0xa0] ss:$0 sm:$0xff] }
 0xe75   :  { %v2974_v26 = vadd.f32 %v2973_v62, %v2972_v60 }
 0xe77   :  { %7331 = vmatmul.mubr.msk.f32.vlgmr.msra.gmra.mrb[40].mxu1 %vm352_vm3, %v2974_v26  ;;  %7896 = vmatmul.mubr.msk.f32.vlgmr.msra.gmra.mrb[36].mxu0 %vm352_vm3, %v2974_v26 }
 0xe78   :  { %8430 = vmatpush3.bf16.msra.mxu0 %v9662_v11  ;;  %8423 = vmatpush1.bf16.msra.mxu1 %v9636_v24 }
 0xe79   :  { %8431 = vmatprep.subr.bf16.mxu0 %v9238_v23  ;;  %8425 = vmatprep.subr.bf16.mxu1 %v9638_v44 }
 0xe7a   :  { %3208 = vmatprep.mubr.f32.mxu1 %v9237_v0  ;;  %7906 = vmatprep.mubr.msk.f32.mxu0 %vm9239_vm2, %v9237_v0 }
 0xe7c   :  { %8433 = vmatpush3.bf16.msra.mxu0 %v9668_v14  ;;  %8427 = vmatpush1.bf16.msra.mxu1 %v9648_v4 }
 0xe7d   :  { %8434 = vmatprep.subr.bf16.mxu0 %v9238_v23  ;;  %8440 = vmatprep.subr.bf16.mxu1 %v9238_v23 }
 0xf4a   :  { %v3044_v11 = vpop.f32.mrb[40].mxu1  ;;  %v3115_v56 = vpop.f32.mrb[36].mxu0 }
 0xf4b   :  { %v8754_v24 = vadd.f32 %v3044_v11, %v9719_v55  ;;  %v3046_v63 = vpop.f32.mrb[41].mxu1  ;;  %v7897_v28 = vpop.f32.mrb[37].mxu0  ;;  %v3133_v9 = vadd.f32 %v3115_v56, %v9729_v16 }
 0xf4c   :  { %v8755_v1 = vadd.f32 %v3046_v63, %v9722_v58 }
 0xf4d   :  { %v7333_v44 = vmul.f32 -1.442695, %v8754_v24 }
 0xf4e   :  { %v7334_v41 = vmul.f32 -1.442695, %v8755_v1 }
 0xf4f   :  { %8997 = vpow2.f32 %v7333_v44 }
 0xf50   :  { %8999 = vpow2.f32 %v7334_v41  ;;  %v1979_v41 = vadd.f32 %v9714_v8, %v9732_v29  ;;  %v3325_v8 = vld [vmem:[%s10562_s7 + $0x78] sm:$0xff] }
 0xf59   :  { %v8998_v2 = vpop.eup %8997 }
 0xf5a   :  { %v3127_v14 = vadd.f32 1.0, %v8998_v2  ;;  %v9000_v4 = vpop.eup %8999 }
 0xf5b   :  { %v3128_v50 = vadd.f32 1.0, %v9000_v4  ;;  %v3322_v4 = vld [vmem:[%s10562_s7 + $0x60] sm:$0xff] }
 0xf5c   :  { %9001 = vrcp.f32 %v3127_v14 }
 0xf5d   :  { %9003 = vrcp.f32 %v3128_v50  ;;  %v3323_v50 = vld [vmem:[%s10562_s7 + $0x68] sm:$0xff] }
 0xf66   :  { %v9002_v13 = vpop.eup %9001 }
 0xf67   :  { %v3134_v6 = vmul.f32 %v9002_v13, %v3133_v9  ;;  %v9004_v12 = vpop.eup %9003  ;;  %v8453_v13 = vpack.c.bf16 %v3323_v50, %v3322_v4  ;;  %v3672_v4 = vld [vmem:[%s10560_s5 + $0x98] sm:$0xff]  ;;  %v3675_v50 = vld [vmem:[%s10560_s5 + $0xb0] sm:$0xff] }
 0xf68   :  { %v3137_v15 = vsub.f32 1.0, %v9004_v12  ;;  %v3139_v21 = vmul.f32 %v9004_v12, %v2974_v26 }
 0xf69   :  { %v3135_v10 = vadd.f32 %v3134_v6, %v1974_v5 }
 0xf6b   :  { %9005 = vtanh.f32 %v3135_v10 }
 0xf75   :  { %v9006_v19 = vpop.eup %9005 }
 0xf76   :  { %v3138_v20 = vmul.f32 %v9006_v19, %v3137_v15  ;;  %v3654_v19 = vld [vmem:[%s10560_s5 + $0x8] sm:$0xff] }
 0xf78   :  { %v9851_v22 = vadd.f32 %v3139_v21, %v3138_v20  ;;  %v3657_v20 = vld [vmem:[%s10560_s5 + $0x20] sm:$0xff] }
 0xf79   :  { %v8458_v21 = vpack.c.bf16 %v3657_v20, %v3654_v19  ;;  %v3848_v20 = vld [vmem:[%s10556_s1 + $0x28] sm:$0xff] }
 0xf7a   :  { %7335 = vmatmul.mubr.msk.f32.vlgmr.msra.gmra.mrb[42].mxu1 %vm352_vm3, %v9851_v22  ;;  %7907 = vmatmul.mubr.msk.f32.vlgmr.msra.gmra.mrb[38].mxu0 %vm352_vm3, %v9851_v22 }
 0xf7b   :  { %8436 = vmatpush3.bf16.msra.mxu0 %v8435_v33  ;;  %7917 = vmatprep.mubr.msk.f32.mxu0 %vm9239_vm2, %v9237_v0  ;;  %v3653_v33 = vld [vmem:[%s10560_s5] sm:$0xff] }
 0xf7c   :  { %8437 = vmatprep.subr.bf16.mxu0 %v9238_v23  ;;  %7928 = vmatprep.mubr.msk.f32.mxu1 %vm9239_vm2, %v9237_v0 }
 0xf7d   :  { %8442 = vmatpush3.bf16.msra.mxu1 %v8441_v52  ;;  %v8462_v52 = vpack.c.bf16 %v3663_v30, %v3660_v37 }
 0xf7e   :  { %8443 = vmatprep.subr.bf16.mxu1 %v9238_v23 }
 0xf7f   :  { %8439 = vmatpush3.bf16.msra.mxu0 %v8438_v34  ;;  %v3658_v34 = vld [vmem:[%s10560_s5 + $0x28] sm:$0xff] }
 0xf80   :  { %8446 = vmatprep.subr.bf16.mxu0 %v9238_v23 }
 0xf81   :  { %8445 = vmatpush3.bf16.msra.mxu1 %v8444_v31  ;;  %v3661_v31 = vld [vmem:[%s10560_s5 + $0x40] sm:$0xff] }
 0xf82   :  { %7918 = vmatmul.mubr.msk.f32.vlgmr.msra.gmra.mrb[40].mxu0 %vm352_vm3, %v3332_v27  ;;  %8452 = vmatprep.subr.bf16.mxu1 %v9238_v23  ;;  %v8467_v27 = vpack.c.bf16 %v3658_v34, %v3655_v42 }
 0xf83   :  { %7939 = vmatprep.mubr.msk.f32.mxu0 %vm9239_vm2, %v9237_v0  ;;  %8448 = vmatpush3.bf16.msra.mxu0 %v8447_v32  ;;  %v8470_v32 = vpack.c.bf16 %v3664_v53, %v3661_v31 }
 0xf84   :  { %8449 = vmatprep.subr.bf16.mxu0 %v9238_v23 }
 0xf87   :  { %8451 = vmatpush3.bf16.msra.mxu0 %v8450_v40  ;;  %v7342_v40 = vld [vmem:[%s10562_s7 + $0xa1] ss:$0 sm:$0xff] }
 0xf88   :  { %8459 = vmatprep.subr.bf16.mxu0 %v8458_v21  ;;  %v3849_v21 = vld [vmem:[%s10556_s1 + $0x30] sm:$0xff] }
0x104d   :  { %v3210_v43 = vpop.f32.mrb[42].mxu1  ;;  %v3281_v45 = vpop.f32.mrb[38].mxu0 }
0x104e   :  { %v8756_v3 = vadd.f32 %v3210_v43, %v9719_v55  ;;  %v3212_v48 = vpop.f32.mrb[43].mxu1  ;;  %v7908_v51 = vpop.f32.mrb[39].mxu0 }
0x104f   :  { %v8757_v57 = vadd.f32 %v3212_v48, %v9722_v58  ;;  %v3299_v58 = vadd.f32 %v3281_v45, %v9729_v16  ;;  %v3324_v16 = vld [vmem:[%s10562_s7 + $0x70] sm:$0xff] }
0x1050   :  { %v7337_v54 = vmul.f32 -1.442695, %v8756_v3  ;;  %v8456_v6 = vpack.c.bf16 %v3325_v8, %v3324_v16  ;;  %v3673_v8 = vld [vmem:[%s10560_s5 + $0xa0] sm:$0xff] }
0x1051   :  { %v7338_v59 = vmul.f32 -1.442695, %v8757_v57 }
0x1052   :  { %9007 = vpow2.f32 %v7337_v54 }
0x1053   :  { %9009 = vpow2.f32 %v7338_v59 }
0x1055   :  { %v3406_v60 = vpop.f32.mrb[40].mxu0 }
0x1056   :  { %v3407_v62 = vadd.f32 %v7339_v7, %v3406_v60  ;;  %v7919_v26 = vpop.f32.mrb[41].mxu0 }
0x1058   :  { %v7341_v11 = vmul.f32 -1.442695, %v3407_v62 }
0x105a   :  { %9011 = vpow2.f32 %v7341_v11 }
0x105c   :  { %v9008_v56 = vpop.eup %9007 }
0x105d   :  { %v3293_v24 = vadd.f32 1.0, %v9008_v56  ;;  %v9010_v55 = vpop.eup %9009 }
0x105e   :  { %v3294_v44 = vadd.f32 1.0, %v9010_v55  ;;  %v3669_v55 = vld [vmem:[%s10560_s5 + $0x80] sm:$0xff] }
0x105f   :  { %9013 = vrcp.f32 %v3293_v24  ;;  %v3666_v24 = vld [vmem:[%s10560_s5 + $0x68] sm:$0xff] }
0x1064   :  { %v9012_v63 = vpop.eup %9011 }
0x1065   :  { %v3413_v28 = vadd.f32 1.0, %v9012_v63 }
0x1067   :  { %9015 = vrcp.f32 %v3413_v28  ;;  %v3680_v28 = vld [vmem:[%s10560_s5 + $0xd8] sm:$0xf] }
0x1068   :  { %9017 = vrcp.f32 %v3294_v44  ;;  %v3665_v44 = vld [vmem:[%s10560_s5 + $0x60] sm:$0xff] }
0x1069   :  { %v9014_v1 = vpop.eup %9013 }
0x106a   :  { %v3300_v2 = vmul.f32 %v9014_v1, %v3299_v58  ;;  %v3668_v58 = vld [vmem:[%s10560_s5 + $0x78] sm:$0xff]  ;;  %v3843_v1 = vld [vmem:[%s10556_s1] sm:$0xff] }
0x106c   :  { %v3301_v14 = vadd.f32 %v3300_v2, %v1979_v41  ;;  %v10004_v41 = vpack.c.bf16 %v3669_v55, %v3666_v24  ;;  %v3667_v2 = vld [vmem:[%s10560_s5 + $0x70] sm:$0xff] }
0x106e   :  { %9019 = vtanh.f32 %v3301_v14  ;;  %v3670_v14 = vld [vmem:[%s10560_s5 + $0x88] sm:$0xff] }
0x106f   :  { %v10032_v16 = vpack.c.bf16 %v3670_v14, %v3667_v2 }
0x1071   :  { %v9016_v9 = vpop.eup %9015 }
0x1072   :  { %v3416_v5 = vmul.f32 %v9016_v9, %v3407_v62  ;;  %v9018_v29 = vpop.eup %9017  ;;  %v7347_v62 = vld [vmem:[%s10562_s7 + $0xa3] ss:$0 sm:$0xff]  ;;  %v3844_v9 = vld [vmem:[%s10556_s1 + $0x8] sm:$0xff] }
0x1073   :  { %v3303_v10 = vsub.f32 1.0, %v9018_v29  ;;  %v3305_v17 = vmul.f32 %v9018_v29, %v9851_v22  ;;  %v3656_v22 = vld [vmem:[%s10560_s5 + $0x18] sm:$0xff] }
0x1074   :  { %7929 = vmatmul.mubr.msk.f32.vlgmr.msra.gmra.mrb[44].mxu1 %vm352_vm3, %v3416_v5  ;;  %v8460_v25 = vpack.c.bf16 %v3656_v22, %v3653_v33  ;;  %v3845_v5 = vld [vmem:[%s10556_s1 + $0x10] sm:$0xff]  ;;  %v3676_v29 = vld [vmem:[%s10560_s5 + $0xb8] sm:$0xff]  ;;  %v7345_v22 = vld [vmem:[%s10562_s7 + $0xa2] ss:$0 sm:$0xff] }
0x1075   :  { %8454 = vmatpush3.bf16.msra.mxu1 %v8453_v13  ;;  %7950 = vmatprep.mubr.msk.f32.mxu1 %vm9239_vm2, %v9237_v0  ;;  %v10025_v13 = vpack.c.bf16 %v3668_v58, %v3665_v44  ;;  %v3850_v33 = vld [vmem:[%s10556_s1 + $0x38] sm:$0xff] }
0x1076   :  { %8455 = vmatprep.subr.bf16.mxu1 %v9238_v23 }
0x1078   :  { %v9020_v12 = vpop.eup %9019 }
0x1079   :  { %8457 = vmatpush3.bf16.msra.mxu1 %v8456_v6  ;;  %v3304_v15 = vmul.f32 %v9020_v12, %v3303_v10  ;;  %v10042_v6 = vpack.c.bf16 %v3675_v50, %v3672_v4  ;;  %v3671_v10 = vld [vmem:[%s10560_s5 + $0x90] sm:$0xff]  ;;  %v3674_v12 = vld [vmem:[%s10560_s5 + $0xa8] sm:$0xff] }
0x107a   :  { %8466 = vmatprep.subr.bf16.mxu1 %v9238_v23  ;;  %v10064_v19 = vpack.c.bf16 %v3674_v12, %v3671_v10  ;;  %v10152_v4 = vld [vmem:[%s10560_s5 + $0xd1] ss:$0 sm:$0xff] }
0x107b   :  { %v3306_v18 = vadd.f32 %v3305_v17, %v3304_v15  ;;  %v3846_v15 = vld [vmem:[%s10556_s1 + $0x18] sm:$0xff]  ;;  %v3847_v17 = vld [vmem:[%s10556_s1 + $0x20] sm:$0xff] }
0x107d   :  { %7940 = vmatmul.mubr.msk.f32.vlgmr.msra.gmra.mrb[42].mxu0 %vm352_vm3, %v3306_v18  ;;  %7951 = vmatmul.mubr.msk.f32.vlgmr.msra.gmra.mrb[46].mxu1 %vm352_vm3, %v3306_v18  ;;  %v10062_v18 = vpack.c.bf16 %v3676_v29, %v3673_v8 }
0x107e   :  { %3766 = vmatprep.mubr.f32.mxu0 %v9237_v0  ;;  %7961 = vmatprep.mubr.msk.f32.mxu1 %vm9239_vm2, %v9237_v0 }
0x107f   :  { %8461 = vmatpush1.bf16.msra.mxu0 %v8460_v25  ;;  %8468 = vmatpush3.bf16.msra.mxu1 %v8467_v27  ;;  %v7349_v25 = vld [vmem:[%s10560_s5 + $0xc0] ss:$8 sm:$0x7] }
0x1080   :  { %8469 = vmatprep.subr.bf16.mxu1 %v9238_v23  ;;  %8463 = vmatprep.subr.bf16.mxu0 %v8462_v52  ;;  %v3695_v34 = vrot.slane %v7349_v25, %v9405_v35 }
0x1083   :  { %8465 = vmatpush1.bf16.msra.mxu0 %v8464_v61  ;;  %8471 = vmatpush3.bf16.msra.mxu1 %v8470_v32 }
0x1084   :  { %7352 = vmatprep.subr.msk.mxu0 %vm124_vm0, %v3681_v36  ;;  %7964 = vmatprep.subr.msk.mxu1 %vm124_vm0, %v3682_v39 }
0x1147   :  { %v3490_v43 = vpop.f32.mrb[44].mxu1 }
0x1148   :  { %v3491_v45 = vadd.f32 %v7342_v40, %v3490_v43  ;;  %v7930_v3 = vpop.f32.mrb[45].mxu1 }
0x114a   :  { %v7344_v48 = vmul.f32 -1.442695, %v3491_v45 }
0x114c   :  { %9021 = vpow2.f32 %v7344_v48 }
0x1150   :  { %v9981_v51 = vpop.f32.mrb[42].mxu0  ;;  %v3648_v54 = vpop.f32.mrb[46].mxu1 }
0x1151   :  { %v7941_v57 = vpop.f32.mrb[43].mxu0  ;;  %v7952_v7 = vpop.f32.mrb[47].mxu1  ;;  %v3649_v56 = vadd.f32 %v7347_v62, %v3648_v54  ;;  %v10098_v42 = vadd.f32 %v7345_v22, %v9981_v51  ;;  %v3687_v62 = vrot.slane %v7349_v25, %v9416_v46 }
0x1156   :  { %v9022_v59 = vpop.eup %9021 }
0x1157   :  { %v3497_v60 = vadd.f32 1.0, %v9022_v59 }
0x1159   :  { %9023 = vrcp.f32 %v3497_v60 }
0x1163   :  { %v9024_v26 = vpop.eup %9023 }
0x1164   :  { %v3500_v11 = vmul.f32 %v9024_v26, %v3491_v45  ;;  %v3691_v26 = vrot.slane %v7349_v25, %v9420_v49 }
0x1166   :  { %v3652_v63 = vadd.f32 %v3649_v56, %v3500_v11 }
0x1168   :  { %7350 = vmatmul.mubr.msk.f32.vlgmr.msra.gmra.mrb[44].mxu0 %vm352_vm3, %v3652_v63  ;;  %7962 = vmatmul.mubr.msk.f32.vlgmr.msra.gmra.mrb[48].mxu1 %vm352_vm3, %v3652_v63 }
0x1169   :  { %7353 = vmatpush1.msk.msra.mxu0 %vm124_vm0, %v3680_v28  ;;  %3948 = vmatprep.mubr.f32.mxu0 %v9237_v0 }
0x116a   :  { %7965 = vmatpush3.msk.msra.mxu1 %vm124_vm0, %v3682_v39  ;;  %7966 = vmatprep.mubr.msk.f32.mxu1 %vm99_vm1, %v3843_v1 }
0x116b   :  { %8473 = vmatprep.subr.bf16.mxu0 %v10004_v41  ;;  %8480 = vmatprep.subr.bf16.mxu1 %v9238_v23 }
0x116c   :  { %7354 = vmatmul.mubr.msk.f32.vlgmr.msra.gmra.mrb[46].mxu0 %vm99_vm1, %v3843_v1  ;;  %7967 = vmatmul.mubr.msk.f32.vlgmr.msra.gmra.mrb[50].mxu1 %vm99_vm1, %v3844_v9 }
0x116d   :  { %8475 = vmatpush1.bf16.msra.mxu0 %v10025_v13  ;;  %3954 = vmatprep.mubr.f32.mxu0 %v9237_v0 }
0x116e   :  { %7969 = vmatprep.mubr.msk.f32.mxu1 %vm99_vm1, %v3845_v5  ;;  %8482 = vmatpush3.bf16.msra.mxu1 %v10032_v16 }
0x116f   :  { %8483 = vmatprep.subr.bf16.mxu1 %v9238_v23  ;;  %8477 = vmatprep.subr.bf16.mxu0 %v10042_v6 }
0x1170   :  { %7355 = vmatmul.mubr.msk.f32.gmra.mrb[48].mxu0 %vm99_vm1, %v3844_v9  ;;  %7970 = vmatmul.mubr.msk.f32.gmra.mrb[52].mxu1 %vm99_vm1, %v3846_v15 }
0x1171   :  { %3960 = vmatprep.mubr.f32.mxu0 %v9237_v0  ;;  %7972 = vmatprep.mubr.msk.f32.mxu1 %vm99_vm1, %v3847_v17 }
0x1172   :  { %8485 = vmatpush3.bf16.msra.mxu1 %v10062_v18  ;;  %8479 = vmatpush1.bf16.msra.mxu0 %v10064_v19 }
0x1173   :  { %8487 = vmatprep.subr.bf16.mxu0 %v10004_v41  ;;  %8494 = vmatprep.subr.bf16.mxu1 %v9238_v23 }
0x1174   :  { %7356 = vmatmul.mubr.msk.f32.gmra.mrb[50].mxu0 %vm99_vm1, %v3845_v5  ;;  %7973 = vmatmul.mubr.msk.f32.gmra.mrb[54].mxu1 %vm99_vm1, %v3848_v20 }
0x1175   :  { %3966 = vmatprep.mubr.f32.mxu0 %v9237_v0  ;;  %7975 = vmatprep.mubr.msk.f32.mxu1 %vm99_vm1, %v3849_v21 }
0x1178   :  { %7357 = vmatmul.mubr.msk.f32.gmra.mrb[52].mxu0 %vm99_vm1, %v3846_v15  ;;  %7976 = vmatmul.mubr.msk.f32.gmra.mrb[56].mxu1 %vm99_vm1, %v3850_v33 }
0x1179   :  { %3972 = vmatprep.mubr.f32.mxu0 %v9237_v0  ;;  %7986 = vmatprep.mubr.msk.f32.mxu1 %vm9239_vm2, %v9237_v0 }
0x117c   :  { %7358 = vmatmul.mubr.msk.f32.gmra.mrb[54].mxu0 %vm99_vm1, %v3847_v17  ;;  %7987 = vmatmul.mubr.msk.f32.vlgmr.msra.gmra.mrb[58].mxu1 %vm352_vm3, %v10098_v42 }
0x117d   :  { %3978 = vmatprep.mubr.f32.mxu0 %v9237_v0  ;;  %8496 = vmatpush3.bf16.msra.mxu1 %v10032_v16 }
0x117e   :  { %8497 = vmatprep.subr.bf16.mxu1 %v9238_v23  ;;  %7997 = vmatprep.mubr.msk.f32.mxu1 %vm9239_vm2, %v9237_v0 }
0x1180   :  { %7359 = vmatmul.mubr.msk.f32.gmra.mrb[56].mxu0 %vm99_vm1, %v3848_v20 }
0x1181   :  { %3984 = vmatprep.mubr.f32.mxu0 %v9237_v0  ;;  %8499 = vmatpush3.bf16.msra.mxu1 %v10062_v18 }
0x1182   :  { %8508 = vmatprep.subr.bf16.mxu1 %v9238_v23 }
0x1184   :  { %7360 = vmatmul.mubr.msk.f32.gmra.mrb[58].mxu0 %vm99_vm1, %v3849_v21 }
0x1185   :  { %3990 = vmatprep.mubr.f32.mxu0 %v9237_v0 }
0x1188   :  { %7361 = vmatmul.mubr.msk.f32.gmra.mrb[60].mxu0 %vm99_vm1, %v3850_v33 }
0x1189   :  { %4172 = vmatprep.mubr.f32.mxu0 %v9237_v0 }
0x118c   :  { %7371 = vmatmul.mubr.msk.f32.vlgmr.msra.gmra.mrb[46].mxu0 %vm352_vm3, %v10098_v42 }
0x118d   :  { %8489 = vmatpush1.bf16.msra.mxu0 %v10025_v13  ;;  %4342 = vmatprep.mubr.f32.mxu0 %v9237_v0 }
0x118e   :  { %8491 = vmatprep.subr.bf16.mxu0 %v10042_v6 }
0x1191   :  { %8493 = vmatpush1.bf16.msra.mxu0 %v10064_v19 }
0x1192   :  { %8501 = vmatprep.subr.bf16.mxu0 %v10004_v41 }
0x123b   :  { %v3768_v27 = vpop.f32.mrb[44].mxu0  ;;  %v3839_v37 = vpop.f32.mrb[48].mxu1 }
0x123c   :  { %v3770_v30 = vpop.f32.mrb[45].mxu0  ;;  %v7963_v52 = vpop.f32.mrb[49].mxu1  ;;  %v3840_v38 = vadd.f32 %v3839_v37, %v3695_v34  ;;  %v10143_v11 = vadd.f32 %v3768_v27, %v3687_v62 }
0x123d   :  { %v10146_v63 = vadd.f32 %v3770_v30, %v3691_v26 }
0x123f   :  { %v7968_v47 = vpop.f32.mrb[50].mxu1 }
0x1240   :  { %v10127_v31 = vadd.f32 %v7968_v47, %v3840_v38  ;;  %v4063_v61 = vpop.f32.mrb[51].mxu1 }
0x1241   :  { %v4104_v53 = vadd.f32 %v4063_v61, %v3840_v38 }
0x1243   :  { %v7971_v32 = vpop.f32.mrb[52].mxu1 }
0x1244   :  { %v10129_v36 = vadd.f32 %v7971_v32, %v3840_v38  ;;  %v4073_v39 = vpop.f32.mrb[53].mxu1 }
0x1245   :  { %v10131_v40 = vadd.f32 %v4073_v39, %v3840_v38 }
0x1247   :  { %v7974_v43 = vpop.f32.mrb[54].mxu1 }
0x1248   :  { %v10133_v45 = vadd.f32 %v7974_v43, %v3840_v38  ;;  %v4083_v3 = vpop.f32.mrb[55].mxu1 }
0x1249   :  { %v10135_v48 = vadd.f32 %v4083_v3, %v3840_v38 }
0x124b   :  { %v7977_v51 = vpop.f32.mrb[56].mxu1 }
0x124c   :  { %v10137_v54 = vadd.f32 %v7977_v51, %v3840_v38  ;;  %v4093_v57 = vpop.f32.mrb[57].mxu1 }
0x124d   :  { %v10139_v7 = vadd.f32 %v4093_v57, %v3840_v38 }
0x124f   :  { %v4245_v59 = vpop.f32.mrb[58].mxu1 }
0x1250   :  { %v7988_v60 = vpop.f32.mrb[59].mxu1  ;;  %v4263_v9 = vadd.f32 %v4245_v59, %v10152_v4 }
0x125f   :  { %v4174_v56 = vpop.f32.mrb[46].mxu0 }
0x1260   :  { %v8758_v24 = vadd.f32 %v4174_v56, %v10143_v11  ;;  %v4176_v55 = vpop.f32.mrb[47].mxu0 }
0x1261   :  { %v8759_v44 = vadd.f32 %v4176_v55, %v10146_v63 }
0x1262   :  { %v7373_v28 = vmul.f32 -1.442695, %v8758_v24 }
0x1263   :  { %v7374_v58 = vmul.f32 -1.442695, %v8759_v44 }
0x1264   :  { %9025 = vpow2.f32 %v7373_v28 }
0x1265   :  { %9027 = vpow2.f32 %v7374_v58 }
0x126e   :  { %v9026_v1 = vpop.eup %9025 }
0x126f   :  { %v4257_v2 = vadd.f32 1.0, %v9026_v1  ;;  %v9028_v14 = vpop.eup %9027 }
0x1270   :  { %v4258_v50 = vadd.f32 1.0, %v9028_v14 }
0x1271   :  { %9029 = vrcp.f32 %v4257_v2 }
0x1272   :  { %9031 = vrcp.f32 %v4258_v50 }
0x127b   :  { %v9030_v5 = vpop.eup %9029 }
0x127c   :  { %v4264_v8 = vmul.f32 %v9030_v5, %v4263_v9  ;;  %v9032_v10 = vpop.eup %9031 }
0x127d   :  { %v4267_v12 = vsub.f32 1.0, %v9032_v10  ;;  %v4269_v20 = vmul.f32 %v9032_v10, %v10098_v42 }
0x127e   :  { %v4265_v29 = vadd.f32 %v4264_v8, %v4104_v53 }
0x1280   :  { %9033 = vtanh.f32 %v4265_v29 }
0x128a   :  { %v9034_v15 = vpop.eup %9033 }
0x128b   :  { %v4268_v17 = vmul.f32 %v9034_v15, %v4267_v12 }
0x128d   :  { %v4270_v21 = vadd.f32 %v4269_v20, %v4268_v17 }
0x128f   :  { %4271 = vst.msk [vmem:[#allocation2] sm:$0xff] %vm352_vm3, %v4270_v21  ;;  %7375 = vmatmul.mubr.msk.f32.vlgmr.msra.gmra.mrb[48].mxu0 %vm352_vm3, %v4270_v21  ;;  %7998 = vmatmul.mubr.msk.f32.vlgmr.msra.gmra.mrb[60].mxu1 %vm352_vm3, %v4270_v21 }
0x1290   :  { %8503 = vmatpush1.bf16.msra.mxu0 %v10025_v13  ;;  %8510 = vmatpush3.bf16.msra.mxu1 %v10032_v16 }
0x1291   :  { %8505 = vmatprep.subr.bf16.mxu0 %v10042_v6  ;;  %8511 = vmatprep.subr.bf16.mxu1 %v9238_v23 }
0x1292   :  { %4512 = vmatprep.mubr.f32.mxu0 %v9237_v0  ;;  %8008 = vmatprep.mubr.msk.f32.mxu1 %vm9239_vm2, %v9237_v0 }
0x1294   :  { %8507 = vmatpush1.bf16.msra.mxu0 %v10064_v19  ;;  %8513 = vmatpush3.bf16.msra.mxu1 %v10062_v18 }
0x1295   :  { %8515 = vmatprep.subr.bf16.mxu0 %v10004_v41  ;;  %8522 = vmatprep.subr.bf16.mxu1 %v9238_v23 }
0x1362   :  { %v4344_v33 = vpop.f32.mrb[48].mxu0  ;;  %v4415_v22 = vpop.f32.mrb[60].mxu1 }
0x1363   :  { %v8760_v25 = vadd.f32 %v4344_v33, %v10143_v11  ;;  %v4346_v34 = vpop.f32.mrb[49].mxu0  ;;  %v7999_v27 = vpop.f32.mrb[61].mxu1  ;;  %v4433_v32 = vadd.f32 %v4415_v22, %v10152_v4 }
0x1364   :  { %v8761_v30 = vadd.f32 %v4346_v34, %v10146_v63 }
0x1365   :  { %v7377_v37 = vmul.f32 -1.442695, %v8760_v25 }
0x1366   :  { %v7378_v52 = vmul.f32 -1.442695, %v8761_v30 }
0x1367   :  { %9035 = vpow2.f32 %v7377_v37 }
0x1368   :  { %9037 = vpow2.f32 %v7378_v52 }
0x1371   :  { %v9036_v38 = vpop.eup %9035 }
0x1372   :  { %v4427_v47 = vadd.f32 1.0, %v9036_v38  ;;  %v9038_v61 = vpop.eup %9037 }
0x1373   :  { %v4428_v53 = vadd.f32 1.0, %v9038_v61 }
0x1374   :  { %9039 = vrcp.f32 %v4427_v47 }
0x1375   :  { %9041 = vrcp.f32 %v4428_v53 }
0x137e   :  { %v9040_v39 = vpop.eup %9039 }
0x137f   :  { %v4434_v43 = vmul.f32 %v9040_v39, %v4433_v32  ;;  %v9042_v51 = vpop.eup %9041 }
0x1380   :  { %v4437_v57 = vsub.f32 1.0, %v9042_v51  ;;  %v4439_v62 = vmul.f32 %v9042_v51, %v4270_v21 }
0x1381   :  { %v4435_v3 = vadd.f32 %v4434_v43, %v10127_v31 }
0x1383   :  { %9043 = vtanh.f32 %v4435_v3 }
0x138d   :  { %v9044_v59 = vpop.eup %9043 }
0x138e   :  { %v4438_v60 = vmul.f32 %v9044_v59, %v4437_v57 }
0x1390   :  { %v4440_v26 = vadd.f32 %v4439_v62, %v4438_v60 }
0x1392   :  { %4441 = vst.msk [vmem:[#allocation2 + $0x8] sm:$0xff] %vm352_vm3, %v4440_v26  ;;  %7379 = vmatmul.mubr.msk.f32.vlgmr.msra.gmra.mrb[50].mxu0 %vm352_vm3, %v4440_v26  ;;  %8009 = vmatmul.mubr.msk.f32.vlgmr.msra.gmra.mrb[62].mxu1 %vm352_vm3, %v4440_v26 }
0x1393   :  { %8517 = vmatpush1.bf16.msra.mxu0 %v10025_v13  ;;  %8524 = vmatpush3.bf16.msra.mxu1 %v10032_v16 }
0x1394   :  { %8519 = vmatprep.subr.bf16.mxu0 %v10042_v6  ;;  %8525 = vmatprep.subr.bf16.mxu1 %v9238_v23 }
0x1395   :  { %4682 = vmatprep.mubr.f32.mxu0 %v9237_v0  ;;  %8019 = vmatprep.mubr.msk.f32.mxu1 %vm9239_vm2, %v9237_v0 }
0x1397   :  { %8521 = vmatpush1.bf16.msra.mxu0 %v10064_v19  ;;  %8527 = vmatpush3.bf16.msra.mxu1 %v10062_v18 }
0x1398   :  { %8529 = vmatprep.subr.bf16.mxu0 %v10004_v41  ;;  %8536 = vmatprep.subr.bf16.mxu1 %v9238_v23 }
0x1465   :  { %v4514_v31 = vpop.f32.mrb[50].mxu0  ;;  %v4585_v56 = vpop.f32.mrb[62].mxu1 }
0x1466   :  { %v8762_v24 = vadd.f32 %v4514_v31, %v10143_v11  ;;  %v4516_v55 = vpop.f32.mrb[51].mxu0  ;;  %v8010_v28 = vpop.f32.mrb[63].mxu1  ;;  %v4603_v5 = vadd.f32 %v4585_v56, %v10152_v4 }
0x1467   :  { %v8763_v58 = vadd.f32 %v4516_v55, %v10146_v63 }
0x1468   :  { %v7381_v44 = vmul.f32 -1.442695, %v8762_v24 }
0x1469   :  { %v7382_v1 = vmul.f32 -1.442695, %v8763_v58 }
0x146a   :  { %9045 = vpow2.f32 %v7381_v44 }
0x146b   :  { %9047 = vpow2.f32 %v7382_v1 }
0x1474   :  { %v9046_v2 = vpop.eup %9045 }
0x1475   :  { %v4597_v14 = vadd.f32 1.0, %v9046_v2  ;;  %v9048_v50 = vpop.eup %9047 }
0x1476   :  { %v4598_v9 = vadd.f32 1.0, %v9048_v50 }
0x1477   :  { %9049 = vrcp.f32 %v4597_v14 }
0x1478   :  { %9051 = vrcp.f32 %v4598_v9 }
0x1481   :  { %v9050_v8 = vpop.eup %9049 }
0x1482   :  { %v4604_v29 = vmul.f32 %v9050_v8, %v4603_v5  ;;  %v9052_v12 = vpop.eup %9051 }
0x1483   :  { %v4607_v15 = vsub.f32 1.0, %v9052_v12  ;;  %v4609_v21 = vmul.f32 %v9052_v12, %v4440_v26 }
0x1484   :  { %v4605_v10 = vadd.f32 %v4604_v29, %v10131_v40 }
0x1486   :  { %9053 = vtanh.f32 %v4605_v10 }
0x1490   :  { %v9054_v17 = vpop.eup %9053 }
0x1491   :  { %v4608_v20 = vmul.f32 %v9054_v17, %v4607_v15 }
0x1493   :  { %v4610_v33 = vadd.f32 %v4609_v21, %v4608_v20 }
0x1495   :  { %4611 = vst.msk [vmem:[#allocation2 + $0x10] sm:$0xff] %vm352_vm3, %v4610_v33  ;;  %7383 = vmatmul.mubr.msk.f32.vlgmr.msra.gmra.mrb[52].mxu0 %vm352_vm3, %v4610_v33  ;;  %8020 = vmatmul.mubr.msk.f32.vlgmr.msra.gmra.mrb[64].mxu1 %vm352_vm3, %v4610_v33 }
0x1496   :  { %8531 = vmatpush1.bf16.msra.mxu0 %v10025_v13  ;;  %8538 = vmatpush3.bf16.msra.mxu1 %v10032_v16 }
0x1497   :  { %8533 = vmatprep.subr.bf16.mxu0 %v10042_v6  ;;  %8539 = vmatprep.subr.bf16.mxu1 %v9238_v23 }
0x1498   :  { %4852 = vmatprep.mubr.f32.mxu0 %v9237_v0  ;;  %8030 = vmatprep.mubr.msk.f32.mxu1 %vm9239_vm2, %v9237_v0 }
0x149a   :  { %8535 = vmatpush1.bf16.msra.mxu0 %v10064_v19  ;;  %8541 = vmatpush3.bf16.msra.mxu1 %v10062_v18 }
0x149b   :  { %8543 = vmatprep.subr.bf16.mxu0 %v10004_v41  ;;  %8550 = vmatprep.subr.bf16.mxu1 %v9238_v23 }
0x1568   :  { %v4684_v40 = vpop.f32.mrb[52].mxu0  ;;  %v4755_v22 = vpop.f32.mrb[64].mxu1 }
0x1569   :  { %v8764_v25 = vadd.f32 %v4684_v40, %v10143_v11  ;;  %v4686_v34 = vpop.f32.mrb[53].mxu0  ;;  %v8021_v27 = vpop.f32.mrb[65].mxu1  ;;  %v4773_v32 = vadd.f32 %v4755_v22, %v10152_v4 }
0x156a   :  { %v8765_v30 = vadd.f32 %v4686_v34, %v10146_v63 }
0x156b   :  { %v7385_v37 = vmul.f32 -1.442695, %v8764_v25 }
0x156c   :  { %v7386_v52 = vmul.f32 -1.442695, %v8765_v30 }
0x156d   :  { %9055 = vpow2.f32 %v7385_v37 }
0x156e   :  { %9057 = vpow2.f32 %v7386_v52 }
0x1577   :  { %v9056_v38 = vpop.eup %9055 }
0x1578   :  { %v4767_v47 = vadd.f32 1.0, %v9056_v38  ;;  %v9058_v61 = vpop.eup %9057 }
0x1579   :  { %v4768_v53 = vadd.f32 1.0, %v9058_v61 }
0x157a   :  { %9059 = vrcp.f32 %v4767_v47 }
0x157b   :  { %9061 = vrcp.f32 %v4768_v53 }
0x1584   :  { %v9060_v39 = vpop.eup %9059 }
0x1585   :  { %v4774_v43 = vmul.f32 %v9060_v39, %v4773_v32  ;;  %v9062_v51 = vpop.eup %9061 }
0x1586   :  { %v4777_v57 = vsub.f32 1.0, %v9062_v51  ;;  %v4779_v62 = vmul.f32 %v9062_v51, %v4610_v33 }
0x1587   :  { %v4775_v3 = vadd.f32 %v4774_v43, %v10129_v36 }
0x1589   :  { %9063 = vtanh.f32 %v4775_v3 }
0x1593   :  { %v9064_v59 = vpop.eup %9063 }
0x1594   :  { %v4778_v60 = vmul.f32 %v9064_v59, %v4777_v57 }
0x1596   :  { %v4780_v26 = vadd.f32 %v4779_v62, %v4778_v60  ;;  %v5466_v60 = vld [vmem:[#allocation5 + $0x20] sm:$0xff]  ;;  %v5464_v62 = vld [vmem:[#allocation5 + $0x10] sm:$0xff] }
0x1598   :  { %4781 = vst.msk [vmem:[#allocation2 + $0x18] sm:$0xff] %vm352_vm3, %v4780_v26  ;;  %7387 = vmatmul.mubr.msk.f32.vlgmr.msra.gmra.mrb[54].mxu0 %vm352_vm3, %v4780_v26  ;;  %8031 = vmatmul.mubr.msk.f32.vlgmr.msra.gmra.mrb[66].mxu1 %vm352_vm3, %v4780_v26 }
0x1599   :  { %8545 = vmatpush1.bf16.msra.mxu0 %v10025_v13  ;;  %8552 = vmatpush3.bf16.msra.mxu1 %v10032_v16 }
0x159a   :  { %8547 = vmatprep.subr.bf16.mxu0 %v10042_v6  ;;  %8553 = vmatprep.subr.bf16.mxu1 %v9238_v23 }
0x159b   :  { %5022 = vmatprep.mubr.f32.mxu0 %v9237_v0  ;;  %8041 = vmatprep.mubr.msk.f32.mxu1 %vm9239_vm2, %v9237_v0 }
0x159d   :  { %8549 = vmatpush1.bf16.msra.mxu0 %v10064_v19  ;;  %8555 = vmatpush3.bf16.msra.mxu1 %v10062_v18 }
0x159e   :  { %8557 = vmatprep.subr.bf16.mxu0 %v10004_v41  ;;  %8564 = vmatprep.subr.bf16.mxu1 %v9238_v23 }
0x166b   :  { %v4854_v36 = vpop.f32.mrb[54].mxu0  ;;  %v4925_v31 = vpop.f32.mrb[66].mxu1 }
0x166c   :  { %v8766_v56 = vadd.f32 %v4854_v36, %v10143_v11  ;;  %v4856_v24 = vpop.f32.mrb[55].mxu0  ;;  %v8032_v55 = vpop.f32.mrb[67].mxu1  ;;  %v4943_v9 = vadd.f32 %v4925_v31, %v10152_v4 }
0x166d   :  { %v8767_v44 = vadd.f32 %v4856_v24, %v10146_v63 }
0x166e   :  { %v7389_v28 = vmul.f32 -1.442695, %v8766_v56 }
0x166f   :  { %v7390_v58 = vmul.f32 -1.442695, %v8767_v44 }
0x1670   :  { %9065 = vpow2.f32 %v7389_v28 }
0x1671   :  { %9067 = vpow2.f32 %v7390_v58 }
0x167a   :  { %v9066_v1 = vpop.eup %9065 }
0x167b   :  { %v4937_v2 = vadd.f32 1.0, %v9066_v1  ;;  %v9068_v14 = vpop.eup %9067 }
0x167c   :  { %v4938_v50 = vadd.f32 1.0, %v9068_v14 }
0x167d   :  { %9069 = vrcp.f32 %v4937_v2 }
0x167e   :  { %9071 = vrcp.f32 %v4938_v50 }
0x1687   :  { %v9070_v5 = vpop.eup %9069 }
0x1688   :  { %v4944_v8 = vmul.f32 %v9070_v5, %v4943_v9  ;;  %v9072_v10 = vpop.eup %9071 }
0x1689   :  { %v4947_v12 = vsub.f32 1.0, %v9072_v10  ;;  %v4949_v20 = vmul.f32 %v9072_v10, %v4780_v26  ;;  %v5465_v10 = vld [vmem:[#allocation5 + $0x18] sm:$0xff] }
0x168a   :  { %v4945_v29 = vadd.f32 %v4944_v8, %v10135_v48 }
0x168c   :  { %9073 = vtanh.f32 %v4945_v29  ;;  %v5462_v29 = vld [vmem:[#allocation5] sm:$0xff] }
0x1696   :  { %v9074_v15 = vpop.eup %9073 }
0x1697   :  { %v4948_v17 = vmul.f32 %v9074_v15, %v4947_v12  ;;  %v5469_v15 = vld [vmem:[#allocation5 + $0x38] sm:$0xff] }
0x1699   :  { %v4950_v21 = vadd.f32 %v4949_v20, %v4948_v17  ;;  %v5472_v17 = vld [vmem:[#allocation5 + $0x50] sm:$0xff] }
0x169b   :  { %4951 = vst.msk [vmem:[#allocation2 + $0x20] sm:$0xff] %vm352_vm3, %v4950_v21  ;;  %7391 = vmatmul.mubr.msk.f32.vlgmr.msra.gmra.mrb[56].mxu0 %vm352_vm3, %v4950_v21  ;;  %8042 = vmatmul.mubr.msk.f32.vlgmr.msra.gmra.mrb[68].mxu1 %vm352_vm3, %v4950_v21 }
0x169c   :  { %8559 = vmatpush1.bf16.msra.mxu0 %v10025_v13  ;;  %8566 = vmatpush3.bf16.msra.mxu1 %v10032_v16 }
0x169d   :  { %8561 = vmatprep.subr.bf16.mxu0 %v10042_v6  ;;  %8567 = vmatprep.subr.bf16.mxu1 %v9238_v23 }
0x169e   :  { %5192 = vmatprep.mubr.f32.mxu0 %v9237_v0  ;;  %8052 = vmatprep.mubr.msk.f32.mxu1 %vm9239_vm2, %v9237_v0 }
0x16a0   :  { %8563 = vmatpush1.bf16.msra.mxu0 %v10064_v19  ;;  %8569 = vmatpush3.bf16.msra.mxu1 %v10062_v18 }
0x16a1   :  { %8571 = vmatprep.subr.bf16.mxu0 %v10004_v41  ;;  %8578 = vmatprep.subr.bf16.mxu1 %v9238_v23 }
0x176e   :  { %v5024_v48 = vpop.f32.mrb[56].mxu0  ;;  %v5095_v33 = vpop.f32.mrb[68].mxu1 }
0x176f   :  { %v8768_v40 = vadd.f32 %v5024_v48, %v10143_v11  ;;  %v5026_v22 = vpop.f32.mrb[57].mxu0  ;;  %v8043_v25 = vpop.f32.mrb[69].mxu1  ;;  %v5113_v41 = vadd.f32 %v5095_v33, %v10152_v4  ;;  %v5470_v48 = vld [vmem:[#allocation5 + $0x40] sm:$0xff]  ;;  %v5473_v33 = vld [vmem:[#allocation5 + $0x58] sm:$0xff] }
0x1770   :  { %v8769_v27 = vadd.f32 %v5026_v22, %v10146_v63  ;;  %v8588_v25 = vpack.c.bf16 %v5472_v17, %v5469_v15 }
0x1771   :  { %v7393_v34 = vmul.f32 -1.442695, %v8768_v40  ;;  %v8586_v40 = vpack.c.bf16 %v5465_v10, %v5462_v29 }
0x1772   :  { %v7394_v37 = vmul.f32 -1.442695, %v8769_v27  ;;  %v5471_v27 = vld [vmem:[#allocation5 + $0x48] sm:$0xff] }
0x1773   :  { %9075 = vpow2.f32 %v7393_v34  ;;  %v5468_v34 = vld [vmem:[#allocation5 + $0x30] sm:$0xff] }
0x1774   :  { %9077 = vpow2.f32 %v7394_v37  ;;  %v8596_v37 = vpack.c.bf16 %v5473_v33, %v5470_v48 }
0x177d   :  { %v9076_v30 = vpop.eup %9075 }
0x177e   :  { %v5107_v52 = vadd.f32 1.0, %v9076_v30  ;;  %v9078_v38 = vpop.eup %9077  ;;  %v8590_v30 = vpack.c.bf16 %v5471_v27, %v5468_v34 }
0x177f   :  { %v5108_v47 = vadd.f32 1.0, %v9078_v38  ;;  %v5491_v38 = vld [vmem:[#allocation2 + $0x10] sm:$0xff] }
0x1780   :  { %9079 = vrcp.f32 %v5107_v52  ;;  %v5490_v52 = vld [vmem:[#allocation2 + $0x8] sm:$0xff] }
0x1781   :  { %9081 = vrcp.f32 %v5108_v47  ;;  %v5492_v47 = vld [vmem:[#allocation2 + $0x18] sm:$0xff] }
0x178a   :  { %v9080_v61 = vpop.eup %9079 }
0x178b   :  { %v5114_v53 = vmul.f32 %v9080_v61, %v5113_v41  ;;  %v9082_v39 = vpop.eup %9081  ;;  %v5493_v41 = vld [vmem:[#allocation2 + $0x20] sm:$0xff] }
0x178c   :  { %v5117_v43 = vsub.f32 1.0, %v9082_v39  ;;  %v5119_v57 = vmul.f32 %v9082_v39, %v4950_v21  ;;  %v5478_v39 = vld [vmem:[#allocation5 + $0x80] sm:$0xff] }
0x178d   :  { %v5115_v32 = vadd.f32 %v5114_v53, %v10133_v45  ;;  %v5463_v45 = vld [vmem:[#allocation5 + $0x8] sm:$0xff] }
0x178e   :  { %v8584_v26 = vpack.c.bf16 %v5466_v60, %v5463_v45 }
0x178f   :  { %9083 = vtanh.f32 %v5115_v32  ;;  %v5475_v32 = vld [vmem:[#allocation5 + $0x68] sm:$0xff] }
0x1799   :  { %v9084_v3 = vpop.eup %9083 }
0x179a   :  { %v5118_v51 = vmul.f32 %v9084_v3, %v5117_v43  ;;  %v5474_v43 = vld [vmem:[#allocation5 + $0x60] sm:$0xff]  ;;  %v10293_v3 = vpack.c.bf16 %v5478_v39, %v5475_v32 }
0x179c   :  { %v5120_v59 = vadd.f32 %v5119_v57, %v5118_v51  ;;  %v5477_v51 = vld [vmem:[#allocation5 + $0x78] sm:$0xff] }
0x179d   :  { %v5481_v57 = vld [vmem:[#allocation5 + $0x98] sm:$0xff]  ;;  %v10295_v45 = vpack.c.bf16 %v5477_v51, %v5474_v43 }
0x179e   :  { %5121 = vst.msk [vmem:[#allocation2 + $0x28] sm:$0xff] %vm352_vm3, %v5120_v59  ;;  %7395 = vmatmul.mubr.msk.f32.vlgmr.msra.gmra.mrb[58].mxu0 %vm352_vm3, %v5120_v59  ;;  %8053 = vmatmul.mubr.msk.f32.vlgmr.msra.gmra.mrb[70].mxu1 %vm352_vm3, %v5120_v59 }
0x179f   :  { %8573 = vmatpush1.bf16.msra.mxu0 %v10025_v13  ;;  %8580 = vmatpush3.bf16.msra.mxu1 %v10032_v16  ;;  %v5467_v13 = vld [vmem:[#allocation5 + $0x28] sm:$0xff] }
0x17a0   :  { %8575 = vmatprep.subr.bf16.mxu0 %v10042_v6  ;;  %8581 = vmatprep.subr.bf16.mxu1 %v9238_v23  ;;  %v8592_v36 = vpack.c.bf16 %v5467_v13, %v5464_v62  ;;  %v5480_v62 = vld [vmem:[#allocation5 + $0x90] sm:$0xff] }
0x17a1   :  { %5362 = vmatprep.mubr.f32.mxu0 %v9237_v0  ;;  %8063 = vmatprep.mubr.msk.f32.mxu1 %vm9239_vm2, %v9237_v0  ;;  %v5476_v13 = vld [vmem:[#allocation5 + $0x70] sm:$0xff] }
0x17a3   :  { %8577 = vmatpush1.bf16.msra.mxu0 %v10064_v19  ;;  %8583 = vmatpush3.bf16.msra.mxu1 %v10062_v18 }
0x17a4   :  { %8585 = vmatprep.subr.bf16.mxu1 %v8584_v26  ;;  %8593 = vmatprep.subr.bf16.mxu0 %v8592_v36  ;;  %v5483_v26 = vld [vmem:[#allocation5 + $0xa8] sm:$0xff] }
0x17a5   :  { %v5494_v61 = vld [vmem:[#allocation2 + $0x28] sm:$0xff] }
0x1871   :  { %v5194_v16 = vpop.f32.mrb[58].mxu0  ;;  %v5265_v6 = vpop.f32.mrb[70].mxu1 }
0x1872   :  { %v8770_v31 = vadd.f32 %v5194_v16, %v10143_v11  ;;  %v5196_v56 = vpop.f32.mrb[59].mxu0  ;;  %v8054_v24 = vpop.f32.mrb[71].mxu1  ;;  %v5283_v2 = vadd.f32 %v5265_v6, %v10152_v4  ;;  %v10301_v16 = vpack.c.bf16 %v5483_v26, %v5480_v62 }
0x1873   :  { %v8771_v28 = vadd.f32 %v5196_v56, %v10146_v63  ;;  %v5485_v56 = vld [vmem:[#allocation5 + $0xb8] sm:$0xff] }
0x1874   :  { %v7397_v55 = vmul.f32 -1.442695, %v8770_v31  ;;  %v5482_v31 = vld [vmem:[#allocation5 + $0xa0] sm:$0xff] }
0x1875   :  { %v7398_v19 = vmul.f32 -1.442695, %v8771_v28  ;;  %v10309_v24 = vpack.c.bf16 %v5485_v56, %v5482_v31 }
0x1876   :  { %9085 = vpow2.f32 %v7397_v55 }
0x1877   :  { %9087 = vpow2.f32 %v7398_v19 }
0x1880   :  { %v9086_v18 = vpop.eup %9085 }
0x1881   :  { %v5277_v44 = vadd.f32 1.0, %v9086_v18  ;;  %v9088_v58 = vpop.eup %9087 }
0x1882   :  { %v5278_v1 = vadd.f32 1.0, %v9088_v58 }
0x1883   :  { %9089 = vrcp.f32 %v5277_v44 }
0x1884   :  { %9091 = vrcp.f32 %v5278_v1 }
0x188d   :  { %v9090_v14 = vpop.eup %9089 }
0x188e   :  { %v5284_v50 = vmul.f32 %v9090_v14, %v5283_v2  ;;  %v9092_v5 = vpop.eup %9091 }
0x188f   :  { %v5287_v8 = vsub.f32 1.0, %v9092_v5  ;;  %v5289_v21 = vmul.f32 %v9092_v5, %v5120_v59  ;;  %v5484_v59 = vld [vmem:[#allocation5 + $0xb0] sm:$0xff] }
0x1890   :  { %v5285_v9 = vadd.f32 %v5284_v50, %v10139_v7  ;;  %v5489_v7 = vld [vmem:[#allocation2] sm:$0xff]  ;;  %v10297_v60 = vpack.c.bf16 %v5484_v59, %v5481_v57 }
0x1891   :  { %v10364_v57 = vld [vmem:[#allocation5 + $0xd1] ss:$0 sm:$0xff] }
0x1892   :  { %9093 = vtanh.f32 %v5285_v9 }
0x189c   :  { %v9094_v12 = vpop.eup %9093 }
0x189d   :  { %v5288_v20 = vmul.f32 %v9094_v12, %v5287_v8 }
0x189f   :  { %v10262_v22 = vadd.f32 %v5289_v21, %v5288_v20 }
0x18a1   :  { %5291 = vst.msk [vmem:[#allocation2 + $0x30] sm:$0xff] %vm352_vm3, %v10262_v22  ;;  %7399 = vmatmul.mubr.msk.f32.vlgmr.msra.gmra.mrb[60].mxu0 %vm352_vm3, %v10262_v22  ;;  %8064 = vmatmul.mubr.msk.f32.vlgmr.msra.gmra.mrb[72].mxu1 %vm352_vm3, %v10262_v22 }
0x18a2   :  { %8587 = vmatpush1.bf16.msra.mxu1 %v8586_v40  ;;  %8595 = vmatpush3.bf16.msra.mxu0 %v8592_v36  ;;  %v5479_v36 = vld [vmem:[#allocation5 + $0x88] sm:$0xff] }
0x18a3   :  { %8074 = vmatprep.mubr.msk.f32.mxu0 %vm352_vm3, %v5489_v7  ;;  %8589 = vmatprep.subr.bf16.mxu1 %v8588_v25  ;;  %v10303_v6 = vpack.c.bf16 %v5479_v36, %v5476_v13 }
0x18a4   :  { %8597 = vmatprep.subr.bf16.mxu0 %v8596_v37  ;;  %5601 = vmatprep.mubr.f32.mxu1 %v9237_v0 }
0x18a6   :  { %8591 = vmatpush1.bf16.msra.mxu1 %v8590_v30  ;;  %8599 = vmatpush3.bf16.msra.mxu0 %v8596_v37 }
0x18a7   :  { %8608 = vmatprep.subr.bf16.mxu0 %v9238_v23  ;;  %8601 = vmatprep.subr.bf16.mxu1 %v10293_v3 }
0x18a8   :  { %v5495_v53 = vld [vmem:[#allocation2 + $0x30] sm:$0xff] }
0x18a9   :  { %7403 = vmatmul.mubr.msk.f32.vlgmr.msra.gmra.mrb[74].mxu1 %vm352_vm3, %v5489_v7  ;;  %8075 = vmatmul.mubr.msk.f32.vlgmr.msra.gmra.mrb[62].mxu0 %vm352_vm3, %v5490_v52 }
0x18aa   :  { %8077 = vmatprep.mubr.msk.f32.mxu0 %vm352_vm3, %v5491_v38  ;;  %5607 = vmatprep.mubr.f32.mxu1 %v9237_v0 }
0x18ab   :  { %8603 = vmatpush1.bf16.msra.mxu1 %v10295_v45  ;;  %8610 = vmatpush3.bf16.msra.mxu0 %v10303_v6 }
0x18ac   :  { %8605 = vmatprep.subr.bf16.mxu1 %v10297_v60  ;;  %8611 = vmatprep.subr.bf16.mxu0 %v9238_v23 }
0x18ad   :  { %7404 = vmatmul.mubr.msk.f32.gmra.mrb[76].mxu1 %vm352_vm3, %v5490_v52  ;;  %8078 = vmatmul.mubr.msk.f32.gmra.mrb[64].mxu0 %vm352_vm3, %v5492_v47 }
0x18ae   :  { %8080 = vmatprep.mubr.msk.f32.mxu0 %vm352_vm3, %v5493_v41  ;;  %5613 = vmatprep.mubr.f32.mxu1 %v9237_v0 }
0x18af   :  { %8607 = vmatpush1.bf16.msra.mxu1 %v10301_v16  ;;  %8613 = vmatpush3.bf16.msra.mxu0 %v10309_v24 }
0x18b0   :  { %8615 = vmatprep.subr.bf16.mxu1 %v10293_v3  ;;  %8622 = vmatprep.subr.bf16.mxu0 %v9238_v23 }
0x18b1   :  { %7405 = vmatmul.mubr.msk.f32.gmra.mrb[78].mxu1 %vm352_vm3, %v5491_v38  ;;  %8081 = vmatmul.mubr.msk.f32.gmra.mrb[66].mxu0 %vm352_vm3, %v5494_v61 }
0x18b2   :  { %8083 = vmatprep.mubr.msk.f32.mxu0 %vm352_vm3, %v5495_v53  ;;  %5619 = vmatprep.mubr.f32.mxu1 %v9237_v0 }
0x18b5   :  { %7406 = vmatmul.mubr.msk.f32.gmra.mrb[80].mxu1 %vm352_vm3, %v5492_v47 }
0x18b6   :  { %5625 = vmatprep.mubr.f32.mxu1 %v9237_v0 }
0x18b9   :  { %7407 = vmatmul.mubr.msk.f32.gmra.mrb[82].mxu1 %vm352_vm3, %v5493_v41 }
0x18ba   :  { %5631 = vmatprep.mubr.f32.mxu1 %v9237_v0 }
0x18bd   :  { %7408 = vmatmul.mubr.msk.f32.gmra.mrb[84].mxu1 %vm352_vm3, %v5494_v61 }
0x18be   :  { %5637 = vmatprep.mubr.f32.mxu1 %v9237_v0 }
0x18c1   :  { %7409 = vmatmul.mubr.msk.f32.gmra.mrb[86].mxu1 %vm352_vm3, %v5495_v53 }
0x18c2   :  { %5643 = vmatprep.mubr.f32.mxu1 %v9237_v0 }
0x1974   :  { %v5364_v55 = vpop.f32.mrb[60].mxu0  ;;  %v5435_v28 = vpop.f32.mrb[72].mxu1 }
0x1975   :  { %v8772_v19 = vadd.f32 %v5364_v55, %v10143_v11  ;;  %v5366_v18 = vpop.f32.mrb[61].mxu0  ;;  %v8065_v44 = vpop.f32.mrb[73].mxu1  ;;  %v5453_v15 = vadd.f32 %v5435_v28, %v10152_v4 }
0x1976   :  { %v8773_v1 = vadd.f32 %v5366_v18, %v10146_v63 }
0x1977   :  { %v7401_v58 = vmul.f32 -1.442695, %v8772_v19 }
0x1978   :  { %v7402_v2 = vmul.f32 -1.442695, %v8773_v1 }
0x1979   :  { %9095 = vpow2.f32 %v7401_v58 }
0x197a   :  { %9097 = vpow2.f32 %v7402_v2 }
0x197c   :  { %v10316_v14 = vpop.f32.mrb[62].mxu0 }
0x197d   :  { %v10318_v50 = vpop.f32.mrb[63].mxu0 }
0x1980   :  { %v10320_v9 = vpop.f32.mrb[64].mxu0 }
0x1981   :  { %v10322_v5 = vpop.f32.mrb[65].mxu0 }
0x1983   :  { %v9096_v8 = vpop.eup %9095 }
0x1984   :  { %v5447_v29 = vadd.f32 1.0, %v9096_v8  ;;  %v10324_v10 = vpop.f32.mrb[66].mxu0  ;;  %v9098_v12 = vpop.eup %9097 }
0x1985   :  { %v10326_v11 = vpop.f32.mrb[67].mxu0  ;;  %v5448_v63 = vadd.f32 1.0, %v9098_v12 }
0x1986   :  { %9099 = vrcp.f32 %v5447_v29 }
0x1987   :  { %9101 = vrcp.f32 %v5448_v63 }
0x1990   :  { %v9100_v17 = vpop.eup %9099 }
0x1991   :  { %v5454_v20 = vmul.f32 %v9100_v17, %v5453_v15  ;;  %v9102_v48 = vpop.eup %9101 }
0x1992   :  { %v5457_v33 = vsub.f32 1.0, %v9102_v48  ;;  %v5459_v34 = vmul.f32 %v9102_v48, %v10262_v22 }
0x1993   :  { %v5455_v21 = vadd.f32 %v5454_v20, %v10137_v54  ;;  %v5487_v54 = vld [vmem:[#allocation5 + $0xc0] ss:$8 sm:$0x7] }
0x1994   :  { %v10357_v7 = vrot.slane %v5487_v54, %v9416_v46  ;;  %v10360_v38 = vrot.slane %v5487_v54, %v9420_v49  ;;  %v10367_v59 = vrot.slane %v5487_v54, %v9405_v35 }
0x1995   :  { %9103 = vtanh.f32 %v5455_v21 }
0x1996   :  { %v5717_v13 = vadd.f32 %v10318_v50, %v10367_v59  ;;  %v5722_v48 = vadd.f32 %v10316_v14, %v10367_v59 }
0x199f   :  { %v9104_v40 = vpop.eup %9103 }
0x19a0   :  { %v5458_v25 = vmul.f32 %v9104_v40, %v5457_v33 }
0x19a2   :  { %v5460_v27 = vadd.f32 %v5459_v34, %v5458_v25 }
0x19a4   :  { %5461 = vst.msk [vmem:[#allocation2 + $0x38] sm:$0xff] %vm352_vm3, %v5460_v27 }
0x19ab   :  { %v5496_v37 = vld [vmem:[#allocation2 + $0x38] sm:$0xff] }
0x19ac   :  { %7410 = vmatmul.mubr.msk.f32.gmra.mrb[88].mxu1 %vm352_vm3, %v5496_v37  ;;  %8084 = vmatmul.mubr.msk.f32.gmra.mrb[68].mxu0 %vm352_vm3, %v5496_v37 }
0x19ad   :  { %5819 = vmatprep.mubr.f32.mxu1 %v9237_v0  ;;  %8094 = vmatprep.mubr.msk.f32.mxu0 %vm9239_vm2, %v9237_v0 }
0x19b0   :  { %7419 = vmatmul.mubr.msk.f32.vlgmr.msra.gmra.mrb[74].mxu1 %vm352_vm3, %v10098_v42  ;;  %8095 = vmatmul.mubr.msk.f32.vlgmr.msra.gmra.mrb[70].mxu0 %vm352_vm3, %v10098_v42 }
0x19b1   :  { %8617 = vmatpush1.bf16.msra.mxu1 %v10295_v45  ;;  %8624 = vmatpush3.bf16.msra.mxu0 %v10303_v6 }
0x19b2   :  { %8619 = vmatprep.subr.bf16.mxu1 %v10297_v60  ;;  %8625 = vmatprep.subr.bf16.mxu0 %v9238_v23 }
0x19b3   :  { %5986 = vmatprep.mubr.f32.mxu1 %v9237_v0  ;;  %8105 = vmatprep.mubr.msk.f32.mxu0 %vm9239_vm2, %v9237_v0 }
0x19b5   :  { %8621 = vmatpush1.bf16.msra.mxu1 %v10301_v16  ;;  %8627 = vmatpush3.bf16.msra.mxu0 %v10309_v24 }
0x19b6   :  { %8629 = vmatprep.subr.bf16.mxu1 %v10293_v3  ;;  %8636 = vmatprep.subr.bf16.mxu0 %v9238_v23 }
0x1a7f   :  { %v10352_v4 = vpop.f32.mrb[68].mxu0 }
0x1a80   :  { %v10354_v22 = vpop.f32.mrb[69].mxu0 }
0x1a83   :  { %v5821_v30 = vpop.f32.mrb[74].mxu1  ;;  %v5892_v52 = vpop.f32.mrb[70].mxu0 }
0x1a84   :  { %v8774_v47 = vadd.f32 %v5821_v30, %v10357_v7  ;;  %v5823_v41 = vpop.f32.mrb[75].mxu1  ;;  %v8096_v61 = vpop.f32.mrb[71].mxu0  ;;  %v5910_v62 = vadd.f32 %v5892_v52, %v10364_v57 }
0x1a85   :  { %v8775_v32 = vadd.f32 %v5823_v41, %v10360_v38 }
0x1a86   :  { %v7421_v53 = vmul.f32 -1.442695, %v8774_v47 }
0x1a87   :  { %v7422_v39 = vmul.f32 -1.442695, %v8775_v32 }
0x1a88   :  { %9105 = vpow2.f32 %v7421_v53 }
0x1a89   :  { %9107 = vpow2.f32 %v7422_v39 }
0x1a92   :  { %v9106_v43 = vpop.eup %9105 }
0x1a93   :  { %v5904_v51 = vadd.f32 1.0, %v9106_v43  ;;  %v9108_v46 = vpop.eup %9107 }
0x1a94   :  { %v5905_v49 = vadd.f32 1.0, %v9108_v46 }
0x1a95   :  { %9109 = vrcp.f32 %v5904_v51 }
0x1a96   :  { %9111 = vrcp.f32 %v5905_v49 }
0x1a9f   :  { %v9110_v26 = vpop.eup %9109 }
0x1aa0   :  { %v5911_v36 = vmul.f32 %v9110_v26, %v5910_v62  ;;  %v9112_v56 = vpop.eup %9111 }
0x1aa1   :  { %v5914_v55 = vsub.f32 1.0, %v9112_v56  ;;  %v5916_v18 = vmul.f32 %v9112_v56, %v10098_v42 }
0x1aa2   :  { %v5912_v31 = vadd.f32 %v5911_v36, %v5717_v13  ;;  %v5727_v13 = vadd.f32 %v10322_v5, %v10367_v59 }
0x1aa4   :  { %9113 = vtanh.f32 %v5912_v31 }
0x1aae   :  { %v9114_v28 = vpop.eup %9113 }
0x1aaf   :  { %v5915_v19 = vmul.f32 %v9114_v28, %v5914_v55 }
0x1ab1   :  { %v5917_v44 = vadd.f32 %v5916_v18, %v5915_v19 }
0x1ab3   :  { %5918 = vst.msk [vmem:[#allocation2] sm:$0xff] %vm352_vm3, %v5917_v44  ;;  %7423 = vmatmul.mubr.msk.f32.vlgmr.msra.gmra.mrb[76].mxu1 %vm352_vm3, %v5917_v44  ;;  %8106 = vmatmul.mubr.msk.f32.vlgmr.msra.gmra.mrb[72].mxu0 %vm352_vm3, %v5917_v44 }
0x1ab4   :  { %8631 = vmatpush1.bf16.msra.mxu1 %v10295_v45  ;;  %8638 = vmatpush3.bf16.msra.mxu0 %v10303_v6 }
0x1ab5   :  { %8633 = vmatprep.subr.bf16.mxu1 %v10297_v60  ;;  %8639 = vmatprep.subr.bf16.mxu0 %v9238_v23 }
0x1ab6   :  { %6153 = vmatprep.mubr.f32.mxu1 %v9237_v0  ;;  %8116 = vmatprep.mubr.msk.f32.mxu0 %vm9239_vm2, %v9237_v0 }
0x1ab8   :  { %8635 = vmatpush1.bf16.msra.mxu1 %v10301_v16  ;;  %8641 = vmatpush3.bf16.msra.mxu0 %v10309_v24 }
0x1ab9   :  { %8643 = vmatprep.subr.bf16.mxu1 %v10293_v3  ;;  %8650 = vmatprep.subr.bf16.mxu0 %v9238_v23 }
0x1b86   :  { %v5988_v35 = vpop.f32.mrb[76].mxu1  ;;  %v6059_v42 = vpop.f32.mrb[72].mxu0 }
0x1b87   :  { %v8776_v58 = vadd.f32 %v5988_v35, %v10357_v7  ;;  %v5990_v1 = vpop.f32.mrb[77].mxu1  ;;  %v8107_v2 = vpop.f32.mrb[73].mxu0  ;;  %v6077_v20 = vadd.f32 %v6059_v42, %v10364_v57 }
0x1b88   :  { %v8777_v8 = vadd.f32 %v5990_v1, %v10360_v38 }
0x1b89   :  { %v7425_v50 = vmul.f32 -1.442695, %v8776_v58 }
0x1b8a   :  { %v7426_v29 = vmul.f32 -1.442695, %v8777_v8 }
0x1b8b   :  { %9115 = vpow2.f32 %v7425_v50 }
0x1b8c   :  { %9117 = vpow2.f32 %v7426_v29 }
0x1b95   :  { %v9116_v12 = vpop.eup %9115 }
0x1b96   :  { %v6071_v63 = vadd.f32 1.0, %v9116_v12  ;;  %v9118_v15 = vpop.eup %9117 }
0x1b97   :  { %v6072_v17 = vadd.f32 1.0, %v9118_v15 }
0x1b98   :  { %9119 = vrcp.f32 %v6071_v63 }
0x1b99   :  { %9121 = vrcp.f32 %v6072_v17 }
0x1ba2   :  { %v9120_v21 = vpop.eup %9119 }
0x1ba3   :  { %v6078_v33 = vmul.f32 %v9120_v21, %v6077_v20  ;;  %v9122_v25 = vpop.eup %9121  ;;  %v5732_v21 = vadd.f32 %v10320_v9, %v10367_v59 }
0x1ba4   :  { %v6081_v34 = vsub.f32 1.0, %v9122_v25  ;;  %v6083_v54 = vmul.f32 %v9122_v25, %v5917_v44 }
0x1ba5   :  { %v6079_v40 = vadd.f32 %v6078_v33, %v5722_v48 }
0x1ba7   :  { %9123 = vtanh.f32 %v6079_v40 }
0x1bb1   :  { %v9124_v27 = vpop.eup %9123 }
0x1bb2   :  { %v6082_v37 = vmul.f32 %v9124_v27, %v6081_v34 }
0x1bb4   :  { %v6084_v30 = vadd.f32 %v6083_v54, %v6082_v37 }
0x1bb6   :  { %6085 = vst.msk [vmem:[#allocation2 + $0x8] sm:$0xff] %vm352_vm3, %v6084_v30  ;;  %7427 = vmatmul.mubr.msk.f32.vlgmr.msra.gmra.mrb[78].mxu1 %vm352_vm3, %v6084_v30  ;;  %8117 = vmatmul.mubr.msk.f32.vlgmr.msra.gmra.mrb[74].mxu0 %vm352_vm3, %v6084_v30 }
0x1bb7   :  { %8645 = vmatpush1.bf16.msra.mxu1 %v10295_v45  ;;  %8652 = vmatpush3.bf16.msra.mxu0 %v10303_v6 }
0x1bb8   :  { %8647 = vmatprep.subr.bf16.mxu1 %v10297_v60  ;;  %8653 = vmatprep.subr.bf16.mxu0 %v9238_v23 }
0x1bb9   :  { %6320 = vmatprep.mubr.f32.mxu1 %v9237_v0  ;;  %8127 = vmatprep.mubr.msk.f32.mxu0 %vm9239_vm2, %v9237_v0 }
0x1bbb   :  { %8649 = vmatpush1.bf16.msra.mxu1 %v10301_v16  ;;  %8655 = vmatpush3.bf16.msra.mxu0 %v10309_v24 }
0x1bbc   :  { %8657 = vmatprep.subr.bf16.mxu1 %v10293_v3  ;;  %8664 = vmatprep.subr.bf16.mxu0 %v9238_v23 }
0x1c89   :  { %v6155_v14 = vpop.f32.mrb[78].mxu1  ;;  %v6226_v52 = vpop.f32.mrb[74].mxu0 }
0x1c8a   :  { %v8778_v47 = vadd.f32 %v6155_v14, %v10357_v7  ;;  %v6157_v41 = vpop.f32.mrb[79].mxu1  ;;  %v8118_v61 = vpop.f32.mrb[75].mxu0  ;;  %v6244_v62 = vadd.f32 %v6226_v52, %v10364_v57 }
0x1c8b   :  { %v8779_v32 = vadd.f32 %v6157_v41, %v10360_v38 }
0x1c8c   :  { %v7429_v53 = vmul.f32 -1.442695, %v8778_v47 }
0x1c8d   :  { %v7430_v39 = vmul.f32 -1.442695, %v8779_v32 }
0x1c8e   :  { %9125 = vpow2.f32 %v7429_v53 }
0x1c8f   :  { %9127 = vpow2.f32 %v7430_v39 }
0x1c98   :  { %v9126_v43 = vpop.eup %9125 }
0x1c99   :  { %v6238_v51 = vadd.f32 1.0, %v9126_v43  ;;  %v9128_v46 = vpop.eup %9127 }
0x1c9a   :  { %v6239_v49 = vadd.f32 1.0, %v9128_v46 }
0x1c9b   :  { %9129 = vrcp.f32 %v6238_v51 }
0x1c9c   :  { %9131 = vrcp.f32 %v6239_v49 }
0x1ca5   :  { %v9130_v26 = vpop.eup %9129 }
0x1ca6   :  { %v6245_v36 = vmul.f32 %v9130_v26, %v6244_v62  ;;  %v9132_v56 = vpop.eup %9131  ;;  %v5737_v62 = vadd.f32 %v10326_v11, %v10367_v59 }
0x1ca7   :  { %v6248_v55 = vsub.f32 1.0, %v9132_v56  ;;  %v6250_v18 = vmul.f32 %v9132_v56, %v6084_v30 }
0x1ca8   :  { %v6246_v31 = vadd.f32 %v6245_v36, %v5727_v13 }
0x1caa   :  { %9133 = vtanh.f32 %v6246_v31 }
0x1cb4   :  { %v9134_v28 = vpop.eup %9133 }
0x1cb5   :  { %v6249_v19 = vmul.f32 %v9134_v28, %v6248_v55 }
0x1cb7   :  { %v6251_v44 = vadd.f32 %v6250_v18, %v6249_v19 }
0x1cb9   :  { %6252 = vst.msk [vmem:[#allocation2 + $0x10] sm:$0xff] %vm352_vm3, %v6251_v44  ;;  %7431 = vmatmul.mubr.msk.f32.vlgmr.msra.gmra.mrb[80].mxu1 %vm352_vm3, %v6251_v44  ;;  %8128 = vmatmul.mubr.msk.f32.vlgmr.msra.gmra.mrb[76].mxu0 %vm352_vm3, %v6251_v44 }
0x1cba   :  { %8659 = vmatpush1.bf16.msra.mxu1 %v10295_v45  ;;  %8666 = vmatpush3.bf16.msra.mxu0 %v10303_v6 }
0x1cbb   :  { %8661 = vmatprep.subr.bf16.mxu1 %v10297_v60  ;;  %8667 = vmatprep.subr.bf16.mxu0 %v9238_v23 }
0x1cbc   :  { %6487 = vmatprep.mubr.f32.mxu1 %v9237_v0  ;;  %8138 = vmatprep.mubr.msk.f32.mxu0 %vm9239_vm2, %v9237_v0 }
0x1cbe   :  { %8663 = vmatpush1.bf16.msra.mxu1 %v10301_v16  ;;  %8669 = vmatpush3.bf16.msra.mxu0 %v10309_v24 }
0x1cbf   :  { %8671 = vmatprep.subr.bf16.mxu1 %v10293_v3  ;;  %8678 = vmatprep.subr.bf16.mxu0 %v9238_v23 }
0x1d8c   :  { %v6322_v5 = vpop.f32.mrb[80].mxu1  ;;  %v6393_v35 = vpop.f32.mrb[76].mxu0 }
0x1d8d   :  { %v8780_v42 = vadd.f32 %v6322_v5, %v10357_v7  ;;  %v6324_v58 = vpop.f32.mrb[81].mxu1  ;;  %v8129_v1 = vpop.f32.mrb[77].mxu0  ;;  %v6411_v17 = vadd.f32 %v6393_v35, %v10364_v57 }
0x1d8e   :  { %v8781_v50 = vadd.f32 %v6324_v58, %v10360_v38 }
0x1d8f   :  { %v7433_v2 = vmul.f32 -1.442695, %v8780_v42 }
0x1d90   :  { %v7434_v8 = vmul.f32 -1.442695, %v8781_v50 }
0x1d91   :  { %9135 = vpow2.f32 %v7433_v2 }
0x1d92   :  { %9137 = vpow2.f32 %v7434_v8 }
0x1d9b   :  { %v9136_v29 = vpop.eup %9135 }
0x1d9c   :  { %v6405_v12 = vadd.f32 1.0, %v9136_v29  ;;  %v9138_v63 = vpop.eup %9137 }
0x1d9d   :  { %v6406_v15 = vadd.f32 1.0, %v9138_v63  ;;  %v5742_v63 = vadd.f32 %v10324_v10, %v10367_v59  ;;  %v3327_v10 = vld [vmem:[%s10562_s7 + $0x80] sm:$0xff] }
0x1d9e   :  { %9139 = vrcp.f32 %v6405_v12 }
0x1d9f   :  { %9141 = vrcp.f32 %v6406_v15 }
0x1da8   :  { %v9140_v20 = vpop.eup %9139 }
0x1da9   :  { %v6412_v48 = vmul.f32 %v9140_v20, %v6411_v17  ;;  %v9142_v40 = vpop.eup %9141 }
0x1daa   :  { %v6415_v25 = vsub.f32 1.0, %v9142_v40  ;;  %v6417_v37 = vmul.f32 %v9142_v40, %v6251_v44 }
0x1dab   :  { %v6413_v33 = vadd.f32 %v6412_v48, %v5732_v21 }
0x1dad   :  { %9143 = vtanh.f32 %v6413_v33 }
0x1db7   :  { %v9144_v34 = vpop.eup %9143 }
0x1db8   :  { %v6416_v27 = vmul.f32 %v9144_v34, %v6415_v25 }
0x1dba   :  { %v6418_v54 = vadd.f32 %v6417_v37, %v6416_v27 }
0x1dbc   :  { %6419 = vst.msk [vmem:[#allocation2 + $0x18] sm:$0xff] %vm352_vm3, %v6418_v54  ;;  %7435 = vmatmul.mubr.msk.f32.vlgmr.msra.gmra.mrb[82].mxu1 %vm352_vm3, %v6418_v54  ;;  %8139 = vmatmul.mubr.msk.f32.vlgmr.msra.gmra.mrb[78].mxu0 %vm352_vm3, %v6418_v54 }
0x1dbd   :  { %8673 = vmatpush1.bf16.msra.mxu1 %v10295_v45  ;;  %8680 = vmatpush3.bf16.msra.mxu0 %v10303_v6 }
0x1dbe   :  { %8675 = vmatprep.subr.bf16.mxu1 %v10297_v60  ;;  %8681 = vmatprep.subr.bf16.mxu0 %v9238_v23 }
0x1dbf   :  { %6654 = vmatprep.mubr.f32.mxu1 %v9237_v0  ;;  %8149 = vmatprep.mubr.msk.f32.mxu0 %vm9239_vm2, %v9237_v0 }
0x1dc1   :  { %8677 = vmatpush1.bf16.msra.mxu1 %v10301_v16  ;;  %8683 = vmatpush3.bf16.msra.mxu0 %v10309_v24 }
0x1dc2   :  { %8685 = vmatprep.subr.bf16.mxu1 %v10293_v3  ;;  %8692 = vmatprep.subr.bf16.mxu0 %v9238_v23 }
0x1e8f   :  { %v6489_v9 = vpop.f32.mrb[82].mxu1  ;;  %v6560_v30 = vpop.f32.mrb[78].mxu0 }
0x1e90   :  { %v8782_v14 = vadd.f32 %v6489_v9, %v10357_v7  ;;  %v6491_v52 = vpop.f32.mrb[83].mxu1  ;;  %v8140_v47 = vpop.f32.mrb[79].mxu0  ;;  %v6578_v46 = vadd.f32 %v6560_v30, %v10364_v57 }
0x1e91   :  { %v8783_v61 = vadd.f32 %v6491_v52, %v10360_v38 }
0x1e92   :  { %v7437_v41 = vmul.f32 -1.442695, %v8782_v14 }
0x1e93   :  { %v7438_v53 = vmul.f32 -1.442695, %v8783_v61 }
0x1e94   :  { %9145 = vpow2.f32 %v7437_v41  ;;  %v5747_v41 = vadd.f32 %v10354_v22, %v10367_v59 }
0x1e95   :  { %9147 = vpow2.f32 %v7438_v53 }
0x1e9e   :  { %v9146_v32 = vpop.eup %9145 }
0x1e9f   :  { %v6572_v39 = vadd.f32 1.0, %v9146_v32  ;;  %v9148_v43 = vpop.eup %9147 }
0x1ea0   :  { %v6573_v51 = vadd.f32 1.0, %v9148_v43 }
0x1ea1   :  { %9149 = vrcp.f32 %v6572_v39 }
0x1ea2   :  { %9151 = vrcp.f32 %v6573_v51  ;;  %v3329_v51 = vld [vmem:[%s10562_s7 + $0x90] sm:$0xff] }
0x1eab   :  { %v9150_v49 = vpop.eup %9149 }
0x1eac   :  { %v6579_v26 = vmul.f32 %v9150_v49, %v6578_v46  ;;  %v9152_v36 = vpop.eup %9151  ;;  %v3330_v46 = vld [vmem:[%s10562_s7 + $0x98] sm:$0xff] }
0x1ead   :  { %v6582_v31 = vsub.f32 1.0, %v9152_v36  ;;  %v6584_v28 = vmul.f32 %v9152_v36, %v6418_v54  ;;  %v8716_v22 = vpack.c.bf16 %v3330_v46, %v3329_v51  ;;  %v7089_v36 = vld [vmem:[#allocation2 + $0x8] sm:$0xff] }
0x1eae   :  { %v6580_v13 = vadd.f32 %v6579_v26, %v5737_v62 }
0x1eb0   :  { %9153 = vtanh.f32 %v6580_v13  ;;  %v7088_v13 = vld [vmem:[#allocation2] sm:$0xff] }
0x1eba   :  { %v9154_v56 = vpop.eup %9153 }
0x1ebb   :  { %v6583_v55 = vmul.f32 %v9154_v56, %v6582_v31  ;;  %v7090_v31 = vld [vmem:[#allocation2 + $0x10] sm:$0xff]  ;;  %v7091_v56 = vld [vmem:[#allocation2 + $0x18] sm:$0xff] }
0x1ebd   :  { %v6585_v19 = vadd.f32 %v6584_v28, %v6583_v55 }
0x1ebf   :  { %6586 = vst.msk [vmem:[#allocation2 + $0x20] sm:$0xff] %vm352_vm3, %v6585_v19  ;;  %7439 = vmatmul.mubr.msk.f32.vlgmr.msra.gmra.mrb[84].mxu1 %vm352_vm3, %v6585_v19  ;;  %8150 = vmatmul.mubr.msk.f32.vlgmr.msra.gmra.mrb[80].mxu0 %vm352_vm3, %v6585_v19 }
0x1ec0   :  { %8687 = vmatpush1.bf16.msra.mxu1 %v10295_v45  ;;  %8694 = vmatpush3.bf16.msra.mxu0 %v10303_v6 }
0x1ec1   :  { %8689 = vmatprep.subr.bf16.mxu1 %v10297_v60  ;;  %8695 = vmatprep.subr.bf16.mxu0 %v9238_v23 }
0x1ec2   :  { %6821 = vmatprep.mubr.f32.mxu1 %v9237_v0  ;;  %8160 = vmatprep.mubr.msk.f32.mxu0 %vm9239_vm2, %v9237_v0 }
0x1ec4   :  { %8691 = vmatpush1.bf16.msra.mxu1 %v10301_v16  ;;  %8697 = vmatpush3.bf16.msra.mxu0 %v10309_v24 }
0x1ec5   :  { %8706 = vmatprep.subr.bf16.mxu0 %v9238_v23  ;;  %8699 = vmatprep.subr.bf16.mxu1 %v10293_v3 }
0x1ec6   :  { %v7092_v55 = vld [vmem:[#allocation2 + $0x20] sm:$0xff] }
0x1f92   :  { %v6656_v11 = vpop.f32.mrb[84].mxu1  ;;  %v6727_v18 = vpop.f32.mrb[80].mxu0 }
0x1f93   :  { %v8784_v44 = vadd.f32 %v6656_v11, %v10357_v7  ;;  %v6658_v5 = vpop.f32.mrb[85].mxu1  ;;  %v8151_v35 = vpop.f32.mrb[81].mxu0  ;;  %v6745_v12 = vadd.f32 %v6727_v18, %v10364_v57 }
0x1f94   :  { %v8785_v58 = vadd.f32 %v6658_v5, %v10360_v38 }
0x1f95   :  { %v7441_v42 = vmul.f32 -1.442695, %v8784_v44 }
0x1f96   :  { %v7442_v1 = vmul.f32 -1.442695, %v8785_v58 }
0x1f97   :  { %9155 = vpow2.f32 %v7441_v42 }
0x1f98   :  { %9157 = vpow2.f32 %v7442_v1  ;;  %v7451_v1 = vld [vmem:[%s10562_s7 + $0xa4] ss:$0 sm:$0xff] }
0x1fa1   :  { %v9156_v2 = vpop.eup %9155 }
0x1fa2   :  { %v6739_v50 = vadd.f32 1.0, %v9156_v2  ;;  %v9158_v8 = vpop.eup %9157 }
0x1fa3   :  { %v6740_v29 = vadd.f32 1.0, %v9158_v8 }
0x1fa4   :  { %9159 = vrcp.f32 %v6739_v50 }
0x1fa5   :  { %9161 = vrcp.f32 %v6740_v29 }
0x1fae   :  { %v9160_v3 = vpop.eup %9159 }
0x1faf   :  { %v6746_v15 = vmul.f32 %v9160_v3, %v6745_v12  ;;  %v9162_v20 = vpop.eup %9161 }
0x1fb0   :  { %v6749_v21 = vsub.f32 1.0, %v9162_v20  ;;  %v6751_v40 = vmul.f32 %v9162_v20, %v6585_v19 }
0x1fb1   :  { %v6747_v17 = vadd.f32 %v6746_v15, %v5742_v63 }
0x1fb3   :  { %9163 = vtanh.f32 %v6747_v17 }
0x1fbd   :  { %v9164_v48 = vpop.eup %9163 }
0x1fbe   :  { %v6750_v33 = vmul.f32 %v9164_v48, %v6749_v21 }
0x1fc0   :  { %v6752_v25 = vadd.f32 %v6751_v40, %v6750_v33 }
0x1fc2   :  { %6753 = vst.msk [vmem:[#allocation2 + $0x28] sm:$0xff] %vm352_vm3, %v6752_v25  ;;  %7443 = vmatmul.mubr.msk.f32.vlgmr.msra.gmra.mrb[86].mxu1 %vm352_vm3, %v6752_v25  ;;  %8161 = vmatmul.mubr.msk.f32.vlgmr.msra.gmra.mrb[82].mxu0 %vm352_vm3, %v6752_v25 }
0x1fc3   :  { %8708 = vmatpush3.bf16.msra.mxu0 %v10303_v6  ;;  %8701 = vmatpush1.bf16.msra.mxu1 %v10295_v45  ;;  %v3328_v45 = vld [vmem:[%s10562_s7 + $0x88] sm:$0xff] }
0x1fc4   :  { %8709 = vmatprep.subr.bf16.mxu0 %v9238_v23  ;;  %8703 = vmatprep.subr.bf16.mxu1 %v10297_v60  ;;  %v8712_v23 = vpack.c.bf16 %v3328_v45, %v3327_v10 }
0x1fc5   :  { %6988 = vmatprep.mubr.f32.mxu1 %v9237_v0  ;;  %8171 = vmatprep.mubr.msk.f32.mxu0 %vm9239_vm2, %v9237_v0 }
0x1fc7   :  { %8711 = vmatpush3.bf16.msra.mxu0 %v10309_v24  ;;  %8705 = vmatpush1.bf16.msra.mxu1 %v10301_v16 }
0x1fc8   :  { %8713 = vmatprep.subr.bf16.mxu0 %v8712_v23 }
0x1fc9   :  { %v7093_v28 = vld [vmem:[#allocation2 + $0x28] sm:$0xff] }
0x2095   :  { %v6823_v60 = vpop.f32.mrb[86].mxu1  ;;  %v6894_v6 = vpop.f32.mrb[82].mxu0 }
0x2096   :  { %v8786_v34 = vadd.f32 %v6823_v60, %v10357_v7  ;;  %v6825_v27 = vpop.f32.mrb[87].mxu1  ;;  %v8162_v0 = vpop.f32.mrb[83].mxu0  ;;  %v6912_v52 = vadd.f32 %v6894_v6, %v10364_v57 }
0x2097   :  { %v8787_v24 = vadd.f32 %v6825_v27, %v10360_v38 }
0x2098   :  { %v7445_v37 = vmul.f32 -1.442695, %v8786_v34 }
0x2099   :  { %v7446_v16 = vmul.f32 -1.442695, %v8787_v24 }
0x209a   :  { %9165 = vpow2.f32 %v7445_v37 }
0x209b   :  { %9167 = vpow2.f32 %v7446_v16 }
0x20a4   :  { %v9166_v54 = vpop.eup %9165 }
0x20a5   :  { %v6906_v9 = vadd.f32 1.0, %v9166_v54  ;;  %v9168_v30 = vpop.eup %9167 }
0x20a6   :  { %v6907_v14 = vadd.f32 1.0, %v9168_v30 }
0x20a7   :  { %9169 = vrcp.f32 %v6906_v9 }
0x20a8   :  { %9171 = vrcp.f32 %v6907_v14 }
0x20b1   :  { %v9170_v47 = vpop.eup %9169 }
0x20b2   :  { %v6913_v61 = vmul.f32 %v9170_v47, %v6912_v52  ;;  %v9172_v32 = vpop.eup %9171 }
0x20b3   :  { %v6916_v39 = vsub.f32 1.0, %v9172_v32  ;;  %v6918_v62 = vmul.f32 %v9172_v32, %v6752_v25 }
0x20b4   :  { %v6914_v53 = vadd.f32 %v6913_v61, %v5747_v41 }
0x20b6   :  { %9173 = vtanh.f32 %v6914_v53 }
0x20c0   :  { %v9174_v43 = vpop.eup %9173 }
0x20c1   :  { %v6917_v49 = vmul.f32 %v9174_v43, %v6916_v39 }
0x20c3   :  { %v10497_v26 = vadd.f32 %v6918_v62, %v6917_v49 }
0x20c5   :  { %6920 = vst.msk [vmem:[#allocation2 + $0x30] sm:$0xff] %vm352_vm3, %v10497_v26  ;;  %7447 = vmatmul.mubr.msk.f32.vlgmr.msra.gmra.mrb[88].mxu1 %vm352_vm3, %v10497_v26  ;;  %8172 = vmatmul.mubr.msk.f32.vlgmr.msra.gmra.mrb[84].mxu0 %vm352_vm3, %v10497_v26 }
0x20c6   :  { %8715 = vmatpush3.bf16.msra.mxu0 %v8712_v23  ;;  %8182 = vmatprep.mubr.msk.f32.mxu0 %vm352_vm3, %v7088_v13  ;;  %v5752_v23 = vadd.f32 %v10352_v4, %v10367_v59 }
0x20c7   :  { %8717 = vmatprep.subr.bf16.mxu0 %v8716_v22 }
0x20ca   :  { %8719 = vmatpush3.bf16.msra.mxu0 %v8716_v22 }
0x20cc   :  { %v7094_v19 = vld [vmem:[#allocation2 + $0x30] sm:$0xff] }
0x20cd   :  { %8183 = vmatmul.mubr.msk.f32.vlgmr.msra.gmra.mrb[86].mxu0 %vm352_vm3, %v7089_v36 }
0x20ce   :  { %8185 = vmatprep.mubr.msk.f32.mxu0 %vm352_vm3, %v7090_v31 }
0x20d1   :  { %8186 = vmatmul.mubr.msk.f32.gmra.mrb[88].mxu0 %vm352_vm3, %v7091_v56 }
0x20d2   :  { %8188 = vmatprep.mubr.msk.f32.mxu0 %vm352_vm3, %v7092_v55 }
0x20d5   :  { %8189 = vmatmul.mubr.msk.f32.gmra.mrb[90].mxu0 %vm352_vm3, %v7093_v28 }
0x20d6   :  { %8191 = vmatprep.mubr.msk.f32.mxu0 %vm352_vm3, %v7094_v19 }
0x2198   :  { %v6990_v11 = vpop.f32.mrb[88].mxu1  ;;  %v7061_v18 = vpop.f32.mrb[84].mxu0 }
0x2199   :  { %v8788_v44 = vadd.f32 %v6990_v11, %v10357_v7  ;;  %v6992_v5 = vpop.f32.mrb[89].mxu1  ;;  %v8173_v35 = vpop.f32.mrb[85].mxu0  ;;  %v7079_v10 = vadd.f32 %v7061_v18, %v10364_v57 }
0x219a   :  { %v8789_v58 = vadd.f32 %v6992_v5, %v10360_v38 }
0x219b   :  { %v7449_v42 = vmul.f32 -1.442695, %v8788_v44 }
0x219c   :  { %v7450_v2 = vmul.f32 -1.442695, %v8789_v58 }
0x219d   :  { %9175 = vpow2.f32 %v7449_v42 }
0x219e   :  { %9177 = vpow2.f32 %v7450_v2 }
0x21a0   :  { %v8184_v50 = vpop.f32.mrb[86].mxu0 }
0x21a1   :  { %v7196_v8 = vadd.f32 %v8184_v50, %v7451_v1  ;;  %v7190_v29 = vpop.f32.mrb[87].mxu0 }
0x21a2   :  { %v7191_v12 = vadd.f32 %v7451_v1, %v7190_v29 }
0x21a3   :  { %7230 = vst.msk [vmem:[%s10563_s8 + $0x8] sm:$0xff] %vm99_vm1, %v7196_v8 }
0x21a4   :  { %7229 = vst.msk [vmem:[%s10563_s8] sm:$0xff] %vm99_vm1, %v7191_v12  ;;  %v8187_v7 = vpop.f32.mrb[88].mxu0 }
0x21a5   :  { %v7206_v38 = vadd.f32 %v8187_v7, %v7451_v1  ;;  %v7200_v3 = vpop.f32.mrb[89].mxu0 }
0x21a6   :  { %v7201_v63 = vadd.f32 %v7451_v1, %v7200_v3 }
0x21a7   :  { %v9176_v15 = vpop.eup %9175  ;;  %7232 = vst.msk [vmem:[%s10563_s8 + $0x18] sm:$0xff] %vm99_vm1, %v7206_v38 }
0x21a8   :  { %v7073_v17 = vadd.f32 1.0, %v9176_v15  ;;  %7231 = vst.msk [vmem:[%s10563_s8 + $0x10] sm:$0xff] %vm99_vm1, %v7201_v63  ;;  %v8190_v20 = vpop.f32.mrb[90].mxu0  ;;  %v9178_v40 = vpop.eup %9177 }
0x21a9   :  { %v7216_v21 = vadd.f32 %v8190_v20, %v7451_v1  ;;  %v7210_v48 = vpop.f32.mrb[91].mxu0  ;;  %v7074_v25 = vadd.f32 1.0, %v9178_v40 }
0x21aa   :  { %9179 = vrcp.f32 %v7073_v17  ;;  %v7211_v33 = vadd.f32 %v7451_v1, %v7210_v48 }
0x21ab   :  { %7234 = vst.msk [vmem:[%s10563_s8 + $0x28] sm:$0xff] %vm99_vm1, %v7216_v21  ;;  %9181 = vrcp.f32 %v7074_v25 }
0x21ac   :  { %7233 = vst.msk [vmem:[%s10563_s8 + $0x20] sm:$0xff] %vm99_vm1, %v7211_v33 }
0x21b4   :  { %v9180_v45 = vpop.eup %9179 }
0x21b5   :  { %v7080_v60 = vmul.f32 %v9180_v45, %v7079_v10  ;;  %v9182_v34 = vpop.eup %9181 }
0x21b6   :  { %v7083_v27 = vsub.f32 1.0, %v9182_v34  ;;  %v7085_v24 = vmul.f32 %v9182_v34, %v10497_v26 }
0x21b7   :  { %v7081_v6 = vadd.f32 %v7080_v60, %v5752_v23 }
0x21b9   :  { %9183 = vtanh.f32 %v7081_v6 }
0x21c3   :  { %v9184_v0 = vpop.eup %9183 }
0x21c4   :  { %v7084_v37 = vmul.f32 %v9184_v0, %v7083_v27 }
0x21c6   :  { %v7086_v16 = vadd.f32 %v7085_v24, %v7084_v37 }
0x21c8   :  { %7087 = vst.msk [vmem:[#allocation2 + $0x38] sm:$0xff] %vm352_vm3, %v7086_v16 }
0x21cf   :  { %v7095_v54 = vld [vmem:[#allocation2 + $0x38] sm:$0xff] }
0x21d0   :  { %8192 = vmatmul.mubr.msk.f32.gmra.mrb[92].mxu0 %vm352_vm3, %v7095_v54 }
0x22a3   :  { %v8193_v57 = vpop.f32.mrb[92].mxu0 }
0x22a4   :  { %v7226_v9 = vadd.f32 %v8193_v57, %v7451_v1  ;;  %v7220_v30 = vpop.f32.mrb[93].mxu0 }
0x22a5   :  { %v7221_v4 = vadd.f32 %v7451_v1, %v7220_v30 }
0x22a6   :  { %7236 = vst.msk [vmem:[%s10563_s8 + $0x38] sm:$0xff] %vm99_vm1, %v7226_v9 }
0x22a7   :  { %7235 = vst.msk [vmem:[%s10563_s8 + $0x30] sm:$0xff] %vm99_vm1, %v7221_v4 }
0x22a8   :  { %7241 = vsyncpa [#allocation4], 1 }
0x22a9   :  { %7242 = vsyncpa [#allocation6], 1 }

</bundles_post_ra>
